<compile_context>
chip_gen: v5e
topology: v5e:2x2
jax: 0.10.0
libtpu: 0.0.40
codegen_flags: <defaults>
</compile_context>

<pallas_src>
import math
import jax
import jax.numpy as jnp
from jax import lax
from jax.experimental import pallas as pl
from jax.experimental.pallas import tpu as pltpu

OCTAVE = 12
NUM_OCTAVES = 4
NUM_NOTES = OCTAVE * NUM_OCTAVES          # 48
NOTE_UNITS = 3
OCTAVE_UNITS = 64
POS_EMB_DIM = 20
KERNEL_SIZE = 2 * OCTAVE                  # 24
PAD_L = (2 * OCTAVE - 1) // 2             # 11
PAD_R = math.ceil((2 * OCTAVE - 1) / 2)   # 12

CIN = NUM_NOTES * NOTE_UNITS              # 144  raw note features per row
FEAT = OCTAVE_UNITS + POS_EMB_DIM + OCTAVE + 1   # 97 output features per note
FOUT = NUM_NOTES * FEAT                   # 4656 packed output lanes per row
KAUG = CIN + NUM_NOTES                    # 192  kernel input = notes + bins cols
TBT_DEFAULT = 512                         # (batch*time) rows per grid step
ROW_CHUNK = 128                           # in-kernel compute chunk (rows)


def _round_up(a, m):
    return (a + m - 1) // m * m


def _feature_kernel(x_ref, w_ref, c_ref, o_ref):
    """One grid step: fused conv+tanh+embeddings+bins for a block of rows.

    x_ref: (tbt, 192)  bf16   [raw notes (144) | precomputed per-note bins (48)]
    w_ref: (192, 4656) bf16   banded conv weight + bins routing (resident)
    c_ref: (3, 4656)   f32    row0 = pre-tanh bias (conv_b), row1 = post-tanh
                              bias (pos/class emb), row2 = tanh-lane mask
    o_ref: (tbt, 4656) bf16   packed 97-per-note feature slab
    """
    pre = c_ref[0:1, :]                    # (1, FOUT) f32
    post = c_ref[1:2, :]
    m = c_ref[2:3, :]
    one_minus_m = 1.0 - m
    w = w_ref[...]                         # whole resident weight

    rows = x_ref.shape[0]                  # static block rows
    chunk = ROW_CHUNK if rows % ROW_CHUNK == 0 else rows
    n_chunks = rows // chunk

    def body(i, carry):
        r0 = pl.multiple_of(i * chunk, chunk)
        acc = jnp.dot(x_ref[pl.ds(r0, chunk), :], w,
                      preferred_element_type=jnp.float32)      # (chunk, FOUT) f32
        t = jnp.tanh(acc + pre)
        # conv lanes: tanh(acc + conv_b); emb lanes: 0 + emb; bins lane: acc.
        out = t * m + acc * one_minus_m + post
        o_ref[pl.ds(r0, chunk), :] = out.astype(o_ref.dtype)
        return carry

    lax.fori_loop(0, n_chunks, body, 0)


def init_params(key):
    k1, k2, k3, k4 = jax.random.split(key, 4)
    fan_in = NOTE_UNITS * KERNEL_SIZE
    bound = 1.0 / math.sqrt(fan_in)
    return dict(
        conv_w=jax.random.uniform(k1, (OCTAVE_UNITS, NOTE_UNITS, KERNEL_SIZE),
                                  jnp.float32, -bound, bound),
        conv_b=jax.random.uniform(k2, (OCTAVE_UNITS,), jnp.float32, -bound, bound),
        pos_emb=0.02 * jax.random.normal(k3, (NUM_NOTES, POS_EMB_DIM), jnp.float32),
        class_emb=0.02 * jax.random.normal(k4, (OCTAVE, OCTAVE), jnp.float32),
    )


def _banded_conv_weight(conv_w):
    """Scatter Conv1d weight (O, C, K) onto a (144, 48, 64) banded tensor.

    W[p*3 + c, n, o] = conv_w[o, c, p - n + PAD_L] (0 outside the kernel window),
    so  conv[n, o] = sum_{p,c} x[p, c] * W[p*3+c, n, o]  reproduces the
    zero-padded Conv1d exactly.
    """
    p = jnp.arange(NUM_NOTES)
    n = jnp.arange(NUM_NOTES)
    k = p[:, None] - n[None, :] + PAD_L                      # (48_p, 48_n)
    valid = (k >= 0) & (k < KERNEL_SIZE)
    kc = jnp.clip(k, 0, KERNEL_SIZE - 1)
    w_kco = jnp.transpose(conv_w, (2, 1, 0))                 # (K, C, O)
    w_band = jnp.where(valid[..., None, None], w_kco[kc], 0.0)   # (p, n, C, O)
    return jnp.transpose(w_band, (0, 2, 1, 3)).reshape(CIN, NUM_NOTES, OCTAVE_UNITS)


def _fused_weight_and_consts(params):
    """Build the (192, 4656) fused weight, the (3, 4656) constants, and the band."""
    w_band = _banded_conv_weight(params["conv_w"])           # (144, 48, 64) f32

    w_full = jnp.zeros((KAUG, NUM_NOTES, FEAT), jnp.float32)
    w_full = w_full.at[:CIN, :, :OCTAVE_UNITS].set(w_band)                 # conv band
    w_full = w_full.at[CIN:, :, FEAT - 1].set(jnp.eye(NUM_NOTES, dtype=jnp.float32))  # bins routing
    w_full = w_full.reshape(KAUG, FOUT).astype(jnp.bfloat16)

    class_idx = jnp.arange(NUM_NOTES) % OCTAVE
    bias_pre = jnp.zeros((NUM_NOTES, FEAT), jnp.float32)
    bias_pre = bias_pre.at[:, :OCTAVE_UNITS].set(params["conv_b"][None, :])
    bias_post = jnp.zeros((NUM_NOTES, FEAT), jnp.float32)
    bias_post = bias_post.at[:, OCTAVE_UNITS:OCTAVE_UNITS + POS_EMB_DIM].set(params["pos_emb"])
    bias_post = bias_post.at[:, OCTAVE_UNITS + POS_EMB_DIM:FEAT - 1].set(
        params["class_emb"][class_idx])
    tanh_mask = jnp.zeros((NUM_NOTES, FEAT), jnp.float32).at[:, :OCTAVE_UNITS].set(1.0)

    consts = jnp.stack([bias_pre.reshape(FOUT),
                        bias_post.reshape(FOUT),
                        tanh_mask.reshape(FOUT)], axis=0)     # (3, FOUT) f32
    return w_full, consts, w_band


def feature_generation_forward(notes, params):
    B, T, P, F = notes.shape
    assert P == NUM_NOTES and F == NOTE_UNITS
    N = B * T

    w_full, consts, w_band = _fused_weight_and_consts(params)

    x_flat = notes.reshape(N, CIN).astype(jnp.bfloat16)       # (N, 144) bf16

    # --- bins precompute (tiny, ~0.4 KB/row): conv channel 0 only, then the
    #     exact torch repeat+view row scramble.  bins for output row r needs
    #     conv ch-0 of rows 4r..4r+3, so it cannot be produced inside a
    #     row-blocked kernel; instead it is fed in as 48 extra input columns
    #     and routed to lane n*97+96 by the fused weight. ---
    w_c0 = w_band[:, :, 0].astype(jnp.bfloat16)               # (144, 48)
    c0 = jnp.tanh(jnp.dot(x_flat, w_c0, preferred_element_type=jnp.float32)
                  + params["conv_b"][0])                      # (N, 48) f32
    bins_small = c0.reshape(B, T, NUM_OCTAVES, OCTAVE).sum(axis=2)        # (B, T, 12)
    bins_rows = jnp.tile(bins_small, (NUM_OCTAVES, 1, 1)).reshape(N, NUM_NOTES)

    x_aug = jnp.concatenate([x_flat, bins_rows.astype(jnp.bfloat16)], axis=1)  # (N, 192)

    # --- row-block size: big enough to amortize the ~0.35us/step overhead,
    #     small enough for v7x's 64 MiB VMEM; >=2 grid steps when possible so
    #     v7x's two TensorCores both get work. ---
    if N <= TBT_DEFAULT:
        tbt = _round_up(max(N, 8), 8)
        if N >= 16:
            tbt = _round_up((N + 1) // 2, 8)
    else:
        tbt = TBT_DEFAULT
    n_pad = _round_up(N, tbt)
    if n_pad != N:
        x_aug = jnp.pad(x_aug, ((0, n_pad - N), (0, 0)))

    chunk = ROW_CHUNK if tbt % ROW_CHUNK == 0 else tbt
    grid = (n_pad // tbt,)

    # VMEM budget derived from the actual block footprint (+ f32 intermediates
    # of one compute chunk, + headroom), instead of a hard-coded constant.
    block_bytes = 2 * (tbt * KAUG * 2 + KAUG * FOUT * 2 + 3 * FOUT * 4 + tbt * FOUT * 2)
    temp_bytes = 6 * chunk * FOUT * 4
    vmem_limit = int(min(block_bytes + temp_bytes + (8 << 20), 112 * 1024 * 1024))

    out_flat = pl.pallas_call(
        _feature_kernel,
        out_shape=jax.ShapeDtypeStruct((n_pad, FOUT), jnp.bfloat16),
        grid_spec=pltpu.PrefetchScalarGridSpec(
            num_scalar_prefetch=0,
            grid=grid,
            in_specs=[
                pl.BlockSpec((tbt, KAUG), lambda i: (i, 0)),
                # TODO(synk): these two operands are grid-invariant; single-
                # buffering them (pipeline_mode=pl.Buffered(1)) would save
                # ~1.8 MiB of VMEM, left double-buffered here for safety.
                pl.BlockSpec((KAUG, FOUT), lambda i: (0, 0)),   # resident weight
                pl.BlockSpec((3, FOUT), lambda i: (0, 0)),      # resident biases/mask
            ],
            out_specs=pl.BlockSpec((tbt, FOUT), lambda i: (i, 0)),
        ),
        compiler_params=pltpu.CompilerParams(
            dimension_semantics=("parallel",),
            vmem_limit_bytes=vmem_limit,
        ),
        cost_estimate=pl.CostEstimate(
            flops=2 * n_pad * KAUG * FOUT,
            transcendentals=n_pad * FOUT,
            bytes_accessed=(n_pad * KAUG * 2 + KAUG * FOUT * 2 + 3 * FOUT * 4
                            + n_pad * FOUT * 2),
        ),
    )(x_aug, w_full, consts)

    # 4656 = 48 * 97: this reshape is a free row-major bitcast, no extra pass.
    return out_flat[:N].reshape(B, T, NUM_NOTES, FEAT)


if __name__ == "__main__":
    key = jax.random.PRNGKey(0)
    kp, kx = jax.random.split(key)
    params = init_params(kp)

    B, T = 2, 8
    notes = jax.random.uniform(kx, (B, T, NUM_NOTES, NOTE_UNITS), jnp.float32)

    forward = jax.jit(feature_generation_forward)
    out = jax.block_until_ready(forward(notes, params))
    assert out.shape == (B, T, NUM_NOTES, FEAT)

    # --- pure-JAX reference of the torch module (same bf16-rounded conv
    #     operands as the kernel; kernel output is bf16 -> loose tolerance). ---
    lhs = jnp.transpose(notes.reshape(-1, NUM_NOTES, NOTE_UNITS), (0, 2, 1))
    lhs = jnp.pad(lhs, ((0, 0), (0, 0), (PAD_L, PAD_R))).astype(jnp.bfloat16)
    conv = lax.conv_general_dilated(lhs, params["conv_w"].astype(jnp.bfloat16),
                                    (1,), "VALID",
                                    dimension_numbers=("NCH", "OIH", "NCH"),
                                    preferred_element_type=jnp.float32)
    conv = jnp.tanh(conv + params["conv_b"][None, :, None])
    conv = jnp.transpose(conv, (0, 2, 1)).reshape(B, T, NUM_NOTES, OCTAVE_UNITS)

    pos = jnp.broadcast_to(params["pos_emb"][None, None],
                           (B, T, NUM_NOTES, POS_EMB_DIM))
    cls = jnp.broadcast_to(params["class_emb"][jnp.arange(NUM_NOTES) % OCTAVE][None, None],
                           (B, T, NUM_NOTES, OCTAVE))
    # torch's pitch_bins_f: repeat(NUM_OCTAVES,1,1) then view -> reproduced exactly
    bins_small = conv[..., 0].reshape(B, T, NUM_OCTAVES, OCTAVE).sum(axis=2)
    bins = jnp.tile(bins_small, (NUM_OCTAVES, 1, 1)).reshape(B, T, NUM_NOTES, 1)
    ref = jnp.concatenate([conv, pos, cls, bins], axis=-1)

    assert jnp.allclose(out.astype(jnp.float32), ref, atol=5e-2, rtol=5e-2), \
        "feature mismatch"
    print("KERNEL_OK")
</pallas_src>

<mosaic_0001>
module attributes {stable_mosaic.version = 11 : i64} {
  func.func @_feature_kernel(%arg0: i32, %arg1: memref<8x192xbf16, #tpu.memory_space<vmem>>, %arg2: memref<192x4656xbf16, #tpu.memory_space<vmem>>, %arg3: memref<3x4656xf32, #tpu.memory_space<vmem>>, %arg4: memref<8x4656xbf16, #tpu.memory_space<vmem>>) attributes {dimension_semantics = [#tpu.dimension_semantics<parallel>], iteration_bounds = array<i64: 2>, scalar_prefetch = 0 : i64, scratch_operands = 0 : i64, tpu.core_type = #tpu.core_type<tc>, window_params = [{transform_indices = @transform_0, window_bounds = array<i64: 8, 192>}, {pipeline_mode = #tpu.pipeline_mode<synchronous>, transform_indices = @transform_1, window_bounds = array<i64: 192, 4656>}, {pipeline_mode = #tpu.pipeline_mode<synchronous>, transform_indices = @transform_2, window_bounds = array<i64: 3, 4656>}, {transform_indices = @transform_3, window_bounds = array<i64: 8, 4656>}]} {
    %c0 = arith.constant 0 : index
    %c0_0 = arith.constant 0 : index
    %0 = vector.load %arg3[%c0, %c0_0] : memref<3x4656xf32, #tpu.memory_space<vmem>>, vector<1x4656xf32>
    %c1 = arith.constant 1 : index
    %c0_1 = arith.constant 0 : index
    %1 = vector.load %arg3[%c1, %c0_1] : memref<3x4656xf32, #tpu.memory_space<vmem>>, vector<1x4656xf32>
    %c2 = arith.constant 2 : index
    %c0_2 = arith.constant 0 : index
    %2 = vector.load %arg3[%c2, %c0_2] : memref<3x4656xf32, #tpu.memory_space<vmem>>, vector<1x4656xf32>
    %cst = arith.constant 1.000000e+00 : f32
    %3 = vector.broadcast %cst : f32 to vector<1x4656xf32>
    %4 = arith.subf %3, %2 : vector<1x4656xf32>
    %c0_3 = arith.constant 0 : index
    %c0_4 = arith.constant 0 : index
    %5 = vector.load %arg2[%c0_3, %c0_4] : memref<192x4656xbf16, #tpu.memory_space<vmem>>, vector<192x4656xbf16>
    %c0_i32 = arith.constant 0 : i32
    %c8_i32 = arith.constant 8 : i32
    %6 = arith.muli %c0_i32, %c8_i32 : i32
    %7 = tpu.assume_multiple %6, 8 : i32
    %8 = arith.index_cast %7 : i32 to index
    %c0_5 = arith.constant 0 : index
    %9 = vector.load %arg1[%8, %c0_5] : memref<8x192xbf16, #tpu.memory_space<vmem>>, vector<8x192xbf16>
    %cst_6 = arith.constant dense<0.000000e+00> : vector<8x4656xf32>
    %10 = tpu.matmul %9, %5, %cst_6 {dimension_numbers = #tpu.dot_dimension_numbers<[1], [0], [0], [1], [0, 0, 1, 1], [], []>} : vector<8x192xbf16>, vector<192x4656xbf16>, vector<8x4656xf32> -> vector<8x4656xf32>
    %11 = vector.broadcast %0 : vector<1x4656xf32> to vector<8x4656xf32>
    %12 = arith.addf %10, %11 : vector<8x4656xf32>
    %13 = math.tanh %12 : vector<8x4656xf32>
    %14 = vector.broadcast %2 : vector<1x4656xf32> to vector<8x4656xf32>
    %15 = arith.mulf %13, %14 : vector<8x4656xf32>
    %16 = vector.broadcast %4 : vector<1x4656xf32> to vector<8x4656xf32>
    %17 = arith.mulf %10, %16 : vector<8x4656xf32>
    %18 = arith.addf %15, %17 : vector<8x4656xf32>
    %19 = vector.broadcast %1 : vector<1x4656xf32> to vector<8x4656xf32>
    %20 = arith.addf %18, %19 : vector<8x4656xf32>
    %21 = arith.truncf %20 : vector<8x4656xf32> to vector<8x4656xbf16>
    %22 = arith.index_cast %7 : i32 to index
    %c0_7 = arith.constant 0 : index
    %23 = vector.load %arg4[%22, %c0_7] : memref<8x4656xbf16, #tpu.memory_space<vmem>>, vector<8x4656xbf16>
    tpu.vector_store %arg4[%22, %c0_7], %21 {strides = array<i32>} : memref<8x4656xbf16, #tpu.memory_space<vmem>>, vector<8x4656xbf16>,
    %c1_i32 = arith.constant 1 : i32
    return
  }
  func.func @transform_0(%arg0: i32) -> (i32, i32) {
    %c0_i32 = arith.constant 0 : i32
    %c0_i32_0 = arith.constant 0 : i32
    return %arg0, %c0_i32 : i32, i32
  }
  func.func @transform_1(%arg0: i32) -> (i32, i32) {
    %c0_i32 = arith.constant 0 : i32
    %c0_i32_0 = arith.constant 0 : i32
    %c0_i32_1 = arith.constant 0 : i32
    return %c0_i32, %c0_i32_0 : i32, i32
  }
  func.func @transform_2(%arg0: i32) -> (i32, i32) {
    %c0_i32 = arith.constant 0 : i32
    %c0_i32_0 = arith.constant 0 : i32
    %c0_i32_1 = arith.constant 0 : i32
    return %c0_i32, %c0_i32_0 : i32, i32
  }
  func.func @transform_3(%arg0: i32) -> (i32, i32) {
    %c0_i32 = arith.constant 0 : i32
    %c0_i32_0 = arith.constant 0 : i32
    return %arg0, %c0_i32 : i32, i32
  }
}

</mosaic_0001>

<bundles_post_ra>
// kernel: feature_generation_forward.1
= control target key start
LH: loop header
LB: loop body
LE: loop exit
PB: predicated region body
PF: predicated region fallthrough
CT: control target
= control target key end

     0   :  { %s6898_s12 = smov 0   ;;  %s10014_s0 = inlined_call_operand.vmem [shape: bf16[16,192], index: 0, kind: input, shape index: {}]   ;;  %s10015_s1 = inlined_call_operand.vmem [shape: bf16[192,4656], index: 1, kind: input, shape index: {}]   ;;  %s10016_s2 = inlined_call_operand.vmem [shape: f32[3,4656], index: 2, kind: input, shape index: {}]   ;;  %s10017_s3 = inlined_call_operand.vmem [shape: bf16[16,4656], index: 3, kind: output, shape index: {}]  }
   0x1 LB: > { %s4505_s13 = sadd.s32 4294967295, %s6876_s12   ;;  %p4509_p0 = scmp.ge.s32.totalorder %s6876_s12, 1  ;;  %s6876_s12 = sphi %s6898_s12, %s13_s12  }
   0x2   : > { %p137_p1 = scmp.lt.s32.totalorder %s6876_s12, 3 }
   0x4   : > { %p138_p2 = pnand %p4509_p0, %p137_p1 }
   0x5   : > { %p161_p3 = scmp.lt.s32.totalorder (!%p138_p2), %s4505_s13, 1 }
   0x6   : > { %141 = sbr.rel (%p138_p2) target bundleno = 615 (0x267), region = 32 }
   0xb   : > { %v5565_v0 = vld [vmem:[%s10015_s1 + $0x818] sm:$0xf]  ;;  %v6620_v1 = vld [vmem:[%s10015_s1 + $0x8a8] sm:$0xf0]  ;;  %v6602_v5 = vld [vmem:[%s10015_s1 + $0x81c] sm:$0xf] }
   0xc   : > { %v6157_v2 = vld [vmem:[%s10015_s1 + $0xcb8] sm:$0xf]  ;;  %v5566_v3 = vor.u32 %v6620_v1, %v5565_v0  ;;  %v6768_v4 = vld [vmem:[%s10015_s1 + $0xd48] sm:$0xf0]  ;;  %v5567_v6 = vld [vmem:[%s10015_s1 + $0x8ac] sm:$0xf0] }
   0xd   : > { %v6158_v7 = vor.u32 %v6768_v4, %v6157_v2  ;;  %v5570_v8 = vor.u32 %v6602_v5, %v5567_v6  ;;  %v6750_v9 = vld [vmem:[%s10015_s1 + $0xcbc] sm:$0xf]  ;;  %v6159_v10 = vld [vmem:[%s10015_s1 + $0xd4c] sm:$0xf0]  ;;  %v6583_v13 = vld [vmem:[%s10015_s1 + $0x780] sm:$0xf0] }
   0xe   : > { %v5417_v11 = vld [vmem:[%s10015_s1 + $0x6f0] sm:$0xf]  ;;  %2908 = vmatpush.bf16.msra.mxu0 %v5566_v3  ;;  %v6162_v12 = vor.u32 %v6750_v9, %v6159_v10  ;;  %v6731_v15 = vld [vmem:[%s10015_s1 + $0xc20] sm:$0xf0]  ;;  %v6565_v18 = vld [vmem:[%s10015_s1 + $0x6f4] sm:$0xf] }
   0xf   : > { %v6009_v14 = vld [vmem:[%s10015_s1 + $0xb90] sm:$0xf]  ;;  %2925 = vmatpush.bf16.msra.mxu1 %v6158_v7  ;;  %2934 = vmatpush.bf16.msra.mxu2 %v5570_v8  ;;  %v5418_v16 = vor.u32 %v6583_v13, %v5417_v11  ;;  %v5419_v19 = vld [vmem:[%s10015_s1 + $0x784] sm:$0xf0]  ;;  %v6713_v20 = vld [vmem:[%s10015_s1 + $0xb94] sm:$0xf] }
  0x10   : > { %v6010_v17 = vor.u32 %v6731_v15, %v6009_v14  ;;  %2951 = vmatpush.bf16.msra.mxu3 %v6162_v12  ;;  %v5422_v21 = vor.u32 %v6565_v18, %v5419_v19  ;;  %v6011_v22 = vld [vmem:[%s10015_s1 + $0xc24] sm:$0xf0]  ;;  %v6546_v24 = vld [vmem:[%s10015_s1 + $0x658] sm:$0xf0]  ;;  %v6528_v28 = vld [vmem:[%s10015_s1 + $0x5cc] sm:$0xf] }
  0x11   : > { %v5269_v23 = vld [vmem:[%s10015_s1 + $0x5c8] sm:$0xf]  ;;  %v6014_v25 = vor.u32 %v6713_v20, %v6011_v22  ;;  %v6694_v27 = vld [vmem:[%s10015_s1 + $0xaf8] sm:$0xf0]  ;;  %v5271_v30 = vld [vmem:[%s10015_s1 + $0x65c] sm:$0xf0] }
  0x12   : > { %v5861_v26 = vld [vmem:[%s10015_s1 + $0xa68] sm:$0xf]  ;;  %2909 = vmatpush.bf16.msra.mxu0 %v5418_v16  ;;  %v5270_v29 = vor.u32 %v6546_v24, %v5269_v23  ;;  %v6676_v31 = vld [vmem:[%s10015_s1 + $0xa6c] sm:$0xf]  ;;  %v5863_v32 = vld [vmem:[%s10015_s1 + $0xafc] sm:$0xf0]  ;;  %v5274_v34 = vor.u32 %v6528_v28, %v5271_v30 }
  0x13   : > { %2926 = vmatpush.bf16.msra.mxu1 %v6010_v17  ;;  %2935 = vmatpush.bf16.msra.mxu2 %v5422_v21  ;;  %v5862_v33 = vor.u32 %v6694_v27, %v5861_v26  ;;  %v5121_v35 = vld [vmem:[%s10015_s1 + $0x4a0] sm:$0xf]  ;;  %v6509_v36 = vld [vmem:[%s10015_s1 + $0x530] sm:$0xf0]  ;;  %v5866_v38 = vor.u32 %v6676_v31, %v5863_v32  ;;  %v6491_v40 = vld [vmem:[%s10015_s1 + $0x4a4] sm:$0xf] }
  0x14   : > { %v5713_v37 = vld [vmem:[%s10015_s1 + $0x940] sm:$0xf]  ;;  %2952 = vmatpush.bf16.msra.mxu3 %v6014_v25  ;;  %v6657_v39 = vld [vmem:[%s10015_s1 + $0x9d0] sm:$0xf0]  ;;  %v5123_v41 = vld [vmem:[%s10015_s1 + $0x534] sm:$0xf0]  ;;  %v5122_v45 = vor.u32 %v6509_v36, %v5121_v35 }
  0x15   : > { %v6639_v42 = vld [vmem:[%s10015_s1 + $0x944] sm:$0xf]  ;;  %v5715_v43 = vld [vmem:[%s10015_s1 + $0x9d4] sm:$0xf0]  ;;  %v5573_v44 = vld [vmem:[%s10015_s1 + $0x820] sm:$0xf]  ;;  %v5714_v49 = vor.u32 %v6657_v39, %v5713_v37  ;;  %v5126_v50 = vor.u32 %v6491_v40, %v5123_v41 }
  0x16   : > { %2910 = vmatpush.bf16.msra.mxu0 %v5270_v29  ;;  %v6621_v46 = vld [vmem:[%s10015_s1 + $0x8b0] sm:$0xf0]  ;;  %v6165_v47 = vld [vmem:[%s10015_s1 + $0xcc0] sm:$0xf]  ;;  %v4973_v51 = vld [vmem:[%s10015_s1 + $0x378] sm:$0xf]  ;;  %v5718_v53 = vor.u32 %v6639_v42, %v5715_v43 }
  0x17   : > { %v6769_v48 = vld [vmem:[%s10015_s1 + $0xd50] sm:$0xf0]  ;;  %2927 = vmatpush.bf16.msra.mxu1 %v5862_v33  ;;  %2936 = vmatpush.bf16.msra.mxu2 %v5274_v34  ;;  %v6472_v52 = vld [vmem:[%s10015_s1 + $0x408] sm:$0xf0]  ;;  %v5574_v54 = vor.u32 %v6621_v46, %v5573_v44  ;;  %v6454_v55 = vld [vmem:[%s10015_s1 + $0x37c] sm:$0xf] }
  0x18   : > { %2953 = vmatpush.bf16.msra.mxu3 %v5866_v38  ;;  %v4975_v56 = vld [vmem:[%s10015_s1 + $0x40c] sm:$0xf0]  ;;  %v6166_v57 = vor.u32 %v6769_v48, %v6165_v47  ;;  %v5425_v58 = vld [vmem:[%s10015_s1 + $0x6f8] sm:$0xf]  ;;  %v6584_v59 = vld [vmem:[%s10015_s1 + $0x788] sm:$0xf0]  ;;  %v4974_v60 = vor.u32 %v6472_v52, %v4973_v51 }
  0x19   : > { %v6017_v61 = vld [vmem:[%s10015_s1 + $0xb98] sm:$0xf]  ;;  %v6732_v62 = vld [vmem:[%s10015_s1 + $0xc28] sm:$0xf0]  ;;  %v4978_v63 = vor.u32 %v6454_v55, %v4975_v56  ;;  %s10019_s13 = smov (!%p161_p3, %s4505_s13), 1  ;;  %v5426_v2 = vor.u32 %v6584_v59, %v5425_v58  ;;  %vm2904_vm0 = vcmask 523264  }
  0x1a   : > { %2911 = vmatpush.bf16.msra.mxu0 %v5122_v45  ;;  %v4825_v0 = vld [vmem:[%s10015_s1 + $0x250] sm:$0xf]  ;;  %v6435_v1 = vld [vmem:[%s10015_s1 + $0x2e0] sm:$0xf0]  ;;  %v6417_v3 = vld [vmem:[%s10015_s1 + $0x254] sm:$0xf]  ;;  %v6018_v5 = vor.u32 %v6732_v62, %v6017_v61 }
  0x1b   : > { %2928 = vmatpush.bf16.msra.mxu1 %v5714_v49  ;;  %2937 = vmatpush.bf16.msra.mxu2 %v5126_v50  ;;  %v4827_v4 = vld [vmem:[%s10015_s1 + $0x2e4] sm:$0xf0]  ;;  %s6342_s8 = sshll.u32 %s10019_s13, 3  ;;  %v5277_v6 = vld [vmem:[%s10015_s1 + $0x5d0] sm:$0xf]  ;;  %v4826_v8 = vor.u32 %v6435_v1, %v4825_v0  ;;  %s6787_s5 = smul.u32 148, %s10019_s13 }
  0x1c   : > { %2954 = vmatpush.bf16.msra.mxu3 %v5718_v53  ;;  %v6547_v7 = vld [vmem:[%s10015_s1 + $0x660] sm:$0xf0]  ;;  %s165_s17 = scalar_lea.vmem %s10014_s0, %s6342_s8  ;;  %v5869_v9 = vld [vmem:[%s10015_s1 + $0xa70] sm:$0xf]  ;;  %v4830_v12 = vor.u32 %v6417_v3, %v4827_v4  ;;  %v4677_v13 = vld [vmem:[%s10015_s1 + $0x128] sm:$0xf] }
  0x1d   : > { %v6695_v10 = vld [vmem:[%s10015_s1 + $0xb00] sm:$0xf0]  ;;  %v6398_v14 = vld [vmem:[%s10015_s1 + $0x1b8] sm:$0xf0]  ;;  %v5278_v16 = vor.u32 %v6547_v7, %v5277_v6  ;;  %v6380_v17 = vld [vmem:[%s10015_s1 + $0x12c] sm:$0xf]  ;;  %s8290_s30 = scalar_lea.vmem %s10017_s3, %s6787_s5 }
  0x1e   : > { %2912 = vmatpush.bf16.msra.mxu0 %v4974_v60  ;;  %v665_v11 = vld [vmem:[%s165_s17] sm:$0xff]  ;;  %v5129_v19 = vld [vmem:[%s10015_s1 + $0x4a8] sm:$0xf]  ;;  %v5870_v20 = vor.u32 %v6695_v10, %v5869_v9  ;;  %v6510_v21 = vld [vmem:[%s10015_s1 + $0x538] sm:$0xf0]  ;;  %v4678_v25 = vor.u32 %v6398_v14, %v4677_v13  ;;  %vm4448_vm1 = vcmask 388096  }
  0x1f   : > { %2960 = vmatpush.bf16.msrb.mxu1 %v5574_v54  ;;  %2938 = vmatpush.bf16.msra.mxu2 %v4978_v63  ;;  %v668_v15 = vunpack.c.h.b16 %v665_v11  ;;  %v4679_v18 = vld [vmem:[%s10015_s1 + $0x1bc] sm:$0xf0]  ;;  %v5721_v22 = vld [vmem:[%s10015_s1 + $0x948] sm:$0xf]  ;;  %v6658_v23 = vld [vmem:[%s10015_s1 + $0x9d8] sm:$0xf0]  ;;  %v5130_v33 = vor.u32 %v6510_v21, %v5129_v19  ;;  %v667_v43 = vunpack.c.l.b16 %v665_v11 }
  0x20   : > { %2977 = vmatpush.bf16.msrb.mxu3 %v6166_v57  ;;  %v5581_v26 = vld [vmem:[%s10015_s1 + $0x828] sm:$0xf]  ;;  %v6622_v27 = vld [vmem:[%s10015_s1 + $0x8b8] sm:$0xf0]  ;;  %v4529_v28 = vld [vmem:[%s10015_s1] sm:$0xf]  ;;  %v4682_v29 = vor.u32 %v6380_v17, %v4679_v18  ;;  %v5722_v37 = vor.u32 %v6658_v23, %v5721_v22 }
  0x21   : > { %v7096_v24 = vpack.c.b16 %v668_v15, %v668_v15  ;;  %v6361_v30 = vld [vmem:[%s10015_s1 + $0x90] sm:$0xf0]  ;;  %v6343_v31 = vld [vmem:[%s10015_s1 + $0x4] sm:$0xf]  ;;  %v4531_v32 = vld [vmem:[%s10015_s1 + $0x94] sm:$0xf0]  ;;  %v5582_v41 = vor.u32 %v6622_v27, %v5581_v26  ;;  %v7162_v57 = vpack.c.b16 %v667_v43, %v667_v43 }
  0x22   : > { %2913 = vmatpush.bf16.msra.mxu0 %v4826_v8  ;;  %v4981_v34 = vld [vmem:[%s10015_s1 + $0x380] sm:$0xf]  ;;  %v6603_v35 = vld [vmem:[%s10015_s1 + $0x824] sm:$0xf]  ;;  %v5575_v36 = vld [vmem:[%s10015_s1 + $0x8b4] sm:$0xf0]  ;;  %v4530_v42 = vor.u32 %v6361_v30, %v4529_v28  ;;  %v4534_v44 = vor.u32 %v6343_v31, %v4531_v32 }
  0x23   : > { %2961 = vmatpush.bf16.msrb.mxu1 %v5426_v2  ;;  %2939 = vmatpush.bf16.msra.mxu2 %v4830_v12  ;;  %v6473_v38 = vld [vmem:[%s10015_s1 + $0x410] sm:$0xf0]  ;;  %v6751_v39 = vld [vmem:[%s10015_s1 + $0xcc4] sm:$0xf]  ;;  %v6167_v40 = vld [vmem:[%s10015_s1 + $0xd54] sm:$0xf0]  ;;  %v5578_v45 = vor.u32 %v6603_v35, %v5575_v36 }
  0x24   : > { %2978 = vmatpush.bf16.msrb.mxu3 %v6018_v5  ;;  %6303 = vmatmul.msk.bf16.vlgmr.msra.gmra.mxu1 %vm2904_vm0, %v7096_v24  ;;  %v5433_v46 = vld [vmem:[%s10015_s1 + $0x700] sm:$0xf]  ;;  %v6585_v47 = vld [vmem:[%s10015_s1 + $0x790] sm:$0xf0]  ;;  %v4982_v48 = vor.u32 %v6473_v38, %v4981_v34  ;;  %v6170_v49 = vor.u32 %v6751_v39, %v6167_v40  ;;  %v4833_v50 = vld [vmem:[%s10015_s1 + $0x258] sm:$0xf] }
  0x25   : > { %6304 = vmatmul.msk.bf16.vlgmr.msra.gmra.mxu3 %vm2904_vm0, %v7096_v24  ;;  %v6566_v51 = vld [vmem:[%s10015_s1 + $0x6fc] sm:$0xf]  ;;  %v5427_v52 = vld [vmem:[%s10015_s1 + $0x78c] sm:$0xf0]  ;;  %v6436_v53 = vld [vmem:[%s10015_s1 + $0x2e8] sm:$0xf0]  ;;  %v5434_v56 = vor.u32 %v6585_v47, %v5433_v46 }
  0x26   : > { %2914 = vmatpush.bf16.msra.mxu0 %v4678_v25  ;;  %v6714_v54 = vld [vmem:[%s10015_s1 + $0xb9c] sm:$0xf]  ;;  %v6019_v55 = vld [vmem:[%s10015_s1 + $0xc2c] sm:$0xf0]  ;;  %v5430_v58 = vor.u32 %v6566_v51, %v5427_v52  ;;  %v5285_v59 = vld [vmem:[%s10015_s1 + $0x5d8] sm:$0xf]  ;;  %v4834_v61 = vor.u32 %v6436_v53, %v4833_v50 }
  0x27   : > { %2962 = vmatpush.bf16.msrb.mxu1 %v5278_v16  ;;  %2940 = vmatpush.bf16.msra.mxu2 %v4682_v29  ;;  %v6548_v60 = vld [vmem:[%s10015_s1 + $0x668] sm:$0xf0]  ;;  %v6022_v62 = vor.u32 %v6714_v54, %v6019_v55  ;;  %v4685_v63 = vld [vmem:[%s10015_s1 + $0x130] sm:$0xf]  ;;  %v6529_v0 = vld [vmem:[%s10015_s1 + $0x5d4] sm:$0xf] }
  0x28   : > { %2979 = vmatpush.bf16.msrb.mxu3 %v5870_v20  ;;  %v5279_v1 = vld [vmem:[%s10015_s1 + $0x664] sm:$0xf0]  ;;  %v6399_v2 = vld [vmem:[%s10015_s1 + $0x1c0] sm:$0xf0]  ;;  %v6677_v3 = vld [vmem:[%s10015_s1 + $0xa74] sm:$0xf]  ;;  %v5286_v5 = vor.u32 %v6548_v60, %v5285_v59 }
  0x29   : > { %v5871_v4 = vld [vmem:[%s10015_s1 + $0xb04] sm:$0xf0]  ;;  %v5282_v6 = vor.u32 %v6529_v0, %v5279_v1  ;;  %v5137_v7 = vld [vmem:[%s10015_s1 + $0x4b0] sm:$0xf]  ;;  %v6511_v8 = vld [vmem:[%s10015_s1 + $0x540] sm:$0xf0]  ;;  %v4686_v10 = vor.u32 %v6399_v2, %v4685_v63 }
  0x2a   : > { %2915 = vmatpush.bf16.msra.mxu0 %v4530_v42  ;;  %v4537_v9 = vld [vmem:[%s10015_s1 + $0x8] sm:$0xf]  ;;  %v5874_v11 = vor.u32 %v6677_v3, %v5871_v4  ;;  %v6362_v12 = vld [vmem:[%s10015_s1 + $0x98] sm:$0xf0]  ;;  %v6492_v13 = vld [vmem:[%s10015_s1 + $0x4ac] sm:$0xf]  ;;  %v5138_v18 = vor.u32 %v6511_v8, %v5137_v7 }
  0x2b   : > { %2963 = vmatpush.bf16.msrb.mxu1 %v5130_v33  ;;  %2941 = vmatpush.bf16.msra.mxu2 %v4534_v44  ;;  %v5131_v14 = vld [vmem:[%s10015_s1 + $0x53c] sm:$0xf0]  ;;  %v6640_v15 = vld [vmem:[%s10015_s1 + $0x94c] sm:$0xf]  ;;  %v6173_v17 = vld [vmem:[%s10015_s1 + $0xcc8] sm:$0xf]  ;;  %v4538_v26 = vor.u32 %v6362_v12, %v4537_v9 }
  0x2c   : > { %2980 = vmatpush.bf16.msrb.mxu3 %v5722_v37  ;;  %v5723_v16 = vld [vmem:[%s10015_s1 + $0x9dc] sm:$0xf0]  ;;  %v6770_v19 = vld [vmem:[%s10015_s1 + $0xd58] sm:$0xf0]  ;;  %v6604_v20 = vld [vmem:[%s10015_s1 + $0x82c] sm:$0xf]  ;;  %v5134_v22 = vor.u32 %v6492_v13, %v5131_v14 }
  0x2d   : > { %2916 = vmatmul.bf16.vlgmr.msra.gmra.mxu0 %v7162_v57  ;;  %v5583_v21 = vld [vmem:[%s10015_s1 + $0x8bc] sm:$0xf0]  ;;  %v4989_v23 = vld [vmem:[%s10015_s1 + $0x388] sm:$0xf]  ;;  %v6474_v25 = vld [vmem:[%s10015_s1 + $0x418] sm:$0xf0]  ;;  %v5726_v27 = vor.u32 %v6640_v15, %v5723_v16  ;;  %v6174_v30 = vor.u32 %v6770_v19, %v6173_v17 }
  0x2e   : > { %2986 = vmatpush.bf16.msrb.mxu0 %v5578_v45  ;;  %2942 = vmatmul.bf16.vlgmr.msra.gmra.mxu2 %v7162_v57  ;;  %v6455_v28 = vld [vmem:[%s10015_s1 + $0x384] sm:$0xf]  ;;  %v4983_v29 = vld [vmem:[%s10015_s1 + $0x414] sm:$0xf0]  ;;  %v5586_v31 = vor.u32 %v6604_v20, %v5583_v21  ;;  %v6025_v32 = vld [vmem:[%s10015_s1 + $0xba0] sm:$0xf]  ;;  %v4990_v33 = vor.u32 %v6474_v25, %v4989_v23 }
  0x2f   : > { %2964 = vmatpush.bf16.msrb.mxu1 %v4982_v48  ;;  %3003 = vmatpush.bf16.msrb.mxu2 %v6170_v49  ;;  %v6733_v34 = vld [vmem:[%s10015_s1 + $0xc30] sm:$0xf0]  ;;  %v6567_v35 = vld [vmem:[%s10015_s1 + $0x704] sm:$0xf]  ;;  %v5435_v36 = vld [vmem:[%s10015_s1 + $0x794] sm:$0xf0]  ;;  %v4986_v37 = vor.u32 %v6455_v28, %v4983_v29 }
  0x30   : > { %3012 = vmatpush.bf16.msra.mxu3 %v5582_v41  ;;  %v4841_v38 = vld [vmem:[%s10015_s1 + $0x260] sm:$0xf]  ;;  %v6437_v39 = vld [vmem:[%s10015_s1 + $0x2f0] sm:$0xf0]  ;;  %v6418_v40 = vld [vmem:[%s10015_s1 + $0x25c] sm:$0xf]  ;;  %v6026_v42 = vor.u32 %v6733_v34, %v6025_v32  ;;  %v5438_v43 = vor.u32 %v6567_v35, %v5435_v36 }
  0x31   : > { %v4835_v41 = vld [vmem:[%s10015_s1 + $0x2ec] sm:$0xf0]  ;;  %v5877_v44 = vld [vmem:[%s10015_s1 + $0xa78] sm:$0xf]  ;;  %v4842_v45 = vor.u32 %v6437_v39, %v4841_v38  ;;  %v6696_v46 = vld [vmem:[%s10015_s1 + $0xb08] sm:$0xf0] }
  0x32   : > { %2987 = vmatpush.bf16.msrb.mxu0 %v5430_v58  ;;  %v6530_v47 = vld [vmem:[%s10015_s1 + $0x5dc] sm:$0xf]  ;;  %v5287_v48 = vld [vmem:[%s10015_s1 + $0x66c] sm:$0xf0]  ;;  %v4838_v49 = vor.u32 %v6418_v40, %v4835_v41  ;;  %v4693_v50 = vld [vmem:[%s10015_s1 + $0x138] sm:$0xf]  ;;  %v5878_v54 = vor.u32 %v6696_v46, %v5877_v44 }
  0x33   : > { %2965 = vmatpush.bf16.msrb.mxu1 %v4834_v61  ;;  %3004 = vmatpush.bf16.msrb.mxu2 %v6022_v62  ;;  %v6400_v51 = vld [vmem:[%s10015_s1 + $0x1c8] sm:$0xf0]  ;;  %v6381_v52 = vld [vmem:[%s10015_s1 + $0x134] sm:$0xf]  ;;  %v4687_v53 = vld [vmem:[%s10015_s1 + $0x1c4] sm:$0xf0]  ;;  %v5290_v55 = vor.u32 %v6530_v47, %v5287_v48 }
  0x34   : > { %3013 = vmatpush.bf16.msra.mxu3 %v5434_v56  ;;  %v4545_v56 = vld [vmem:[%s10015_s1 + $0x10] sm:$0xf]  ;;  %v6363_v58 = vld [vmem:[%s10015_s1 + $0xa0] sm:$0xf0]  ;;  %v4694_v60 = vor.u32 %v6400_v51, %v4693_v50  ;;  %v6493_v62 = vld [vmem:[%s10015_s1 + $0x4b4] sm:$0xf]  ;;  %v4690_v0 = vor.u32 %v6381_v52, %v4687_v53 }
  0x35   : > { %6305 = vmatmul.msk.bf16.vlgmr.msrb.gmra.mxu3 %vm2904_vm0, %v7096_v24  ;;  %v5729_v59 = vld [vmem:[%s10015_s1 + $0x950] sm:$0xf]  ;;  %v6659_v61 = vld [vmem:[%s10015_s1 + $0x9e0] sm:$0xf0]  ;;  %v5139_v63 = vld [vmem:[%s10015_s1 + $0x544] sm:$0xf0] }
  0x36   : > { %2988 = vmatpush.bf16.msrb.mxu0 %v5282_v6  ;;  %v5589_v1 = vld [vmem:[%s10015_s1 + $0x830] sm:$0xf]  ;;  %v6623_v2 = vld [vmem:[%s10015_s1 + $0x8c0] sm:$0xf0]  ;;  %v4539_v6 = vld [vmem:[%s10015_s1 + $0x9c] sm:$0xf0]  ;;  %v5730_v7 = vor.u32 %v6659_v61, %v5729_v59  ;;  %v5142_v8 = vor.u32 %v6493_v62, %v5139_v63 }
  0x37   : > { %2966 = vmatpush.bf16.msrb.mxu1 %v4686_v10  ;;  %3005 = vmatpush.bf16.msrb.mxu2 %v5874_v11  ;;  %v6181_v3 = vld [vmem:[%s10015_s1 + $0xcd0] sm:$0xf]  ;;  %v6771_v4 = vld [vmem:[%s10015_s1 + $0xd60] sm:$0xf0]  ;;  %v6752_v9 = vld [vmem:[%s10015_s1 + $0xccc] sm:$0xf]  ;;  %v4546_v11 = vor.u32 %v6363_v58, %v4545_v56  ;;  %v5590_v12 = vor.u32 %v6623_v2, %v5589_v1 }
  0x38   : > { %3014 = vmatpush.bf16.msra.mxu3 %v5286_v5  ;;  %v6344_v5 = vld [vmem:[%s10015_s1 + $0xc] sm:$0xf]  ;;  %v6175_v10 = vld [vmem:[%s10015_s1 + $0xd5c] sm:$0xf0]  ;;  %v6182_v15 = vor.u32 %v6771_v4, %v6181_v3  ;;  %v5441_v17 = vld [vmem:[%s10015_s1 + $0x708] sm:$0xf] }
  0x39   : > { %v6456_v13 = vld [vmem:[%s10015_s1 + $0x38c] sm:$0xf]  ;;  %v4991_v14 = vld [vmem:[%s10015_s1 + $0x41c] sm:$0xf0]  ;;  %v4542_v16 = vor.u32 %v6344_v5, %v4539_v6  ;;  %v6178_v19 = vor.u32 %v6752_v9, %v6175_v10  ;;  %v6033_v20 = vld [vmem:[%s10015_s1 + $0xba8] sm:$0xf] }
  0x3a   : > { %2989 = vmatpush.bf16.msrb.mxu0 %v5134_v22  ;;  %v6734_v21 = vld [vmem:[%s10015_s1 + $0xc38] sm:$0xf0]  ;;  %v4994_v22 = vor.u32 %v6456_v13, %v4991_v14  ;;  %v6715_v23 = vld [vmem:[%s10015_s1 + $0xba4] sm:$0xf]  ;;  %v6027_v25 = vld [vmem:[%s10015_s1 + $0xc34] sm:$0xf0] }
  0x3b   : > { %2967 = vmatpush.bf16.msrb.mxu1 %v4538_v26  ;;  %3006 = vmatpush.bf16.msrb.mxu2 %v5726_v27  ;;  %v6419_v27 = vld [vmem:[%s10015_s1 + $0x264] sm:$0xf]  ;;  %v4843_v28 = vld [vmem:[%s10015_s1 + $0x2f4] sm:$0xf0]  ;;  %v6034_v29 = vor.u32 %v6734_v21, %v6033_v20  ;;  %v6030_v32 = vor.u32 %v6715_v23, %v6027_v25  ;;  %v6697_v34 = vld [vmem:[%s10015_s1 + $0xb10] sm:$0xf0] }
  0x3c   : > { %3015 = vmatpush.bf16.msra.mxu3 %v5138_v18  ;;  %v6586_v18 = vld [vmem:[%s10015_s1 + $0x798] sm:$0xf0]  ;;  %v4846_v35 = vor.u32 %v6419_v27, %v4843_v28  ;;  %v4695_v40 = vld [vmem:[%s10015_s1 + $0x1cc] sm:$0xf0]  ;;  %v5145_v41 = vld [vmem:[%s10015_s1 + $0x4b8] sm:$0xf] }
  0x3d   : > { %v5442_v26 = vor.u32 %v6586_v18, %v5441_v17  ;;  %v6678_v36 = vld [vmem:[%s10015_s1 + $0xa7c] sm:$0xf]  ;;  %v5737_v44 = vld [vmem:[%s10015_s1 + $0x958] sm:$0xf]  ;;  %v6624_v48 = vld [vmem:[%s10015_s1 + $0x8c8] sm:$0xf0] }
  0x3e   : > { %2990 = vmatpush.bf16.msrb.mxu0 %v4986_v37  ;;  %2968 = vmatmul.bf16.vlgmr.msrb.gmra.mxu1 %v7162_v57  ;;  %v5879_v37 = vld [vmem:[%s10015_s1 + $0xb0c] sm:$0xf0]  ;;  %v6382_v39 = vld [vmem:[%s10015_s1 + $0x13c] sm:$0xf]  ;;  %v5597_v47 = vld [vmem:[%s10015_s1 + $0x838] sm:$0xf] }
  0x3f   : > { %3029 = vmatpush.bf16.msra.mxu1 %v6174_v30  ;;  %3038 = vmatpush.bf16.msra.mxu2 %v5586_v31  ;;  %v5293_v30 = vld [vmem:[%s10015_s1 + $0x5e0] sm:$0xf]  ;;  %v6549_v31 = vld [vmem:[%s10015_s1 + $0x670] sm:$0xf0]  ;;  %v5882_v46 = vor.u32 %v6678_v36, %v5879_v37  ;;  %v4698_v50 = vor.u32 %v6382_v39, %v4695_v40  ;;  %v4547_v51 = vld [vmem:[%s10015_s1 + $0xa4] sm:$0xf0]  ;;  %v5598_v63 = vor.u32 %v6624_v48, %v5597_v47 }
  0x40   : > { %3016 = vmatpush.bf16.msra.mxu3 %v4990_v33  ;;  %6306 = vmatmul.msk.bf16.vlgmr.msrb.gmra.mxu2 %vm2904_vm0, %v7096_v24  ;;  %v5885_v33 = vld [vmem:[%s10015_s1 + $0xa80] sm:$0xf]  ;;  %v5294_v38 = vor.u32 %v6549_v31, %v5293_v30  ;;  %v6641_v52 = vld [vmem:[%s10015_s1 + $0x954] sm:$0xf]  ;;  %v5731_v53 = vld [vmem:[%s10015_s1 + $0x9e4] sm:$0xf0] }
  0x41   : > { %v6605_v56 = vld [vmem:[%s10015_s1 + $0x834] sm:$0xf]  ;;  %v5591_v58 = vld [vmem:[%s10015_s1 + $0x8c4] sm:$0xf0]  ;;  %v5449_v3 = vld [vmem:[%s10015_s1 + $0x710] sm:$0xf] }
  0x42   : > { %2991 = vmatpush.bf16.msrb.mxu0 %v4838_v49  ;;  %v6345_v49 = vld [vmem:[%s10015_s1 + $0x14] sm:$0xf]  ;;  %v6183_v62 = vld [vmem:[%s10015_s1 + $0xd64] sm:$0xf0]  ;;  %v5594_v2 = vor.u32 %v6605_v56, %v5591_v58  ;;  %v6587_v4 = vld [vmem:[%s10015_s1 + $0x7a0] sm:$0xf0] }
  0x43   : > { %3030 = vmatpush.bf16.msra.mxu1 %v6026_v42  ;;  %3039 = vmatpush.bf16.msra.mxu2 %v5438_v43  ;;  %v5886_v42 = vor.u32 %v6697_v34, %v5885_v33  ;;  %v6512_v43 = vld [vmem:[%s10015_s1 + $0x548] sm:$0xf0]  ;;  %v6753_v61 = vld [vmem:[%s10015_s1 + $0xcd4] sm:$0xf]  ;;  %v4550_v1 = vor.u32 %v6345_v49, %v4547_v51  ;;  %v5443_v9 = vld [vmem:[%s10015_s1 + $0x79c] sm:$0xf0]  ;;  %v5450_v13 = vor.u32 %v6587_v4, %v5449_v3 }
  0x44   : > { %3017 = vmatpush.bf16.msra.mxu3 %v4842_v45  ;;  %v6660_v45 = vld [vmem:[%s10015_s1 + $0x9e8] sm:$0xf0]  ;;  %v6186_v6 = vor.u32 %v6753_v61, %v6183_v62  ;;  %v6438_v10 = vld [vmem:[%s10015_s1 + $0x2f8] sm:$0xf0]  ;;  %v6531_v20 = vld [vmem:[%s10015_s1 + $0x5e4] sm:$0xf] }
  0x45   : > { %v5738_v59 = vor.u32 %v6660_v45, %v5737_v44  ;;  %v5295_v21 = vld [vmem:[%s10015_s1 + $0x674] sm:$0xf0]  ;;  %v6679_v23 = vld [vmem:[%s10015_s1 + $0xa84] sm:$0xf]  ;;  %v5153_v28 = vld [vmem:[%s10015_s1 + $0x4c0] sm:$0xf] }
  0x46   : > { %2992 = vmatpush.bf16.msrb.mxu0 %v4690_v0  ;;  %v5734_v0 = vor.u32 %v6641_v52, %v5731_v53  ;;  %v5887_v25 = vld [vmem:[%s10015_s1 + $0xb14] sm:$0xf0]  ;;  %v5298_v27 = vor.u32 %v6531_v20, %v5295_v21  ;;  %v6364_v33 = vld [vmem:[%s10015_s1 + $0xa8] sm:$0xf0]  ;;  %v6494_v34 = vld [vmem:[%s10015_s1 + $0x4bc] sm:$0xf] }
  0x47   : > { %3031 = vmatpush.bf16.msra.mxu1 %v5878_v54  ;;  %3040 = vmatpush.bf16.msra.mxu2 %v5290_v55  ;;  %v5146_v54 = vor.u32 %v6512_v43, %v5145_v41  ;;  %v4997_v55 = vld [vmem:[%s10015_s1 + $0x390] sm:$0xf]  ;;  %v4553_v30 = vld [vmem:[%s10015_s1 + $0x18] sm:$0xf]  ;;  %v6642_v36 = vld [vmem:[%s10015_s1 + $0x95c] sm:$0xf] }
  0x48   : > { %3018 = vmatpush.bf16.msra.mxu3 %v4694_v60  ;;  %v6475_v60 = vld [vmem:[%s10015_s1 + $0x420] sm:$0xf0]  ;;  %v5739_v37 = vld [vmem:[%s10015_s1 + $0x9ec] sm:$0xf0]  ;;  %v6772_v40 = vld [vmem:[%s10015_s1 + $0xd68] sm:$0xf0] }
  0x49   : > { %v4998_v5 = vor.u32 %v6475_v60, %v4997_v55  ;;  %v6606_v41 = vld [vmem:[%s10015_s1 + $0x83c] sm:$0xf]  ;;  %v5005_v44 = vld [vmem:[%s10015_s1 + $0x398] sm:$0xf]  ;;  %v6476_v45 = vld [vmem:[%s10015_s1 + $0x428] sm:$0xf0]  ;;  %v5742_v47 = vor.u32 %v6642_v36, %v5739_v37 }
  0x4a   : > { %2993 = vmatpush.bf16.msrb.mxu0 %v4542_v16  ;;  %v6550_v16 = vld [vmem:[%s10015_s1 + $0x678] sm:$0xf0]  ;;  %v6457_v48 = vld [vmem:[%s10015_s1 + $0x394] sm:$0xf]  ;;  %v4999_v49 = vld [vmem:[%s10015_s1 + $0x424] sm:$0xf0]  ;;  %v5006_v53 = vor.u32 %v6476_v45, %v5005_v44 }
  0x4b   : > { %3032 = vmatpush.bf16.msra.mxu1 %v5730_v7  ;;  %3041 = vmatpush.bf16.msra.mxu2 %v5142_v8  ;;  %v4849_v7 = vld [vmem:[%s10015_s1 + $0x268] sm:$0xf]  ;;  %v6568_v8 = vld [vmem:[%s10015_s1 + $0x70c] sm:$0xf]  ;;  %v6041_v52 = vld [vmem:[%s10015_s1 + $0xbb0] sm:$0xf]  ;;  %v5002_v58 = vor.u32 %v6457_v48, %v4999_v49 }
  0x4c   : > { %3019 = vmatpush.bf16.msra.mxu3 %v4546_v11  ;;  %v6716_v11 = vld [vmem:[%s10015_s1 + $0xbac] sm:$0xf]  ;;  %v5446_v14 = vor.u32 %v6568_v8, %v5443_v9  ;;  %v4850_v17 = vor.u32 %v6438_v10, %v4849_v7  ;;  %v6569_v55 = vld [vmem:[%s10015_s1 + $0x714] sm:$0xf]  ;;  %v5451_v56 = vld [vmem:[%s10015_s1 + $0x7a4] sm:$0xf0] }
  0x4d   : > { %2994 = vmatmul.bf16.vlgmr.msrb.gmra.mxu0 %v7162_v57  ;;  %v6439_v60 = vld [vmem:[%s10015_s1 + $0x300] sm:$0xf0]  ;;  %v6420_v61 = vld [vmem:[%s10015_s1 + $0x26c] sm:$0xf]  ;;  %v4851_v62 = vld [vmem:[%s10015_s1 + $0x2fc] sm:$0xf0] }
  0x4e   : > { %3055 = vmatpush.bf16.msra.mxu0 %v6178_v19  ;;  %6307 = vmatmul.msk.bf16.vlgmr.msra.gmra.mxu1 %vm2904_vm0, %v7096_v24  ;;  %v4701_v19 = vld [vmem:[%s10015_s1 + $0x140] sm:$0xf]  ;;  %v6698_v3 = vld [vmem:[%s10015_s1 + $0xb18] sm:$0xf0]  ;;  %v6532_v4 = vld [vmem:[%s10015_s1 + $0x5ec] sm:$0xf] }
  0x4f   : > { %3064 = vmatpush.bf16.msrb.mxu1 %v5590_v12  ;;  %3042 = vmatpush.bf16.msra.mxu2 %v4994_v22  ;;  %v6035_v12 = vld [vmem:[%s10015_s1 + $0xc3c] sm:$0xf0]  ;;  %v6401_v22 = vld [vmem:[%s10015_s1 + $0x1d0] sm:$0xf0]  ;;  %v4709_v7 = vld [vmem:[%s10015_s1 + $0x148] sm:$0xf] }
  0x50   : > { %3081 = vmatpush.bf16.msrb.mxu3 %v6182_v15  ;;  %v5301_v15 = vld [vmem:[%s10015_s1 + $0x5e8] sm:$0xf]  ;;  %v6038_v18 = vor.u32 %v6716_v11, %v6035_v12  ;;  %v4702_v31 = vor.u32 %v6401_v22, %v4701_v19  ;;  %v6402_v8 = vld [vmem:[%s10015_s1 + $0x1d8] sm:$0xf0]  ;;  %v6383_v9 = vld [vmem:[%s10015_s1 + $0x144] sm:$0xf] }
  0x51   : > { %3020 = vmatmul.bf16.vlgmr.msra.gmra.mxu3 %v7162_v57  ;;  %v4703_v10 = vld [vmem:[%s10015_s1 + $0x1d4] sm:$0xf0]  ;;  %v5605_v21 = vld [vmem:[%s10015_s1 + $0x840] sm:$0xf]  ;;  %v6625_v22 = vld [vmem:[%s10015_s1 + $0x8d0] sm:$0xf0] }
  0x52   : > { %3056 = vmatpush.bf16.msra.mxu0 %v6030_v32  ;;  %v5890_v32 = vor.u32 %v6679_v23, %v5887_v25  ;;  %v5155_v19 = vld [vmem:[%s10015_s1 + $0x554] sm:$0xf0]  ;;  %v4706_v20 = vor.u32 %v6383_v9, %v4703_v10  ;;  %v6197_v23 = vld [vmem:[%s10015_s1 + $0xce0] sm:$0xf]  ;;  %v6773_v25 = vld [vmem:[%s10015_s1 + $0xd70] sm:$0xf0] }
  0x53   : > { %3065 = vmatpush.bf16.msrb.mxu1 %v5442_v26  ;;  %3043 = vmatpush.bf16.msra.mxu2 %v4846_v35  ;;  %v5302_v26 = vor.u32 %v6550_v16, %v5301_v15  ;;  %v5147_v35 = vld [vmem:[%s10015_s1 + $0x54c] sm:$0xf0]  ;;  %v5745_v15 = vld [vmem:[%s10015_s1 + $0x960] sm:$0xf]  ;;  %v4710_v16 = vor.u32 %v6402_v8, %v4709_v7  ;;  %v6198_v36 = vor.u32 %v6773_v25, %v6197_v23  ;;  %v6717_v44 = vld [vmem:[%s10015_s1 + $0xbb4] sm:$0xf] }
  0x54   : > { %3082 = vmatpush.bf16.msrb.mxu3 %v6034_v29  ;;  %v6513_v29 = vld [vmem:[%s10015_s1 + $0x550] sm:$0xf0]  ;;  %v5150_v43 = vor.u32 %v6494_v34, %v5147_v35  ;;  %v6458_v34 = vld [vmem:[%s10015_s1 + $0x39c] sm:$0xf]  ;;  %v5007_v35 = vld [vmem:[%s10015_s1 + $0x42c] sm:$0xf0] }
  0x55   : > { %v5154_v39 = vor.u32 %v6513_v29, %v5153_v28  ;;  %v6043_v45 = vld [vmem:[%s10015_s1 + $0xc44] sm:$0xf0]  ;;  %v4563_v8 = vld [vmem:[%s10015_s1 + $0xb4] sm:$0xf0]  ;;  %v6643_v9 = vld [vmem:[%s10015_s1 + $0x964] sm:$0xf] }
  0x56   : > { %3057 = vmatpush.bf16.msra.mxu0 %v5882_v46  ;;  %v4554_v46 = vor.u32 %v6364_v33, %v4553_v30  ;;  %v6754_v30 = vld [vmem:[%s10015_s1 + $0xcdc] sm:$0xf]  ;;  %v5606_v33 = vor.u32 %v6625_v22, %v5605_v21  ;;  %v4859_v48 = vld [vmem:[%s10015_s1 + $0x304] sm:$0xf0]  ;;  %v5747_v10 = vld [vmem:[%s10015_s1 + $0x9f4] sm:$0xf0] }
  0x57   : > { %3066 = vmatpush.bf16.msrb.mxu1 %v5294_v38  ;;  %3044 = vmatpush.bf16.msra.mxu2 %v4698_v50  ;;  %v6189_v38 = vld [vmem:[%s10015_s1 + $0xcd8] sm:$0xf]  ;;  %v5465_v23 = vld [vmem:[%s10015_s1 + $0x720] sm:$0xf]  ;;  %v6589_v25 = vld [vmem:[%s10015_s1 + $0x7b0] sm:$0xf0] }
  0x58   : > { %3083 = vmatpush.bf16.msrb.mxu3 %v5886_v42  ;;  %v5599_v42 = vld [vmem:[%s10015_s1 + $0x8cc] sm:$0xf0]  ;;  %v6190_v50 = vor.u32 %v6772_v40, %v6189_v38  ;;  %v5457_v38 = vld [vmem:[%s10015_s1 + $0x718] sm:$0xf] }
  0x59   : > { %v5602_v51 = vor.u32 %v6606_v41, %v5599_v42  ;;  %v6049_v41 = vld [vmem:[%s10015_s1 + $0xbb8] sm:$0xf]  ;;  %v6736_v42 = vld [vmem:[%s10015_s1 + $0xc48] sm:$0xf0] }
  0x5a   : > { %3058 = vmatpush.bf16.msra.mxu0 %v5734_v0  ;;  %v5454_v0 = vor.u32 %v6569_v55, %v5451_v56  ;;  %v6050_v49 = vor.u32 %v6736_v42, %v6049_v41  ;;  %v6680_v56 = vld [vmem:[%s10015_s1 + $0xa8c] sm:$0xf]  ;;  %v6533_v41 = vld [vmem:[%s10015_s1 + $0x5f4] sm:$0xf]  ;;  %v5311_v42 = vld [vmem:[%s10015_s1 + $0x684] sm:$0xf0] }
  0x5b   : > { %3067 = vmatpush.bf16.msrb.mxu1 %v5146_v54  ;;  %3045 = vmatpush.bf16.msra.mxu2 %v4550_v1  ;;  %v6735_v54 = vld [vmem:[%s10015_s1 + $0xc40] sm:$0xf0]  ;;  %v5893_v1 = vld [vmem:[%s10015_s1 + $0xa88] sm:$0xf] }
  0x5c   : > { %3084 = vmatpush.bf16.msrb.mxu3 %v5738_v59  ;;  %v4857_v59 = vld [vmem:[%s10015_s1 + $0x270] sm:$0xf]  ;;  %v5894_v11 = vor.u32 %v6698_v3, %v5893_v1  ;;  %v5753_v1 = vld [vmem:[%s10015_s1 + $0x968] sm:$0xf] }
  0x5d   : > { %6308 = vmatmul.msk.bf16.vlgmr.msra.gmra.mxu0 %vm2904_vm0, %v7096_v24 }
  0x5e   : > { %3090 = vmatpush.bf16.msrb.mxu0 %v5594_v2  ;;  %3046 = vmatmul.bf16.vlgmr.msra.gmra.mxu2 %v7162_v57  ;;  %v4858_v2 = vor.u32 %v6439_v60, %v4857_v59  ;;  %v6384_v60 = vld [vmem:[%s10015_s1 + $0x14c] sm:$0xf] }
  0x5f   : > { %3068 = vmatpush.bf16.msrb.mxu1 %v4998_v5  ;;  %3107 = vmatpush.bf16.msrb.mxu2 %v6186_v6  ;;  %v5303_v5 = vld [vmem:[%s10015_s1 + $0x67c] sm:$0xf0]  ;;  %v4854_v6 = vor.u32 %v6420_v61, %v4851_v62  ;;  %v5161_v62 = vld [vmem:[%s10015_s1 + $0x4c8] sm:$0xf] }
  0x60   : > { %3116 = vmatpush.bf16.msra.mxu3 %v5598_v63  ;;  %v6042_v63 = vor.u32 %v6735_v54, %v6041_v52  ;;  %v5306_v12 = vor.u32 %v6532_v4, %v5303_v5  ;;  %v6046_v52 = vor.u32 %v6717_v44, %v6043_v45  ;;  %v6699_v54 = vld [vmem:[%s10015_s1 + $0xb20] sm:$0xf0]  ;;  %v4711_v61 = vld [vmem:[%s10015_s1 + $0x1dc] sm:$0xf0]  ;;  %v5613_v4 = vld [vmem:[%s10015_s1 + $0x848] sm:$0xf] }
  0x61   : > { %6309 = vmatmul.msk.bf16.vlgmr.msrb.gmra.mxu3 %vm2904_vm0, %v7096_v24  ;;  %v6626_v5 = vld [vmem:[%s10015_s1 + $0x8d8] sm:$0xf0]  ;;  %v4714_v7 = vor.u32 %v6384_v60, %v4711_v61  ;;  %v6681_v44 = vld [vmem:[%s10015_s1 + $0xa94] sm:$0xf]  ;;  %v5903_v45 = vld [vmem:[%s10015_s1 + $0xb24] sm:$0xf0] }
  0x62   : > { %3091 = vmatpush.bf16.msrb.mxu0 %v5446_v14  ;;  %v6365_v14 = vld [vmem:[%s10015_s1 + $0xb0] sm:$0xf0]  ;;  %v6774_v61 = vld [vmem:[%s10015_s1 + $0xd78] sm:$0xf0] }
  0x63   : > { %3069 = vmatpush.bf16.msrb.mxu1 %v4850_v17  ;;  %3108 = vmatpush.bf16.msrb.mxu2 %v6038_v18  ;;  %v6661_v17 = vld [vmem:[%s10015_s1 + $0x9f0] sm:$0xf0]  ;;  %v6495_v18 = vld [vmem:[%s10015_s1 + $0x4c4] sm:$0xf] }
  0x64   : > { %3117 = vmatpush.bf16.msra.mxu3 %v5450_v13  ;;  %v4561_v13 = vld [vmem:[%s10015_s1 + $0x20] sm:$0xf]  ;;  %v5746_v28 = vor.u32 %v6661_v17, %v5745_v15  ;;  %v5158_v29 = vor.u32 %v6495_v18, %v5155_v19  ;;  %v6755_v17 = vld [vmem:[%s10015_s1 + $0xce4] sm:$0xf]  ;;  %v6199_v18 = vld [vmem:[%s10015_s1 + $0xd74] sm:$0xf0]  ;;  %v5614_v19 = vor.u32 %v6626_v5, %v5613_v4 }
  0x65   : > { %v6459_v5 = vld [vmem:[%s10015_s1 + $0x3a4] sm:$0xf] }
  0x66   : > { %3092 = vmatpush.bf16.msrb.mxu0 %v5298_v27  ;;  %v4555_v27 = vld [vmem:[%s10015_s1 + $0xac] sm:$0xf0] }
  0x67   : > { %3070 = vmatpush.bf16.msrb.mxu1 %v4702_v31  ;;  %3109 = vmatpush.bf16.msrb.mxu2 %v5890_v32  ;;  %v6191_v31 = vld [vmem:[%s10015_s1 + $0xd6c] sm:$0xf0]  ;;  %v4562_v32 = vor.u32 %v6365_v14, %v4561_v13  ;;  %v6607_v13 = vld [vmem:[%s10015_s1 + $0x844] sm:$0xf]  ;;  %v5607_v14 = vld [vmem:[%s10015_s1 + $0x8d4] sm:$0xf0] }
  0x68   : > { %3118 = vmatpush.bf16.msra.mxu3 %v5302_v26  ;;  %v6346_v26 = vld [vmem:[%s10015_s1 + $0x1c] sm:$0xf]  ;;  %v6194_v40 = vor.u32 %v6754_v30, %v6191_v31  ;;  %v5610_v22 = vor.u32 %v6607_v13, %v5607_v14  ;;  %v5459_v30 = vld [vmem:[%s10015_s1 + $0x7ac] sm:$0xf0]  ;;  %v6440_v31 = vld [vmem:[%s10015_s1 + $0x308] sm:$0xf0] }
  0x69   : > { %v4558_v37 = vor.u32 %v6346_v26, %v4555_v27  ;;  %v6202_v27 = vor.u32 %v6755_v17, %v6199_v18  ;;  %v5467_v13 = vld [vmem:[%s10015_s1 + $0x7b4] sm:$0xf0]  ;;  %v6422_v17 = vld [vmem:[%s10015_s1 + $0x27c] sm:$0xf]  ;;  %v4867_v18 = vld [vmem:[%s10015_s1 + $0x30c] sm:$0xf0] }
  0x6a   : > { %3093 = vmatpush.bf16.msrb.mxu0 %v5150_v43  ;;  %v5010_v43 = vor.u32 %v6458_v34, %v5007_v35  ;;  %v5466_v34 = vor.u32 %v6589_v25, %v5465_v23  ;;  %v6700_v23 = vld [vmem:[%s10015_s1 + $0xb28] sm:$0xf0]  ;;  %v6534_v25 = vld [vmem:[%s10015_s1 + $0x5fc] sm:$0xf] }
  0x6b   : > { %3071 = vmatpush.bf16.msrb.mxu1 %v4554_v46  ;;  %3110 = vmatpush.bf16.msrb.mxu2 %v5742_v47  ;;  %v6421_v47 = vld [vmem:[%s10015_s1 + $0x274] sm:$0xf] }
  0x6c   : > { %3119 = vmatpush.bf16.msra.mxu3 %v5154_v39  ;;  %v6588_v39 = vld [vmem:[%s10015_s1 + $0x7a8] sm:$0xf0]  ;;  %v4862_v55 = vor.u32 %v6421_v47, %v4859_v48  ;;  %v5314_v47 = vor.u32 %v6533_v41, %v5311_v42  ;;  %v5169_v48 = vld [vmem:[%s10015_s1 + $0x4d0] sm:$0xf] }
  0x6d   : > { %v5458_v46 = vor.u32 %v6588_v39, %v5457_v38  ;;  %v5621_v42 = vld [vmem:[%s10015_s1 + $0x850] sm:$0xf] }
  0x6e   : > { %3094 = vmatpush.bf16.msrb.mxu0 %v5002_v58  ;;  %3072 = vmatmul.bf16.vlgmr.msrb.gmra.mxu1 %v7162_v57  ;;  %v5895_v58 = vld [vmem:[%s10015_s1 + $0xb1c] sm:$0xf0] }
  0x6f   : > { %3133 = vmatpush.bf16.msra.mxu1 %v6190_v50  ;;  %3142 = vmatpush.bf16.msra.mxu2 %v5602_v51  ;;  %v5309_v50 = vld [vmem:[%s10015_s1 + $0x5f0] sm:$0xf]  ;;  %v6551_v51 = vld [vmem:[%s10015_s1 + $0x680] sm:$0xf0]  ;;  %v5898_v3 = vor.u32 %v6680_v56, %v5895_v58  ;;  %v6644_v56 = vld [vmem:[%s10015_s1 + $0x96c] sm:$0xf] }
  0x70   : > { %3120 = vmatpush.bf16.msra.mxu3 %v5006_v53  ;;  %6310 = vmatmul.msk.bf16.vlgmr.msrb.gmra.mxu2 %vm2904_vm0, %v7096_v24  ;;  %v5901_v53 = vld [vmem:[%s10015_s1 + $0xa90] sm:$0xf]  ;;  %v5310_v59 = vor.u32 %v6551_v51, %v5309_v50  ;;  %v4569_v50 = vld [vmem:[%s10015_s1 + $0x28] sm:$0xf]  ;;  %v5755_v58 = vld [vmem:[%s10015_s1 + $0x9fc] sm:$0xf0] }
  0x71   : > { %v5758_v4 = vor.u32 %v6644_v56, %v5755_v58 }
  0x72   : > { %3095 = vmatpush.bf16.msrb.mxu0 %v4854_v6  ;;  %v6347_v6 = vld [vmem:[%s10015_s1 + $0x24] sm:$0xf] }
  0x73   : > { %3134 = vmatpush.bf16.msra.mxu1 %v6042_v63  ;;  %3143 = vmatpush.bf16.msra.mxu2 %v5454_v0  ;;  %v5902_v63 = vor.u32 %v6699_v54, %v5901_v53  ;;  %v6514_v0 = vld [vmem:[%s10015_s1 + $0x558] sm:$0xf0]  ;;  %v4566_v21 = vor.u32 %v6347_v6, %v4563_v8  ;;  %v6496_v54 = vld [vmem:[%s10015_s1 + $0x4cc] sm:$0xf]  ;;  %v5015_v6 = vld [vmem:[%s10015_s1 + $0x434] sm:$0xf0] }
  0x74   : > { %3121 = vmatpush.bf16.msra.mxu3 %v4858_v2  ;;  %v6662_v2 = vld [vmem:[%s10015_s1 + $0x9f8] sm:$0xf0]  ;;  %v5018_v14 = vor.u32 %v6459_v5, %v5015_v6  ;;  %v4875_v5 = vld [vmem:[%s10015_s1 + $0x314] sm:$0xf0] }
  0x75   : > { %v5754_v15 = vor.u32 %v6662_v2, %v5753_v1  ;;  %v6366_v53 = vld [vmem:[%s10015_s1 + $0xb8] sm:$0xf0]  ;;  %v5021_v1 = vld [vmem:[%s10015_s1 + $0x3a8] sm:$0xf] }
  0x76   : > { %3096 = vmatpush.bf16.msrb.mxu0 %v4706_v20  ;;  %v5750_v20 = vor.u32 %v6643_v9, %v5747_v10  ;;  %v6478_v2 = vld [vmem:[%s10015_s1 + $0x438] sm:$0xf0]  ;;  %v6057_v9 = vld [vmem:[%s10015_s1 + $0xbc0] sm:$0xf] }
  0x77   : > { %3135 = vmatpush.bf16.msra.mxu1 %v5894_v11  ;;  %3144 = vmatpush.bf16.msra.mxu2 %v5306_v12  ;;  %v5162_v11 = vor.u32 %v6514_v0, %v5161_v62  ;;  %v5013_v12 = vld [vmem:[%s10015_s1 + $0x3a0] sm:$0xf]  ;;  %v6608_v62 = vld [vmem:[%s10015_s1 + $0x84c] sm:$0xf]  ;;  %v5022_v10 = vor.u32 %v6478_v2, %v5021_v1  ;;  %v6719_v1 = vld [vmem:[%s10015_s1 + $0xbc4] sm:$0xf] }
  0x78   : > { %3122 = vmatpush.bf16.msra.mxu3 %v4710_v16  ;;  %v6477_v16 = vld [vmem:[%s10015_s1 + $0x430] sm:$0xf0]  ;;  %v6059_v2 = vld [vmem:[%s10015_s1 + $0xc54] sm:$0xf0] }
  0x79   : > { %v5014_v26 = vor.u32 %v6477_v16, %v5013_v12  ;;  %v6571_v12 = vld [vmem:[%s10015_s1 + $0x724] sm:$0xf]  ;;  %v6441_v16 = vld [vmem:[%s10015_s1 + $0x310] sm:$0xf0] }
  0x7a   : > { %3097 = vmatpush.bf16.msrb.mxu0 %v4558_v37  ;;  %v6552_v37 = vld [vmem:[%s10015_s1 + $0x688] sm:$0xf0] }
  0x7b   : > { %3136 = vmatpush.bf16.msra.mxu1 %v5746_v28  ;;  %3145 = vmatpush.bf16.msra.mxu2 %v5158_v29  ;;  %v4865_v28 = vld [vmem:[%s10015_s1 + $0x278] sm:$0xf]  ;;  %v6570_v29 = vld [vmem:[%s10015_s1 + $0x71c] sm:$0xf] }
  0x7c   : > { %3123 = vmatpush.bf16.msra.mxu3 %v4562_v32  ;;  %v6718_v32 = vld [vmem:[%s10015_s1 + $0xbbc] sm:$0xf]  ;;  %v5462_v35 = vor.u32 %v6570_v29, %v5459_v30  ;;  %v4866_v38 = vor.u32 %v6440_v31, %v4865_v28  ;;  %v4725_v28 = vld [vmem:[%s10015_s1 + $0x158] sm:$0xf]  ;;  %v6404_v29 = vld [vmem:[%s10015_s1 + $0x1e8] sm:$0xf0] }
  0x7d   : > { %3098 = vmatmul.bf16.vlgmr.msrb.gmra.mxu0 %v7162_v57  ;;  %v6385_v30 = vld [vmem:[%s10015_s1 + $0x154] sm:$0xf]  ;;  %v4719_v31 = vld [vmem:[%s10015_s1 + $0x1e4] sm:$0xf0] }
  0x7e   : > { %3159 = vmatpush.bf16.msra.mxu0 %v6194_v40  ;;  %6311 = vmatmul.msk.bf16.vlgmr.msra.gmra.mxu1 %vm2904_vm0, %v7096_v24  ;;  %v4717_v40 = vld [vmem:[%s10015_s1 + $0x150] sm:$0xf]  ;;  %v4722_v41 = vor.u32 %v6385_v30, %v4719_v31  ;;  %v6645_v30 = vld [vmem:[%s10015_s1 + $0x974] sm:$0xf]  ;;  %v5763_v31 = vld [vmem:[%s10015_s1 + $0xa04] sm:$0xf0] }
  0x7f   : > { %3168 = vmatpush.bf16.msrb.mxu1 %v5606_v33  ;;  %3146 = vmatpush.bf16.msra.mxu2 %v5010_v43  ;;  %v6051_v33 = vld [vmem:[%s10015_s1 + $0xc4c] sm:$0xf0]  ;;  %v6403_v43 = vld [vmem:[%s10015_s1 + $0x1e0] sm:$0xf0] }
  0x80   : > { %3185 = vmatpush.bf16.msrb.mxu3 %v6198_v36  ;;  %v5317_v36 = vld [vmem:[%s10015_s1 + $0x5f8] sm:$0xf]  ;;  %v6054_v39 = vor.u32 %v6718_v32, %v6051_v33  ;;  %v4718_v51 = vor.u32 %v6403_v43, %v4717_v40  ;;  %v5171_v40 = vld [vmem:[%s10015_s1 + $0x564] sm:$0xf0]  ;;  %v6627_v43 = vld [vmem:[%s10015_s1 + $0x8e0] sm:$0xf0] }
  0x81   : > { %3124 = vmatmul.bf16.vlgmr.msra.gmra.mxu3 %v7162_v57 }
  0x82   : > { %3160 = vmatpush.bf16.msra.mxu0 %v6046_v52  ;;  %v5906_v52 = vor.u32 %v6681_v44, %v5903_v45  ;;  %v6213_v44 = vld [vmem:[%s10015_s1 + $0xcf0] sm:$0xf]  ;;  %v6775_v45 = vld [vmem:[%s10015_s1 + $0xd80] sm:$0xf0] }
  0x83   : > { %3169 = vmatpush.bf16.msrb.mxu1 %v5458_v46  ;;  %3147 = vmatpush.bf16.msra.mxu2 %v4862_v55  ;;  %v5318_v46 = vor.u32 %v6552_v37, %v5317_v36  ;;  %v5163_v55 = vld [vmem:[%s10015_s1 + $0x55c] sm:$0xf0]  ;;  %v5761_v36 = vld [vmem:[%s10015_s1 + $0x970] sm:$0xf]  ;;  %v4726_v37 = vor.u32 %v6404_v29, %v4725_v28  ;;  %v6214_v56 = vor.u32 %v6775_v45, %v6213_v44  ;;  %v4579_v29 = vld [vmem:[%s10015_s1 + $0xc4] sm:$0xf0] }
  0x84   : > { %3186 = vmatpush.bf16.msrb.mxu3 %v6050_v49  ;;  %v6515_v49 = vld [vmem:[%s10015_s1 + $0x560] sm:$0xf0]  ;;  %v5166_v0 = vor.u32 %v6496_v54, %v5163_v55  ;;  %v6460_v54 = vld [vmem:[%s10015_s1 + $0x3ac] sm:$0xf]  ;;  %v5023_v55 = vld [vmem:[%s10015_s1 + $0x43c] sm:$0xf0] }
  0x85   : > { %v5170_v60 = vor.u32 %v6515_v49, %v5169_v48  ;;  %v5481_v45 = vld [vmem:[%s10015_s1 + $0x730] sm:$0xf] }
  0x86   : > { %3161 = vmatpush.bf16.msra.mxu0 %v5898_v3  ;;  %v4570_v3 = vor.u32 %v6366_v53, %v4569_v50  ;;  %v6756_v50 = vld [vmem:[%s10015_s1 + $0xcec] sm:$0xf]  ;;  %v5622_v53 = vor.u32 %v6627_v43, %v5621_v42  ;;  %v5766_v42 = vor.u32 %v6645_v30, %v5763_v31  ;;  %v6610_v30 = vld [vmem:[%s10015_s1 + $0x85c] sm:$0xf]  ;;  %v5631_v31 = vld [vmem:[%s10015_s1 + $0x8ec] sm:$0xf0] }
  0x87   : > { %3170 = vmatpush.bf16.msrb.mxu1 %v5310_v59  ;;  %3148 = vmatpush.bf16.msra.mxu2 %v4714_v7  ;;  %v6205_v59 = vld [vmem:[%s10015_s1 + $0xce8] sm:$0xf] }
  0x88   : > { %3187 = vmatpush.bf16.msrb.mxu3 %v5902_v63  ;;  %v5615_v63 = vld [vmem:[%s10015_s1 + $0x8dc] sm:$0xf0]  ;;  %v6206_v7 = vor.u32 %v6774_v61, %v6205_v59  ;;  %v5473_v59 = vld [vmem:[%s10015_s1 + $0x728] sm:$0xf] }
  0x89   : > { %v5618_v8 = vor.u32 %v6608_v62, %v5615_v63  ;;  %v6065_v62 = vld [vmem:[%s10015_s1 + $0xbc8] sm:$0xf]  ;;  %v6738_v63 = vld [vmem:[%s10015_s1 + $0xc58] sm:$0xf0] }
  0x8a   : > { %3162 = vmatpush.bf16.msra.mxu0 %v5750_v20  ;;  %v5470_v20 = vor.u32 %v6571_v12, %v5467_v13  ;;  %v6066_v6 = vor.u32 %v6738_v63, %v6065_v62  ;;  %v6682_v13 = vld [vmem:[%s10015_s1 + $0xa9c] sm:$0xf] }
  0x8b   : > { %3171 = vmatpush.bf16.msrb.mxu1 %v5162_v11  ;;  %3149 = vmatpush.bf16.msra.mxu2 %v4566_v21  ;;  %v6737_v11 = vld [vmem:[%s10015_s1 + $0xc50] sm:$0xf0]  ;;  %v5909_v21 = vld [vmem:[%s10015_s1 + $0xa98] sm:$0xf]  ;;  %v6554_v62 = vld [vmem:[%s10015_s1 + $0x698] sm:$0xf0] }
  0x8c   : > { %3188 = vmatpush.bf16.msrb.mxu3 %v5754_v15  ;;  %v4873_v15 = vld [vmem:[%s10015_s1 + $0x280] sm:$0xf]  ;;  %v5910_v32 = vor.u32 %v6700_v23, %v5909_v21  ;;  %v5769_v21 = vld [vmem:[%s10015_s1 + $0x978] sm:$0xf] }
  0x8d   : > { %6312 = vmatmul.msk.bf16.vlgmr.msra.gmra.mxu0 %vm2904_vm0, %v7096_v24 }
  0x8e   : > { %3194 = vmatpush.bf16.msrb.mxu0 %v5610_v22  ;;  %3150 = vmatmul.bf16.vlgmr.msra.gmra.mxu2 %v7162_v57  ;;  %v4874_v22 = vor.u32 %v6441_v16, %v4873_v15  ;;  %v6386_v16 = vld [vmem:[%s10015_s1 + $0x15c] sm:$0xf] }
  0x8f   : > { %3172 = vmatpush.bf16.msrb.mxu1 %v5014_v26  ;;  %3211 = vmatpush.bf16.msrb.mxu2 %v6202_v27  ;;  %v5319_v26 = vld [vmem:[%s10015_s1 + $0x68c] sm:$0xf0]  ;;  %v4870_v27 = vor.u32 %v6422_v17, %v4867_v18  ;;  %v5177_v18 = vld [vmem:[%s10015_s1 + $0x4d8] sm:$0xf] }
  0x90   : > { %3220 = vmatpush.bf16.msra.mxu3 %v5614_v19  ;;  %v6058_v19 = vor.u32 %v6737_v11, %v6057_v9  ;;  %v5322_v33 = vor.u32 %v6534_v25, %v5319_v26  ;;  %v6062_v9 = vor.u32 %v6719_v1, %v6059_v2  ;;  %v6701_v11 = vld [vmem:[%s10015_s1 + $0xb30] sm:$0xf0]  ;;  %v4727_v17 = vld [vmem:[%s10015_s1 + $0x1ec] sm:$0xf0]  ;;  %v5629_v25 = vld [vmem:[%s10015_s1 + $0x858] sm:$0xf] }
  0x91   : > { %6313 = vmatmul.msk.bf16.vlgmr.msrb.gmra.mxu3 %vm2904_vm0, %v7096_v24  ;;  %v6628_v26 = vld [vmem:[%s10015_s1 + $0x8e8] sm:$0xf0]  ;;  %v4730_v28 = vor.u32 %v6386_v16, %v4727_v17  ;;  %v4733_v2 = vld [vmem:[%s10015_s1 + $0x160] sm:$0xf]  ;;  %v4585_v16 = vld [vmem:[%s10015_s1 + $0x38] sm:$0xf] }
  0x92   : > { %3195 = vmatpush.bf16.msrb.mxu0 %v5462_v35  ;;  %v6367_v35 = vld [vmem:[%s10015_s1 + $0xc0] sm:$0xf0] }
  0x93   : > { %3173 = vmatpush.bf16.msrb.mxu1 %v4866_v38  ;;  %3212 = vmatpush.bf16.msrb.mxu2 %v6054_v39  ;;  %v6663_v38 = vld [vmem:[%s10015_s1 + $0xa00] sm:$0xf0]  ;;  %v6497_v39 = vld [vmem:[%s10015_s1 + $0x4d4] sm:$0xf] }
  0x94   : > { %3221 = vmatpush.bf16.msra.mxu3 %v5466_v34  ;;  %v4577_v34 = vld [vmem:[%s10015_s1 + $0x30] sm:$0xf]  ;;  %v5762_v48 = vor.u32 %v6663_v38, %v5761_v36  ;;  %v5174_v49 = vor.u32 %v6497_v39, %v5171_v40  ;;  %v6479_v38 = vld [vmem:[%s10015_s1 + $0x440] sm:$0xf0]  ;;  %v6757_v39 = vld [vmem:[%s10015_s1 + $0xcf4] sm:$0xf] }
  0x95   : > { %v6215_v40 = vld [vmem:[%s10015_s1 + $0xd84] sm:$0xf0] }
  0x96   : > { %3196 = vmatpush.bf16.msrb.mxu0 %v5314_v47  ;;  %v4571_v47 = vld [vmem:[%s10015_s1 + $0xbc] sm:$0xf0] }
  0x97   : > { %3174 = vmatpush.bf16.msrb.mxu1 %v4718_v51  ;;  %3213 = vmatpush.bf16.msrb.mxu2 %v5906_v52  ;;  %v6207_v51 = vld [vmem:[%s10015_s1 + $0xd7c] sm:$0xf0]  ;;  %v4578_v52 = vor.u32 %v6367_v35, %v4577_v34  ;;  %v6609_v34 = vld [vmem:[%s10015_s1 + $0x854] sm:$0xf]  ;;  %v5623_v35 = vld [vmem:[%s10015_s1 + $0x8e4] sm:$0xf0] }
  0x98   : > { %3222 = vmatpush.bf16.msra.mxu3 %v5318_v46  ;;  %v6348_v46 = vld [vmem:[%s10015_s1 + $0x2c] sm:$0xf]  ;;  %v6210_v61 = vor.u32 %v6756_v50, %v6207_v51  ;;  %v5626_v44 = vor.u32 %v6609_v34, %v5623_v35  ;;  %v5037_v34 = vld [vmem:[%s10015_s1 + $0x3b8] sm:$0xf] }
  0x99   : > { %v4574_v58 = vor.u32 %v6348_v46, %v4571_v47  ;;  %v6591_v46 = vld [vmem:[%s10015_s1 + $0x7c0] sm:$0xf0]  ;;  %v4881_v47 = vld [vmem:[%s10015_s1 + $0x288] sm:$0xf]  ;;  %v6572_v51 = vld [vmem:[%s10015_s1 + $0x72c] sm:$0xf] }
  0x9a   : > { %3197 = vmatpush.bf16.msrb.mxu0 %v5166_v0  ;;  %v5026_v0 = vor.u32 %v6460_v54, %v5023_v55  ;;  %v8051_v50 = vld [vmem:[%s10016_s2] ss:$4 sm:$0xff]  ;;  %v8112_v17 = vld [vmem:[%s10016_s2 + $0x2] ss:$4 sm:$0xff] }
  0x9b   : > { %3175 = vmatpush.bf16.msrb.mxu1 %v4570_v3  ;;  %3214 = vmatpush.bf16.msrb.mxu2 %v5758_v4  ;;  %v6423_v4 = vld [vmem:[%s10015_s1 + $0x284] sm:$0xf]  ;;  %v6442_v54 = vld [vmem:[%s10015_s1 + $0x318] sm:$0xf0]  ;;  %v6720_v55 = vld [vmem:[%s10015_s1 + $0xbcc] sm:$0xf] }
  0x9c   : > { %3223 = vmatpush.bf16.msra.mxu3 %v5170_v60  ;;  %v6590_v60 = vld [vmem:[%s10015_s1 + $0x7b8] sm:$0xf0]  ;;  %v4878_v12 = vor.u32 %v6423_v4, %v4875_v5  ;;  %v5327_v4 = vld [vmem:[%s10015_s1 + $0x694] sm:$0xf0]  ;;  %v6480_v35 = vld [vmem:[%s10015_s1 + $0x448] sm:$0xf0] }
  0x9d   : > { %v5474_v3 = vor.u32 %v6590_v60, %v5473_v59  ;;  %v3875_v59 = vperm.slane %v8051_v50, 0 }
  0x9e   : > { %3198 = vmatpush.bf16.msrb.mxu0 %v5018_v14  ;;  %3176 = vmatmul.bf16.vlgmr.msrb.gmra.mxu1 %v7162_v57  ;;  %v5911_v14 = vld [vmem:[%s10015_s1 + $0xb2c] sm:$0xf0] }
  0x9f   : > { %3237 = vmatpush.bf16.msra.mxu1 %v6206_v7  ;;  %3246 = vmatpush.bf16.msra.mxu2 %v5618_v8  ;;  %v5325_v7 = vld [vmem:[%s10015_s1 + $0x600] sm:$0xf]  ;;  %v6553_v8 = vld [vmem:[%s10015_s1 + $0x690] sm:$0xf0]  ;;  %v5914_v23 = vor.u32 %v6682_v13, %v5911_v14  ;;  %v3876_v13 = vperm.slane %v8051_v50, 1 }
  0xa0   : > { %3224 = vmatpush.bf16.msra.mxu3 %v5022_v10  ;;  %6314 = vmatmul.msk.bf16.vlgmr.msrb.gmra.mxu2 %vm2904_vm0, %v7096_v24  ;;  %v5917_v10 = vld [vmem:[%s10015_s1 + $0xaa0] sm:$0xf]  ;;  %v5326_v15 = vor.u32 %v6553_v8, %v5325_v7  ;;  %v6405_v7 = vld [vmem:[%s10015_s1 + $0x1f0] sm:$0xf0]  ;;  %v6683_v8 = vld [vmem:[%s10015_s1 + $0xaa4] sm:$0xf] }
  0xa1   : > { %v2930_v36 = vpop.f32.mrf.mxu1 }
  0xa2   : > { %3199 = vmatpush.bf16.msrb.mxu0 %v4870_v27  ;;  %v6349_v27 = vld [vmem:[%s10015_s1 + $0x34] sm:$0xf] }
  0xa3   : > { %3238 = vmatpush.bf16.msra.mxu1 %v6058_v19  ;;  %3247 = vmatpush.bf16.msra.mxu2 %v5470_v20  ;;  %v5918_v19 = vor.u32 %v6701_v11, %v5917_v10  ;;  %v6516_v20 = vld [vmem:[%s10015_s1 + $0x568] sm:$0xf0]  ;;  %v4582_v43 = vor.u32 %v6349_v27, %v4579_v29  ;;  %v5185_v11 = vld [vmem:[%s10015_s1 + $0x4e0] sm:$0xf]  ;;  %v6221_v27 = vld [vmem:[%s10015_s1 + $0xcf8] sm:$0xf] }
  0xa4   : > { %3225 = vmatpush.bf16.msra.mxu3 %v4874_v22  ;;  %v6664_v22 = vld [vmem:[%s10015_s1 + $0xa08] sm:$0xf0] }
  0xa5   : > { %v6776_v29 = vld [vmem:[%s10015_s1 + $0xd88] sm:$0xf0] }
  0xa6   : > { %3200 = vmatpush.bf16.msrb.mxu0 %v4722_v41  ;;  %v5630_v41 = vor.u32 %v6628_v26, %v5629_v25  ;;  %v6646_v25 = vld [vmem:[%s10015_s1 + $0x97c] sm:$0xf]  ;;  %v5771_v26 = vld [vmem:[%s10015_s1 + $0xa0c] sm:$0xf0] }
  0xa7   : > { %3239 = vmatpush.bf16.msra.mxu1 %v5910_v32  ;;  %3248 = vmatpush.bf16.msra.mxu2 %v5322_v33  ;;  %v5178_v32 = vor.u32 %v6516_v20, %v5177_v18  ;;  %v5029_v33 = vld [vmem:[%s10015_s1 + $0x3b0] sm:$0xf]  ;;  %v4734_v18 = vor.u32 %v6405_v7, %v4733_v2  ;;  %v6368_v20 = vld [vmem:[%s10015_s1 + $0xc8] sm:$0xf0]  ;;  %v5925_v2 = vld [vmem:[%s10015_s1 + $0xaa8] sm:$0xf] }
  0xa8   : > { %3226 = vmatpush.bf16.msra.mxu3 %v4726_v37  ;;  %v5770_v37 = vor.u32 %v6664_v22, %v5769_v21  ;;  %v6498_v21 = vld [vmem:[%s10015_s1 + $0x4dc] sm:$0xf]  ;;  %v5179_v22 = vld [vmem:[%s10015_s1 + $0x56c] sm:$0xf0] }
  0xa9   : > { %v2932_v5 = vpop.f32.mrf.mxu1  ;;  %v6702_v7 = vld [vmem:[%s10015_s1 + $0xb38] sm:$0xf0] }
  0xaa   : > { %3201 = vmatpush.bf16.msrb.mxu0 %v4574_v58  ;;  %v5482_v58 = vor.u32 %v6591_v46, %v5481_v45  ;;  %v2917_v63 = vpop.f32.mrf.mxu0  ;;  %v5634_v45 = vor.u32 %v6610_v30, %v5631_v31  ;;  %v6073_v46 = vld [vmem:[%s10015_s1 + $0xbd0] sm:$0xf]  ;;  %v6499_v30 = vld [vmem:[%s10015_s1 + $0x4e4] sm:$0xf]  ;;  %v5187_v31 = vld [vmem:[%s10015_s1 + $0x574] sm:$0xf0] }
  0xab   : > { %3240 = vmatpush.bf16.msra.mxu1 %v5762_v48  ;;  %3249 = vmatpush.bf16.msra.mxu2 %v5174_v49  ;;  %v5030_v48 = vor.u32 %v6479_v38, %v5029_v33  ;;  %v6218_v49 = vor.u32 %v6757_v39, %v6215_v40  ;;  %v5182_v33 = vor.u32 %v6498_v21, %v5179_v22  ;;  %v6461_v39 = vld [vmem:[%s10015_s1 + $0x3b4] sm:$0xf]  ;;  %v5031_v40 = vld [vmem:[%s10015_s1 + $0x444] sm:$0xf0] }
  0xac   : > { %3227 = vmatpush.bf16.msra.mxu3 %v4578_v52  ;;  %v5475_v52 = vld [vmem:[%s10015_s1 + $0x7bc] sm:$0xf0]  ;;  %v5774_v38 = vor.u32 %v6646_v25, %v5771_v26  ;;  %v5926_v21 = vor.u32 %v6702_v7, %v5925_v2  ;;  %v6369_v25 = vld [vmem:[%s10015_s1 + $0xd0] sm:$0xf0] }
  0xad   : > { %3202 = vmatmul.bf16.vlgmr.msrb.gmra.mxu0 %v7162_v57  ;;  %v5478_v60 = vor.u32 %v6572_v51, %v5475_v52  ;;  %v6573_v51 = vld [vmem:[%s10015_s1 + $0x734] sm:$0xf]  ;;  %v5483_v52 = vld [vmem:[%s10015_s1 + $0x7c4] sm:$0xf0]  ;;  %v5777_v26 = vld [vmem:[%s10015_s1 + $0x980] sm:$0xf] }
  0xae   : > { %3263 = vmatpush.bf16.msra.mxu0 %v6210_v61  ;;  %6315 = vmatmul.msk.bf16.vlgmr.msra.gmra.mxu1 %vm2904_vm0, %v7096_v24  ;;  %v5333_v61 = vld [vmem:[%s10015_s1 + $0x608] sm:$0xf] }
  0xaf   : > { %3272 = vmatpush.bf16.msrb.mxu1 %v5622_v53  ;;  %3250 = vmatpush.bf16.msra.mxu2 %v5026_v0  ;;  %v2956_v53 = vpop.f32.mrf.mxu3  ;;  %v4882_v0 = vor.u32 %v6442_v54, %v4881_v47  ;;  %v5334_v10 = vor.u32 %v6554_v62, %v5333_v61  ;;  %v4883_v61 = vld [vmem:[%s10015_s1 + $0x31c] sm:$0xf0] }
  0xb0   : > { %3289 = vmatpush.bf16.msrb.mxu3 %v6214_v56  ;;  %v6067_v56 = vld [vmem:[%s10015_s1 + $0xc5c] sm:$0xf0] }
  0xb1   : > { %3228 = vmatmul.bf16.vlgmr.msra.gmra.mxu3 %v7162_v57  ;;  %v6070_v1 = vor.u32 %v6720_v55, %v6067_v56  ;;  %v5034_v55 = vor.u32 %v6461_v39, %v5031_v40  ;;  %v4889_v56 = vld [vmem:[%s10015_s1 + $0x290] sm:$0xf]  ;;  %v6229_v39 = vld [vmem:[%s10015_s1 + $0xd00] sm:$0xf] }
  0xb2   : > { %3264 = vmatpush.bf16.msra.mxu0 %v6062_v9  ;;  %v5919_v9 = vld [vmem:[%s10015_s1 + $0xb34] sm:$0xf0] }
  0xb3   : > { %3273 = vmatpush.bf16.msrb.mxu1 %v5474_v3  ;;  %3251 = vmatpush.bf16.msra.mxu2 %v4878_v12  ;;  %v6535_v3 = vld [vmem:[%s10015_s1 + $0x604] sm:$0xf] }
  0xb4   : > { %3290 = vmatpush.bf16.msrb.mxu3 %v6066_v6  ;;  %v8084_v6 = vadd.f32 %v2930_v36, %v2917_v63  ;;  %v5330_v14 = vor.u32 %v6535_v3, %v5327_v4 }
  0xb6   : > { %3265 = vmatpush.bf16.msra.mxu0 %v5914_v23  ;;  %v3949_v12 = vadd.f32 %v3875_v59, %v8084_v6 }
  0xb7   : > { %3274 = vmatpush.bf16.msrb.mxu1 %v5326_v15  ;;  %3252 = vmatpush.bf16.msra.mxu2 %v4730_v28  ;;  %v6517_v15 = vld [vmem:[%s10015_s1 + $0x570] sm:$0xf0]  ;;  %v2958_v23 = vpop.f32.mrf.mxu3 }
  0xb8   : > { %3291 = vmatpush.bf16.msrb.mxu3 %v5918_v19  ;;  %v5922_v19 = vor.u32 %v6683_v8, %v5919_v9  ;;  %6796 = vtanh.f32 %v3949_v12  ;;  %v5186_v28 = vor.u32 %v6517_v15, %v5185_v11  ;;  %v6536_v8 = vld [vmem:[%s10015_s1 + $0x60c] sm:$0xf]  ;;  %v5335_v9 = vld [vmem:[%s10015_s1 + $0x69c] sm:$0xf0]  ;;  %v4029_v12 = vperm.slane %v8112_v17, 1 }
  0xb9   : > { %v6406_v15 = vld [vmem:[%s10015_s1 + $0x1f8] sm:$0xf0]  ;;  %v5338_v22 = vor.u32 %v6536_v8, %v5335_v9  ;;  %v4593_v23 = vld [vmem:[%s10015_s1 + $0x40] sm:$0xf]  ;;  %v6721_v8 = vld [vmem:[%s10015_s1 + $0xbd4] sm:$0xf] }
  0xba   : > { %3266 = vmatpush.bf16.msra.mxu0 %v5766_v42  ;;  %v8160_v42 = vld [vmem:[%s10016_s2 + $0x1] ss:$4 sm:$0xff] }
  0xbb   : > { %3275 = vmatpush.bf16.msrb.mxu1 %v5178_v32  ;;  %3253 = vmatpush.bf16.msra.mxu2 %v4582_v43  ;;  %v2943_v32 = vpop.f32.mrf.mxu2  ;;  %v8163_v43 = vsub.f32 1.0, %v8112_v17  ;;  %v4297_v62 = vperm.slane %v8160_v42, 0  ;;  %v2969_v4 = vpop.f32.mrf.mxu1  ;;  %v6075_v9 = vld [vmem:[%s10015_s1 + $0xc64] sm:$0xf0] }
  0xbc   : > { %3292 = vmatpush.bf16.msrb.mxu3 %v5770_v37  ;;  %v8149_v36 = vadd.f32 %v2956_v53, %v2943_v32  ;;  %v4586_v37 = vor.u32 %v6368_v20, %v4585_v16  ;;  %v4028_v53 = vperm.slane %v8112_v17, 0  ;;  %v4735_v20 = vld [vmem:[%s10015_s1 + $0x1f4] sm:$0xf0] }
  0xbd   : > { %6316 = vmatmul.msk.bf16.vlgmr.msra.gmra.mxu0 %vm2904_vm0, %v7096_v24  ;;  %v4144_v54 = vperm.slane %v8163_v43, 0  ;;  %v4145_v63 = vperm.slane %v8163_v43, 1 }
  0xbe   : > { %3298 = vmatpush.bf16.msrb.mxu0 %v5626_v44  ;;  %3254 = vmatmul.bf16.vlgmr.msra.gmra.mxu2 %v7162_v57  ;;  %v6222_v44 = vor.u32 %v6776_v29, %v6221_v27  ;;  %v3950_v47 = vadd.f32 %v3876_v13, %v8149_v36  ;;  %v6797_v59 = vpop.eup %6796  ;;  %v6665_v29 = vld [vmem:[%s10015_s1 + $0xa10] sm:$0xf0] }
  0xbf   : > { %3276 = vmatpush.bf16.msrb.mxu1 %v5030_v48  ;;  %3315 = vmatpush.bf16.msrb.mxu2 %v6218_v49  ;;  %v5038_v48 = vor.u32 %v6480_v35, %v5037_v34  ;;  %v6739_v49 = vld [vmem:[%s10015_s1 + $0xc60] sm:$0xf0]  ;;  %v2982_v5 = vpop.f32.mrf.mxu3  ;;  %v4218_v11 = vmul.f32 %v4144_v54, %v8084_v6  ;;  %v3877_v6 = vperm.slane %v8051_v50, 2  ;;  %v4219_v34 = vmul.f32 %v4145_v63, %v8149_v36  ;;  %v6777_v36 = vld [vmem:[%s10015_s1 + $0xd90] sm:$0xf0] }
  0xc0   : > { %3324 = vmatpush.bf16.msra.mxu3 %v5630_v41  ;;  %v2919_v41 = vpop.f32.mrf.mxu0  ;;  %6798 = vtanh.f32 %v3950_v47  ;;  %v8254_v40 = vadd.f32 %v2982_v5, %v2969_v4  ;;  %v5190_v47 = vor.u32 %v6499_v30, %v5187_v31  ;;  %v6740_v4 = vld [vmem:[%s10015_s1 + $0xc68] sm:$0xf0]  ;;  %v4743_v30 = vld [vmem:[%s10015_s1 + $0x1fc] sm:$0xf0]  ;;  %v5193_v31 = vld [vmem:[%s10015_s1 + $0x4e8] sm:$0xf] }
  0xc1   : > { %6317 = vmatmul.msk.bf16.vlgmr.msrb.gmra.mxu3 %vm2904_vm0, %v7096_v24  ;;  %v6350_v41 = vld [vmem:[%s10015_s1 + $0x3c] sm:$0xf] }
  0xc2   : > { %3299 = vmatpush.bf16.msrb.mxu0 %v5478_v60  ;;  %v6424_v60 = vld [vmem:[%s10015_s1 + $0x28c] sm:$0xf] }
  0xc3   : > { %3277 = vmatpush.bf16.msrb.mxu1 %v4882_v0  ;;  %3316 = vmatpush.bf16.msrb.mxu2 %v6070_v1  ;;  %v6074_v0 = vor.u32 %v6739_v49, %v6073_v46  ;;  %v5486_v1 = vor.u32 %v6573_v51, %v5483_v52  ;;  %v4886_v13 = vor.u32 %v6424_v60, %v4883_v61  ;;  %v2945_v16 = vpop.f32.mrf.mxu2  ;;  %v6223_v49 = vld [vmem:[%s10015_s1 + $0xd8c] sm:$0xf0] }
  0xc4   : > { %3325 = vmatpush.bf16.msra.mxu3 %v5482_v58  ;;  %v6443_v58 = vld [vmem:[%s10015_s1 + $0x320] sm:$0xf0]  ;;  %v5778_v46 = vor.u32 %v6665_v29, %v5777_v26  ;;  %v4594_v51 = vor.u32 %v6369_v25, %v4593_v23  ;;  %v6230_v60 = vor.u32 %v6777_v36, %v6229_v39  ;;  %v4030_v16 = vperm.slane %v8112_v17, 2  ;;  %v6388_v23 = vld [vmem:[%s10015_s1 + $0x16c] sm:$0xf] }
  0xc5   : > { %v4890_v3 = vor.u32 %v6443_v58, %v4889_v56  ;;  %v5039_v56 = vld [vmem:[%s10015_s1 + $0x44c] sm:$0xf0]  ;;  %v6684_v25 = vld [vmem:[%s10015_s1 + $0xaac] sm:$0xf]  ;;  %v5927_v26 = vld [vmem:[%s10015_s1 + $0xb3c] sm:$0xf0] }
  0xc6   : > { %3300 = vmatpush.bf16.msrb.mxu0 %v5330_v14  ;;  %v4741_v14 = vld [vmem:[%s10015_s1 + $0x168] sm:$0xf]  ;;  %v6799_v27 = vpop.eup %6798  ;;  %v4146_v39 = vperm.slane %v8163_v43, 2 }
  0xc7   : > { %3278 = vmatpush.bf16.msrb.mxu1 %v4734_v18  ;;  %3317 = vmatpush.bf16.msrb.mxu2 %v5922_v19  ;;  %v4298_v18 = vperm.slane %v8160_v42, 1  ;;  %v6387_v19 = vld [vmem:[%s10015_s1 + $0x164] sm:$0xf]  ;;  %v2984_v54 = vpop.f32.mrf.mxu3 }
  0xc8   : > { %3326 = vmatpush.bf16.msra.mxu3 %v5334_v10  ;;  %v4102_v10 = vmul.f32 %v6797_v59, %v4028_v53  ;;  %v4738_v35 = vor.u32 %v6387_v19, %v4735_v20  ;;  %v2971_v53 = vpop.f32.mrf.mxu1  ;;  %v5933_v19 = vld [vmem:[%s10015_s1 + $0xab0] sm:$0xf]  ;;  %v6703_v20 = vld [vmem:[%s10015_s1 + $0xb40] sm:$0xf0] }
  0xca   : > { %3301 = vmatpush.bf16.msrb.mxu0 %v5182_v33  ;;  %v4255_v32 = vadd.f32 %v4218_v11, %v4102_v10  ;;  %v4103_v33 = vmul.f32 %v6799_v27, %v4029_v12  ;;  %v6425_v11 = vld [vmem:[%s10015_s1 + $0x294] sm:$0xf]  ;;  %v4891_v12 = vld [vmem:[%s10015_s1 + $0x324] sm:$0xf0] }
  0xcb   : > { %3279 = vmatpush.bf16.msrb.mxu1 %v4586_v37  ;;  %3318 = vmatpush.bf16.msrb.mxu2 %v5774_v38  ;;  %v5637_v37 = vld [vmem:[%s10015_s1 + $0x860] sm:$0xf]  ;;  %v6629_v38 = vld [vmem:[%s10015_s1 + $0x8f0] sm:$0xf0]  ;;  %v3008_v63 = vpop.f32.mrf.mxu2 }
  0xcc   : > { %3327 = vmatpush.bf16.msra.mxu3 %v5186_v28  ;;  %v4742_v28 = vor.u32 %v6406_v15, %v4741_v14  ;;  %v5638_v52 = vor.u32 %v6629_v38, %v5637_v37  ;;  %v4371_v58 = vadd.f32 %v4297_v62, %v4255_v32  ;;  %v3951_v62 = vadd.f32 %v3877_v6, %v8254_v40  ;;  %v5341_v14 = vld [vmem:[%s10015_s1 + $0x610] sm:$0xf]  ;;  %v6555_v15 = vld [vmem:[%s10015_s1 + $0x6a0] sm:$0xf0]  ;;  %v6518_v32 = vld [vmem:[%s10015_s1 + $0x578] sm:$0xf0] }
  0xcd   : > { %v6078_v6 = vor.u32 %v6721_v8, %v6075_v9  ;;  %v5645_v37 = vld [vmem:[%s10015_s1 + $0x868] sm:$0xf]  ;;  %v5194_v54 = vor.u32 %v6518_v32, %v5193_v31  ;;  %v5497_v8 = vld [vmem:[%s10015_s1 + $0x740] sm:$0xf]  ;;  %v6593_v9 = vld [vmem:[%s10015_s1 + $0x7d0] sm:$0xf0] }
  0xce   : > { %3302 = vmatpush.bf16.msrb.mxu0 %v5034_v55  ;;  %3280 = vmatmul.bf16.vlgmr.msrb.gmra.mxu1 %v7162_v57  ;;  %v6462_v55 = vld [vmem:[%s10015_s1 + $0x3bc] sm:$0xf]  ;;  %6800 = vtanh.f32 %v3951_v62 }
  0xcf   : > { %3341 = vmatpush.bf16.msra.mxu1 %v6222_v44  ;;  %3350 = vmatpush.bf16.msra.mxu2 %v5634_v45  ;;  %v4587_v44 = vld [vmem:[%s10015_s1 + $0xcc] sm:$0xf0]  ;;  %v4256_v45 = vadd.f32 %v4219_v34, %v4103_v33  ;;  %v5042_v7 = vor.u32 %v6462_v55, %v5039_v56  ;;  %v5934_v33 = vor.u32 %v6703_v20, %v5933_v19  ;;  %v5785_v34 = vld [vmem:[%s10015_s1 + $0x988] sm:$0xf]  ;;  %v5045_v55 = vld [vmem:[%s10015_s1 + $0x3c0] sm:$0xf] }
  0xd0   : > { %3328 = vmatpush.bf16.msra.mxu3 %v5038_v48  ;;  %6318 = vmatmul.msk.bf16.vlgmr.msrb.gmra.mxu2 %vm2904_vm0, %v7096_v24  ;;  %v6758_v48 = vld [vmem:[%s10015_s1 + $0xcfc] sm:$0xf]  ;;  %v4590_v61 = vor.u32 %v6350_v41, %v4587_v44  ;;  %v3034_v29 = vpop.f32.mrf.mxu1  ;;  %v4147_v41 = vperm.slane %v8163_v43, 3  ;;  %v5930_v44 = vor.u32 %v6684_v25, %v5927_v26  ;;  %v6611_v56 = vld [vmem:[%s10015_s1 + $0x864] sm:$0xf]  ;;  %v4299_v20 = vperm.slane %v8160_v42, 2 }
  0xd1   : > { %v4372_v59 = vadd.f32 %v4298_v18, %v4256_v45  ;;  %v6226_v2 = vor.u32 %v6758_v48, %v6223_v49  ;;  %v3878_v18 = vperm.slane %v8051_v50, 3  ;;  %v6630_v45 = vld [vmem:[%s10015_s1 + $0x8f8] sm:$0xf0]  ;;  %v4595_v48 = vld [vmem:[%s10015_s1 + $0xd4] sm:$0xf0] }
  0xd2   : > { %3303 = vmatpush.bf16.msrb.mxu0 %v4886_v13  ;;  %v6647_v49 = vld [vmem:[%s10015_s1 + $0x984] sm:$0xf] }
  0xd3   : > { %3342 = vmatpush.bf16.msra.mxu1 %v6074_v0  ;;  %3351 = vmatpush.bf16.msra.mxu2 %v5486_v1  ;;  %v5489_v0 = vld [vmem:[%s10015_s1 + $0x738] sm:$0xf]  ;;  %v6592_v1 = vld [vmem:[%s10015_s1 + $0x7c8] sm:$0xf0]  ;;  %v4408_v5 = vpack.c.bf16 %v4372_v59, %v4371_v58  ;;  %v3010_v38 = vpop.f32.mrf.mxu2 }
  0xd4   : > { %3329 = vmatpush.bf16.msra.mxu3 %v4890_v3  ;;  %v6081_v3 = vld [vmem:[%s10015_s1 + $0xbd8] sm:$0xf]  ;;  %v5490_v10 = vor.u32 %v6592_v1, %v5489_v0  ;;  %v3021_v53 = vpop.f32.mrf.mxu3  ;;  %v4031_v0 = vperm.slane %v8112_v17, 3  ;;  %v5646_v1 = vor.u32 %v6630_v45, %v5645_v37  ;;  %v5343_v37 = vld [vmem:[%s10015_s1 + $0x6a4] sm:$0xf0] }
  0xd5   : > { %4430 = vst [vmem:[%s8290_s30] sm:$0xff] %v4408_v5  ;;  %v6082_v13 = vor.u32 %v6740_v4, %v6081_v3  ;;  %v5639_v58 = vld [vmem:[%s10015_s1 + $0x8f4] sm:$0xf0]  ;;  %v4220_v3 = vmul.f32 %v4146_v39, %v8254_v40  ;;  %v6574_v40 = vld [vmem:[%s10015_s1 + $0x73c] sm:$0xf]  ;;  %v6407_v39 = vld [vmem:[%s10015_s1 + $0x200] sm:$0xf0] }
  0xd6   : > { %3304 = vmatpush.bf16.msrb.mxu0 %v4738_v35  ;;  %v6666_v35 = vld [vmem:[%s10015_s1 + $0xa18] sm:$0xf0] }
  0xd7   : > { %3343 = vmatpush.bf16.msra.mxu1 %v5926_v21  ;;  %3352 = vmatpush.bf16.msra.mxu2 %v5338_v22  ;;  %v2995_v21 = vpop.f32.mrf.mxu0  ;;  %v4894_v22 = vor.u32 %v6425_v11, %v4891_v12  ;;  %v5786_v59 = vor.u32 %v6666_v35, %v5785_v34  ;;  %v4897_v12 = vld [vmem:[%s10015_s1 + $0x298] sm:$0xf]  ;;  %v4749_v34 = vld [vmem:[%s10015_s1 + $0x170] sm:$0xf]  ;;  %v6537_v35 = vld [vmem:[%s10015_s1 + $0x614] sm:$0xf] }
  0xd8   : > { %3330 = vmatpush.bf16.msra.mxu3 %v4742_v28  ;;  %v3009_v27 = vadd.f32 %v3008_v63, %v2995_v21  ;;  %v5342_v28 = vor.u32 %v6555_v15, %v5341_v14  ;;  %v6231_v63 = vld [vmem:[%s10015_s1 + $0xd94] sm:$0xf0]  ;;  %v3036_v14 = vpop.f32.mrf.mxu1  ;;  %v8419_v21 = vadd.f32 %v3034_v29, %v3021_v53  ;;  %v6556_v29 = vld [vmem:[%s10015_s1 + $0x6a8] sm:$0xf0]  ;;  %v4601_v53 = vld [vmem:[%s10015_s1 + $0x48] sm:$0xf] }
  0xda   : > { %3305 = vmatpush.bf16.msrb.mxu0 %v4590_v61  ;;  %v3952_v36 = vadd.f32 %v3878_v18, %v3009_v27  ;;  %v6759_v61 = vld [vmem:[%s10015_s1 + $0xd04] sm:$0xf]  ;;  %v4221_v15 = vmul.f32 %v4147_v41, %v3009_v27  ;;  %v6722_v18 = vld [vmem:[%s10015_s1 + $0xbdc] sm:$0xf]  ;;  %v4300_v27 = vperm.slane %v8160_v42, 3 }
  0xdb   : > { %3344 = vmatpush.bf16.msra.mxu1 %v5778_v46  ;;  %3353 = vmatpush.bf16.msra.mxu2 %v5190_v47  ;;  %v6351_v46 = vld [vmem:[%s10015_s1 + $0x44] sm:$0xf]  ;;  %v4746_v47 = vor.u32 %v6388_v23, %v4743_v30  ;;  %v6234_v11 = vor.u32 %v6759_v61, %v6231_v63  ;;  %v5498_v23 = vor.u32 %v6593_v9, %v5497_v8  ;;  %v5349_v30 = vld [vmem:[%s10015_s1 + $0x618] sm:$0xf]  ;;  %v5935_v41 = vld [vmem:[%s10015_s1 + $0xb44] sm:$0xf0] }
  0xdc   : > { %3331 = vmatpush.bf16.msra.mxu3 %v4594_v51  ;;  %v5779_v51 = vld [vmem:[%s10015_s1 + $0xa14] sm:$0xf0]  ;;  %6802 = vtanh.f32 %v3952_v36  ;;  %v4598_v5 = vor.u32 %v6351_v46, %v4595_v48  ;;  %v3023_v31 = vpop.f32.mrf.mxu3  ;;  %v6685_v36 = vld [vmem:[%s10015_s1 + $0xab4] sm:$0xf]  ;;  %v5350_v45 = vor.u32 %v6556_v29, %v5349_v30  ;;  %v3880_v46 = vperm.slane %v8051_v50, 5 }
  0xdd   : > { %3306 = vmatmul.bf16.vlgmr.msrb.gmra.mxu0 %v7162_v57  ;;  %v5782_v62 = vor.u32 %v6647_v49, %v5779_v51  ;;  %v5346_v49 = vor.u32 %v6537_v35, %v5343_v37  ;;  %v5201_v51 = vld [vmem:[%s10015_s1 + $0x4f0] sm:$0xf]  ;;  %v6648_v63 = vld [vmem:[%s10015_s1 + $0x98c] sm:$0xf]  ;;  %v5053_v8 = vld [vmem:[%s10015_s1 + $0x3c8] sm:$0xf] }
  0xde   : > { %3367 = vmatpush.bf16.msra.mxu0 %v6226_v2  ;;  %6319 = vmatmul.msk.bf16.vlgmr.msra.gmra.mxu1 %vm2904_vm0, %v7096_v24  ;;  %v6482_v9 = vld [vmem:[%s10015_s1 + $0x458] sm:$0xf0]  ;;  %v6445_v30 = vld [vmem:[%s10015_s1 + $0x330] sm:$0xf0]  ;;  %v4899_v31 = vld [vmem:[%s10015_s1 + $0x32c] sm:$0xf0] }
  0xdf   : > { %3376 = vmatpush.bf16.msrb.mxu1 %v5638_v52  ;;  %3354 = vmatpush.bf16.msra.mxu2 %v5042_v7  ;;  %v6801_v52 = vpop.eup %6800  ;;  %v2997_v4 = vpop.f32.mrf.mxu0  ;;  %v5642_v7 = vor.u32 %v6611_v56, %v5639_v58  ;;  %v5938_v56 = vor.u32 %v6685_v36, %v5935_v41  ;;  %v6370_v58 = vld [vmem:[%s10015_s1 + $0xd8] sm:$0xf0]  ;;  %v6704_v36 = vld [vmem:[%s10015_s1 + $0xb48] sm:$0xf0] }
  0xe0   : > { %3393 = vmatpush.bf16.msrb.mxu3 %v6230_v60  ;;  %v6481_v60 = vld [vmem:[%s10015_s1 + $0x450] sm:$0xf0]  ;;  %v4104_v2 = vmul.f32 %v6801_v52, %v4030_v16  ;;  %v6444_v16 = vld [vmem:[%s10015_s1 + $0x328] sm:$0xf0]  ;;  %v6519_v52 = vld [vmem:[%s10015_s1 + $0x580] sm:$0xf0] }
  0xe1   : > { %3332 = vmatmul.bf16.vlgmr.msra.gmra.mxu3 %v7162_v57  ;;  %v4898_v32 = vor.u32 %v6444_v16, %v4897_v12  ;;  %v5647_v4 = vld [vmem:[%s10015_s1 + $0x8fc] sm:$0xf0]  ;;  %v4148_v16 = vperm.slane %v8163_v43, 4  ;;  %v6426_v29 = vld [vmem:[%s10015_s1 + $0x29c] sm:$0xf] }
  0xe2   : > { %3368 = vmatpush.bf16.msra.mxu0 %v6078_v6  ;;  %v6083_v6 = vld [vmem:[%s10015_s1 + $0xc6c] sm:$0xf0]  ;;  %v6803_v19 = vpop.eup %6802  ;;  %v4257_v25 = vadd.f32 %v4220_v3, %v4104_v2  ;;  %v6778_v2 = vld [vmem:[%s10015_s1 + $0xd98] sm:$0xf0]  ;;  %v6612_v3 = vld [vmem:[%s10015_s1 + $0x86c] sm:$0xf] }
  0xe3   : > { %3377 = vmatpush.bf16.msrb.mxu1 %v5490_v10  ;;  %3355 = vmatpush.bf16.msra.mxu2 %v4894_v22  ;;  %v5046_v10 = vor.u32 %v6481_v60, %v5045_v55  ;;  %v3879_v22 = vperm.slane %v8051_v50, 4  ;;  %v4105_v26 = vmul.f32 %v6803_v19, %v4031_v0  ;;  %v4750_v55 = vor.u32 %v6407_v39, %v4749_v34  ;;  %v5195_v60 = vld [vmem:[%s10015_s1 + $0x57c] sm:$0xf0]  ;;  %v5941_v39 = vld [vmem:[%s10015_s1 + $0xab8] sm:$0xf] }
  0xe4   : > { %3394 = vmatpush.bf16.msrb.mxu3 %v6082_v13  ;;  %v5491_v13 = vld [vmem:[%s10015_s1 + $0x7cc] sm:$0xf0]  ;;  %v5787_v0 = vld [vmem:[%s10015_s1 + $0xa1c] sm:$0xf0]  ;;  %v3086_v14 = vpop.f32.mrf.mxu3  ;;  %v4149_v34 = vperm.slane %v8163_v43, 5 }
  0xe5   : > { %v4258_v38 = vadd.f32 %v4221_v15, %v4105_v26  ;;  %v5790_v12 = vor.u32 %v6648_v63, %v5787_v0  ;;  %v4032_v15 = vperm.slane %v8112_v17, 4  ;;  %v4905_v19 = vld [vmem:[%s10015_s1 + $0x2a0] sm:$0xf]  ;;  %v6575_v26 = vld [vmem:[%s10015_s1 + $0x744] sm:$0xf] }
  0xe6   : > { %3369 = vmatpush.bf16.msra.mxu0 %v5930_v44  ;;  %v3953_v44 = vadd.f32 %v3879_v22, %v8419_v21  ;;  %v4906_v41 = vor.u32 %v6445_v30, %v4905_v19 }
  0xe7   : > { %3378 = vmatpush.bf16.msrb.mxu1 %v5342_v28  ;;  %3356 = vmatpush.bf16.msra.mxu2 %v4746_v47  ;;  %v5494_v28 = vor.u32 %v6574_v40, %v5491_v13  ;;  %v4373_v47 = vadd.f32 %v4299_v20, %v4257_v25  ;;  %v4374_v48 = vadd.f32 %v4300_v27, %v4258_v38  ;;  %v6463_v40 = vld [vmem:[%s10015_s1 + $0x3c4] sm:$0xf]  ;;  %v5047_v13 = vld [vmem:[%s10015_s1 + $0x454] sm:$0xf0]  ;;  %v6089_v20 = vld [vmem:[%s10015_s1 + $0xbe0] sm:$0xf] }
  0xe8   : > { %3395 = vmatpush.bf16.msrb.mxu3 %v5934_v33  ;;  %v6086_v33 = vor.u32 %v6722_v18, %v6083_v6  ;;  %6804 = vtanh.f32 %v3953_v44  ;;  %v5650_v6 = vor.u32 %v6612_v3, %v5647_v4  ;;  %v6741_v25 = vld [vmem:[%s10015_s1 + $0xc70] sm:$0xf0]  ;;  %v5499_v27 = vld [vmem:[%s10015_s1 + $0x7d4] sm:$0xf0]  ;;  %v3881_v38 = vperm.slane %v8051_v50, 6 }
  0xe9   : > { %v4409_v61 = vpack.c.bf16 %v4374_v48, %v4373_v47  ;;  %v6090_v35 = vor.u32 %v6741_v25, %v6089_v20  ;;  %v5502_v37 = vor.u32 %v6575_v26, %v5499_v27  ;;  %v5351_v47 = vld [vmem:[%s10015_s1 + $0x6ac] sm:$0xf0]  ;;  %v6667_v3 = vld [vmem:[%s10015_s1 + $0xa20] sm:$0xf0]  ;;  %v6239_v25 = vld [vmem:[%s10015_s1 + $0xd9c] sm:$0xf0] }
  0xea   : > { %3370 = vmatpush.bf16.msra.mxu0 %v5782_v62  ;;  %v5202_v62 = vor.u32 %v6519_v52, %v5201_v51  ;;  %v4033_v51 = vperm.slane %v8112_v17, 5  ;;  %v4034_v26 = vperm.slane %v8112_v17, 6 }
  0xeb   : > { %3379 = vmatpush.bf16.msrb.mxu1 %v5194_v54  ;;  %3357 = vmatpush.bf16.msra.mxu2 %v4598_v5  ;;  %v3060_v54 = vpop.f32.mrf.mxu0  ;;  %4431 = vst [vmem:[%s8290_s30 + $0x8] sm:$0xff] %v4409_v61  ;;  %v3047_v5 = vpop.f32.mrf.mxu2 }
  0xec   : > { %3396 = vmatpush.bf16.msrb.mxu3 %v5786_v59  ;;  %v6500_v59 = vld [vmem:[%s10015_s1 + $0x4ec] sm:$0xf]  ;;  %v3073_v44 = vpop.f32.mrf.mxu1 }
  0xed   : > { %6320 = vmatmul.msk.bf16.vlgmr.msra.gmra.mxu0 %vm2904_vm0, %v7096_v24  ;;  %v3087_v52 = vadd.f32 %v3086_v14, %v3073_v44  ;;  %v6631_v14 = vld [vmem:[%s10015_s1 + $0x900] sm:$0xf0]  ;;  %v6097_v44 = vld [vmem:[%s10015_s1 + $0xbe8] sm:$0xf] }
  0xee   : > { %3402 = vmatpush.bf16.msrb.mxu0 %v5642_v7  ;;  %3358 = vmatmul.bf16.vlgmr.msra.gmra.mxu2 %v7162_v57  ;;  %v5198_v7 = vor.u32 %v6500_v59, %v5195_v60  ;;  %v4751_v59 = vld [vmem:[%s10015_s1 + $0x204] sm:$0xf0]  ;;  %v3088_v60 = vpop.f32.mrf.mxu3 }
  0xef   : > { %3380 = vmatpush.bf16.msrb.mxu1 %v5046_v10  ;;  %3419 = vmatpush.bf16.msrb.mxu2 %v6234_v11  ;;  %v3061_v10 = vadd.f32 %v3060_v54, %v3047_v5  ;;  %v4602_v11 = vor.u32 %v6370_v58, %v4601_v53  ;;  %v4757_v53 = vld [vmem:[%s10015_s1 + $0x178] sm:$0xf]  ;;  %v6408_v54 = vld [vmem:[%s10015_s1 + $0x208] sm:$0xf0]  ;;  %v5942_v58 = vor.u32 %v6704_v36, %v5941_v39  ;;  %v4302_v5 = vperm.slane %v8160_v42, 5 }
  0xf0   : > { %3428 = vmatpush.bf16.msra.mxu3 %v5646_v1  ;;  %v6237_v1 = vld [vmem:[%s10015_s1 + $0xd08] sm:$0xf]  ;;  %v3955_v63 = vadd.f32 %v3881_v38, %v3087_v52  ;;  %v6594_v39 = vld [vmem:[%s10015_s1 + $0x7d8] sm:$0xf0] }
  0xf1   : > { %6321 = vmatmul.msk.bf16.vlgmr.msrb.gmra.mxu3 %vm2904_vm0, %v7096_v24  ;;  %v6238_v18 = vor.u32 %v6778_v2, %v6237_v1  ;;  %v3954_v22 = vadd.f32 %v3880_v46, %v3061_v10  ;;  %v6538_v46 = vld [vmem:[%s10015_s1 + $0x61c] sm:$0xf]  ;;  %v4223_v61 = vmul.f32 %v4149_v34, %v3061_v10  ;;  %v4609_v1 = vld [vmem:[%s10015_s1 + $0x50] sm:$0xf]  ;;  %v5203_v10 = vld [vmem:[%s10015_s1 + $0x584] sm:$0xf0] }
  0xf2   : > { %3403 = vmatpush.bf16.msrb.mxu0 %v5494_v28  ;;  %v5050_v28 = vor.u32 %v6463_v40, %v5047_v13  ;;  %v5354_v0 = vor.u32 %v6538_v46, %v5351_v47  ;;  %v5793_v2 = vld [vmem:[%s10015_s1 + $0x990] sm:$0xf]  ;;  %v5505_v38 = vld [vmem:[%s10015_s1 + $0x748] sm:$0xf] }
  0xf3   : > { %3381 = vmatpush.bf16.msrb.mxu1 %v4898_v32  ;;  %3420 = vmatpush.bf16.msrb.mxu2 %v6086_v33  ;;  %v6805_v32 = vpop.eup %6804  ;;  %6806 = vtanh.f32 %v3954_v22  ;;  %v3062_v33 = vpop.f32.mrf.mxu0  ;;  %v5653_v13 = vld [vmem:[%s10015_s1 + $0x870] sm:$0xf]  ;;  %v5794_v20 = vor.u32 %v6667_v3, %v5793_v2  ;;  %v6390_v3 = vld [vmem:[%s10015_s1 + $0x17c] sm:$0xf] }
  0xf4   : > { %3429 = vmatpush.bf16.msra.mxu3 %v5498_v23  ;;  %v5054_v23 = vor.u32 %v6482_v9, %v5053_v8  ;;  %v4106_v48 = vmul.f32 %v6805_v32, %v4032_v15  ;;  %v4758_v8 = vor.u32 %v6408_v54, %v4757_v53  ;;  %v6501_v9 = vld [vmem:[%s10015_s1 + $0x4f4] sm:$0xf]  ;;  %6808 = vtanh.f32 %v3955_v63  ;;  %v6245_v15 = vld [vmem:[%s10015_s1 + $0xd10] sm:$0xf]  ;;  %v3075_v30 = vpop.f32.mrf.mxu1 }
  0xf5   : > { %v5206_v22 = vor.u32 %v6501_v9, %v5203_v10  ;;  %v4303_v53 = vperm.slane %v8160_v42, 6  ;;  %v5506_v54 = vor.u32 %v6594_v39, %v5505_v38  ;;  %v4759_v10 = vld [vmem:[%s10015_s1 + $0x20c] sm:$0xf0] }
  0xf6   : > { %3404 = vmatpush.bf16.msrb.mxu0 %v5346_v49  ;;  %v4222_v49 = vmul.f32 %v4148_v16, %v8419_v21  ;;  %v6389_v21 = vld [vmem:[%s10015_s1 + $0x174] sm:$0xf]  ;;  %v6779_v16 = vld [vmem:[%s10015_s1 + $0xda0] sm:$0xf0]  ;;  %v5061_v30 = vld [vmem:[%s10015_s1 + $0x3d0] sm:$0xf] }
  0xf7   : > { %3382 = vmatpush.bf16.msrb.mxu1 %v4750_v55  ;;  %3421 = vmatpush.bf16.msrb.mxu2 %v5938_v56  ;;  %v3049_v55 = vpop.f32.mrf.mxu2  ;;  %v4301_v56 = vperm.slane %v8160_v42, 4  ;;  %v4754_v40 = vor.u32 %v6389_v21, %v4751_v59  ;;  %v6246_v34 = vor.u32 %v6779_v16, %v6245_v15  ;;  %v5357_v21 = vld [vmem:[%s10015_s1 + $0x620] sm:$0xf]  ;;  %v6557_v59 = vld [vmem:[%s10015_s1 + $0x6b0] sm:$0xf0] }
  0xf8   : > { %3430 = vmatpush.bf16.msra.mxu3 %v5350_v45  ;;  %v4902_v45 = vor.u32 %v6426_v29, %v4899_v31  ;;  %v6464_v29 = vld [vmem:[%s10015_s1 + $0x3cc] sm:$0xf]  ;;  %v5055_v31 = vld [vmem:[%s10015_s1 + $0x45c] sm:$0xf0]  ;;  %v6427_v55 = vld [vmem:[%s10015_s1 + $0x2a4] sm:$0xf] }
  0xf9   : > { %v6807_v4 = vpop.eup %6806  ;;  %v5661_v15 = vld [vmem:[%s10015_s1 + $0x878] sm:$0xf] }
  0xfa   : > { %3405 = vmatpush.bf16.msrb.mxu0 %v5198_v7  ;;  %v4150_v7 = vperm.slane %v8163_v43, 6  ;;  %v6809_v46 = vpop.eup %6808 }
  0xfb   : > { %3383 = vmatpush.bf16.msrb.mxu1 %v4602_v11  ;;  %3422 = vmatpush.bf16.msrb.mxu2 %v5790_v12  ;;  %v4259_v11 = vadd.f32 %v4222_v49, %v4106_v48  ;;  %v4107_v12 = vmul.f32 %v6807_v4, %v4033_v51  ;;  %v5058_v48 = vor.u32 %v6464_v29, %v5055_v31  ;;  %v6723_v49 = vld [vmem:[%s10015_s1 + $0xbe4] sm:$0xf]  ;;  %v6091_v51 = vld [vmem:[%s10015_s1 + $0xc74] sm:$0xf0]  ;;  %v5943_v4 = vld [vmem:[%s10015_s1 + $0xb4c] sm:$0xf0] }
  0xfc   : > { %3431 = vmatpush.bf16.msra.mxu3 %v5202_v62  ;;  %v6371_v62 = vld [vmem:[%s10015_s1 + $0xe0] sm:$0xf0]  ;;  %v4224_v36 = vmul.f32 %v4150_v7, %v3087_v52  ;;  %v4108_v52 = vmul.f32 %v6809_v46, %v4034_v26  ;;  %v6094_v63 = vor.u32 %v6723_v49, %v6091_v51  ;;  %v3138_v9 = vpop.f32.mrf.mxu1  ;;  %v5795_v26 = vld [vmem:[%s10015_s1 + $0xa24] sm:$0xf0]  ;;  %v6613_v29 = vld [vmem:[%s10015_s1 + $0x874] sm:$0xf] }
  0xfd   : > { %v4260_v19 = vadd.f32 %v4223_v61, %v4107_v12  ;;  %v4610_v27 = vor.u32 %v6371_v62, %v4609_v1  ;;  %v4375_v32 = vadd.f32 %v4301_v56, %v4259_v11  ;;  %v4907_v56 = vld [vmem:[%s10015_s1 + $0x334] sm:$0xf0]  ;;  %v3882_v61 = vperm.slane %v8051_v50, 7  ;;  %v6705_v1 = vld [vmem:[%s10015_s1 + $0xb50] sm:$0xf0]  ;;  %v3099_v62 = vpop.f32.mrf.mxu0 }
  0xfe   : > { %3406 = vmatpush.bf16.msrb.mxu0 %v5050_v28  ;;  %3384 = vmatmul.bf16.vlgmr.msrb.gmra.mxu1 %v7162_v57  ;;  %v5654_v28 = vor.u32 %v6631_v14, %v5653_v13  ;;  %v4261_v60 = vadd.f32 %v4224_v36, %v4108_v52  ;;  %v4910_v2 = vor.u32 %v6427_v55, %v4907_v56  ;;  %v6686_v50 = vld [vmem:[%s10015_s1 + $0xabc] sm:$0xf]  ;;  %v5209_v11 = vld [vmem:[%s10015_s1 + $0x4f8] sm:$0xf]  ;;  %v6520_v12 = vld [vmem:[%s10015_s1 + $0x588] sm:$0xf0] }
  0xff   : > { %3445 = vmatpush.bf16.msra.mxu1 %v6238_v18  ;;  %3454 = vmatpush.bf16.msra.mxu2 %v5650_v6  ;;  %v6352_v18 = vld [vmem:[%s10015_s1 + $0x4c] sm:$0xf]  ;;  %v4603_v6 = vld [vmem:[%s10015_s1 + $0xdc] sm:$0xf0]  ;;  %v4376_v33 = vadd.f32 %v4302_v5, %v4260_v19  ;;  %v5801_v13 = vld [vmem:[%s10015_s1 + $0x998] sm:$0xf]  ;;  %v5946_v19 = vor.u32 %v6686_v50, %v5943_v4 }
 0x100   : > { %3432 = vmatpush.bf16.msra.mxu3 %v5054_v23  ;;  %6322 = vmatmul.msk.bf16.vlgmr.msrb.gmra.mxu2 %vm2904_vm0, %v7096_v24  ;;  %v6760_v23 = vld [vmem:[%s10015_s1 + $0xd0c] sm:$0xf]  ;;  %v8661_v5 = vadd.f32 %v4303_v53, %v4261_v60  ;;  %v5655_v31 = vld [vmem:[%s10015_s1 + $0x904] sm:$0xf0]  ;;  %v5513_v46 = vld [vmem:[%s10015_s1 + $0x750] sm:$0xf] }
 0x101   : > { %v4410_v47 = vpack.c.bf16 %v4376_v33, %v4375_v32  ;;  %v6668_v14 = vld [vmem:[%s10015_s1 + $0xa28] sm:$0xf0]  ;;  %v6483_v33 = vld [vmem:[%s10015_s1 + $0x460] sm:$0xf0]  ;;  %v4913_v49 = vld [vmem:[%s10015_s1 + $0x2a8] sm:$0xf] }
 0x102   : > { %3407 = vmatpush.bf16.msrb.mxu0 %v4902_v45  ;;  %v6742_v45 = vld [vmem:[%s10015_s1 + $0xc78] sm:$0xf0]  ;;  %v5802_v32 = vor.u32 %v6668_v14, %v5801_v13  ;;  %v6576_v51 = vld [vmem:[%s10015_s1 + $0x74c] sm:$0xf]  ;;  %v5507_v52 = vld [vmem:[%s10015_s1 + $0x7dc] sm:$0xf0] }
 0x103   : > { %3446 = vmatpush.bf16.msra.mxu1 %v6090_v35  ;;  %3455 = vmatpush.bf16.msra.mxu2 %v5502_v37  ;;  %v4606_v35 = vor.u32 %v6352_v18, %v4603_v6  ;;  %v3112_v37 = vpop.f32.mrf.mxu2  ;;  %4432 = vst [vmem:[%s8290_s30 + $0x10] sm:$0xff] %v4410_v47  ;;  %v4151_v6 = vperm.slane %v8163_v43, 7  ;;  %v6649_v43 = vld [vmem:[%s10015_s1 + $0x994] sm:$0xf]  ;;  %v5062_v47 = vor.u32 %v6483_v33, %v5061_v30  ;;  %v6446_v55 = vld [vmem:[%s10015_s1 + $0x338] sm:$0xf0] }
 0x104   : > { %3433 = vmatpush.bf16.msra.mxu3 %v4906_v41  ;;  %v6242_v41 = vor.u32 %v6760_v23, %v6239_v25  ;;  %v3113_v7 = vadd.f32 %v3112_v37, %v3099_v62  ;;  %v4762_v23 = vor.u32 %v6390_v3, %v4759_v10  ;;  %v4611_v25 = vld [vmem:[%s10015_s1 + $0xe4] sm:$0xf0]  ;;  %v4035_v37 = vperm.slane %v8112_v17, 7  ;;  %v6595_v17 = vld [vmem:[%s10015_s1 + $0x7e0] sm:$0xf0]  ;;  %v3140_v53 = vpop.f32.mrf.mxu1 }
 0x105   : > { %v5798_v39 = vor.u32 %v6649_v43, %v5795_v26  ;;  %v8722_v36 = vld [vmem:[%s10016_s2 + $0x20] ss:$4 sm:$0xff]  ;;  %v4914_v50 = vor.u32 %v6446_v55, %v4913_v49  ;;  %v8846_v49 = vld [vmem:[%s10016_s2 + $0x21] ss:$4 sm:$0xff] }
 0x106   : > { %3408 = vmatpush.bf16.msrb.mxu0 %v4754_v40  ;;  %v3956_v18 = vadd.f32 %v3882_v61, %v3113_v7  ;;  %v6724_v56 = vld [vmem:[%s10015_s1 + $0xbec] sm:$0xf]  ;;  %v3883_v60 = vperm.slane %v8722_v36, 0  ;;  %v5514_v61 = vor.u32 %v6595_v17, %v5513_v46  ;;  %v5365_v62 = vld [vmem:[%s10015_s1 + $0x628] sm:$0xf] }
 0x107   : > { %3447 = vmatpush.bf16.msra.mxu1 %v5942_v58  ;;  %3456 = vmatpush.bf16.msra.mxu2 %v5354_v0  ;;  %v6098_v58 = vor.u32 %v6742_v45, %v6097_v44  ;;  %v5949_v0 = vld [vmem:[%s10015_s1 + $0xac0] sm:$0xf]  ;;  %v5658_v45 = vor.u32 %v6613_v29, %v5655_v31  ;;  %v6409_v10 = vld [vmem:[%s10015_s1 + $0x210] sm:$0xf0]  ;;  %v6372_v43 = vld [vmem:[%s10015_s1 + $0xe8] sm:$0xf0] }
 0x108   : > { %3434 = vmatpush.bf16.msra.mxu3 %v4758_v8  ;;  %v5358_v8 = vor.u32 %v6557_v59, %v5357_v21  ;;  %v5950_v40 = vor.u32 %v6705_v1, %v5949_v0  ;;  %6810 = vtanh.f32 %v3956_v18  ;;  %v4304_v0 = vperm.slane %v8160_v42, 7  ;;  %v4765_v42 = vld [vmem:[%s10015_s1 + $0x180] sm:$0xf]  ;;  %v6502_v26 = vld [vmem:[%s10015_s1 + $0x4fc] sm:$0xf] }
 0x109   : > { %v5510_v1 = vor.u32 %v6576_v51, %v5507_v52  ;;  %v6650_v30 = vld [vmem:[%s10015_s1 + $0x99c] sm:$0xf]  ;;  %v5803_v29 = vld [vmem:[%s10015_s1 + $0xa2c] sm:$0xf0]  ;;  %v6253_v31 = vld [vmem:[%s10015_s1 + $0xd18] sm:$0xf] }
 0x10a   : > { %3409 = vmatpush.bf16.msrb.mxu0 %v4606_v35  ;;  %v6247_v35 = vld [vmem:[%s10015_s1 + $0xda4] sm:$0xf0]  ;;  %v6614_v33 = vld [vmem:[%s10015_s1 + $0x87c] sm:$0xf]  ;;  %v5806_v46 = vor.u32 %v6650_v30, %v5803_v29  ;;  %v6465_v17 = vld [vmem:[%s10015_s1 + $0x3d4] sm:$0xf] }
 0x10b   : > { %3448 = vmatpush.bf16.msra.mxu1 %v5794_v20  ;;  %3457 = vmatpush.bf16.msra.mxu2 %v5206_v22  ;;  %v3114_v16 = vpop.f32.mrf.mxu2  ;;  %v6632_v20 = vld [vmem:[%s10015_s1 + $0x908] sm:$0xf0]  ;;  %v6353_v22 = vld [vmem:[%s10015_s1 + $0x54] sm:$0xf]  ;;  %v6105_v53 = vld [vmem:[%s10015_s1 + $0xbf0] sm:$0xf] }
 0x10c   : > { %3435 = vmatpush.bf16.msra.mxu3 %v4610_v27  ;;  %v3125_v27 = vpop.f32.mrf.mxu3  ;;  %v5662_v38 = vor.u32 %v6632_v20, %v5661_v15  ;;  %v4614_v44 = vor.u32 %v6353_v22, %v4611_v25  ;;  %v3884_v15 = vperm.slane %v8722_v36, 1  ;;  %v4617_v20 = vld [vmem:[%s10015_s1 + $0x58] sm:$0xf]  ;;  %v4625_v29 = vld [vmem:[%s10015_s1 + $0x60] sm:$0xf] }
 0x10d   : > { %3410 = vmatmul.bf16.vlgmr.msrb.gmra.mxu0 %v7162_v57  ;;  %v8748_v59 = vadd.f32 %v3138_v9, %v3125_v27  ;;  %v5211_v27 = vld [vmem:[%s10015_s1 + $0x58c] sm:$0xf0] }
 0x10e   : > { %3471 = vmatpush.bf16.msra.mxu0 %v6242_v41  ;;  %6323 = vmatmul.msk.bf16.vlgmr.msra.gmra.mxu1 %vm2904_vm0, %v7096_v24  ;;  %v3101_v41 = vpop.f32.mrf.mxu0  ;;  %v6811_v21 = vpop.eup %6810 }
 0x10f   : > { %3480 = vmatpush.bf16.msrb.mxu1 %v5654_v28  ;;  %3458 = vmatpush.bf16.msra.mxu2 %v5058_v48  ;;  %v5210_v28 = vor.u32 %v6520_v12, %v5209_v11  ;;  %v6687_v11 = vld [vmem:[%s10015_s1 + $0xac4] sm:$0xf]  ;;  %v5951_v12 = vld [vmem:[%s10015_s1 + $0xb54] sm:$0xf0]  ;;  %v3957_v13 = vadd.f32 %v3883_v60, %v8748_v59  ;;  %v6484_v41 = vld [vmem:[%s10015_s1 + $0x468] sm:$0xf0] }
 0x110   : > { %3497 = vmatpush.bf16.msrb.mxu3 %v6246_v34  ;;  %v6761_v34 = vld [vmem:[%s10015_s1 + $0xd14] sm:$0xf]  ;;  %v5954_v25 = vor.u32 %v6687_v11, %v5951_v12  ;;  %v6706_v12 = vld [vmem:[%s10015_s1 + $0xb58] sm:$0xf0] }
 0x111   : > { %3436 = vmatmul.bf16.vlgmr.msra.gmra.mxu3 %v7162_v57  ;;  %v6250_v48 = vor.u32 %v6761_v34, %v6247_v35  ;;  %6812 = vtanh.f32 %v3957_v13  ;;  %v5663_v34 = vld [vmem:[%s10015_s1 + $0x90c] sm:$0xf0]  ;;  %v6540_v13 = vld [vmem:[%s10015_s1 + $0x62c] sm:$0xf] }
 0x112   : > { %3472 = vmatpush.bf16.msra.mxu0 %v6094_v63  ;;  %v4109_v63 = vmul.f32 %v6811_v21, %v4035_v37  ;;  %v5666_v52 = vor.u32 %v6614_v33, %v5663_v34  ;;  %v5515_v21 = vld [vmem:[%s10015_s1 + $0x7e4] sm:$0xf0]  ;;  %v6669_v34 = vld [vmem:[%s10015_s1 + $0xa30] sm:$0xf0] }
 0x113   : > { %3481 = vmatpush.bf16.msrb.mxu1 %v5506_v54  ;;  %3459 = vmatpush.bf16.msra.mxu2 %v4910_v2  ;;  %v4225_v54 = vmul.f32 %v4151_v6, %v3113_v7  ;;  %v6558_v2 = vld [vmem:[%s10015_s1 + $0x6b8] sm:$0xf0]  ;;  %v6539_v7 = vld [vmem:[%s10015_s1 + $0x624] sm:$0xf]  ;;  %v5217_v6 = vld [vmem:[%s10015_s1 + $0x500] sm:$0xf]  ;;  %v3151_v37 = vpop.f32.mrf.mxu2 }
 0x114   : > { %3498 = vmatpush.bf16.msrb.mxu3 %v6098_v58  ;;  %v6099_v58 = vld [vmem:[%s10015_s1 + $0xc7c] sm:$0xf0]  ;;  %v3127_v3 = vpop.f32.mrf.mxu3  ;;  %v5366_v14 = vor.u32 %v6558_v2, %v5365_v62  ;;  %v6428_v2 = vld [vmem:[%s10015_s1 + $0x2ac] sm:$0xf] }
 0x115   : > { %v6102_v4 = vor.u32 %v6724_v56, %v6099_v58  ;;  %v4262_v9 = vadd.f32 %v4225_v54, %v4109_v63  ;;  %v6743_v56 = vld [vmem:[%s10015_s1 + $0xc80] sm:$0xf0]  ;;  %v6577_v58 = vld [vmem:[%s10015_s1 + $0x754] sm:$0xf]  ;;  %v4915_v3 = vld [vmem:[%s10015_s1 + $0x33c] sm:$0xf0] }
 0x116   : > { %3473 = vmatpush.bf16.msra.mxu0 %v5946_v19  ;;  %v6521_v19 = vld [vmem:[%s10015_s1 + $0x590] sm:$0xf0]  ;;  %v3164_v22 = vpop.f32.mrf.mxu0 }
 0x117   : > { %3482 = vmatpush.bf16.msrb.mxu1 %v5358_v8  ;;  %3460 = vmatpush.bf16.msra.mxu2 %v4762_v23  ;;  %v5359_v8 = vld [vmem:[%s10015_s1 + $0x6b4] sm:$0xf0]  ;;  %v4378_v16 = vadd.f32 %v4304_v0, %v4262_v9  ;;  %v4766_v23 = vor.u32 %v6409_v10, %v4765_v42  ;;  %v4921_v0 = vld [vmem:[%s10015_s1 + $0x2b0] sm:$0xf]  ;;  %v6813_v62 = vpop.eup %6812  ;;  %v5957_v9 = vld [vmem:[%s10015_s1 + $0xac8] sm:$0xf] }
 0x118   : > { %3499 = vmatpush.bf16.msrb.mxu3 %v5950_v40  ;;  %v8779_v40 = vld [vmem:[%s10016_s2 + $0x22] ss:$4 sm:$0xff]  ;;  %v5362_v18 = vor.u32 %v6539_v7, %v5359_v8  ;;  %v6106_v7 = vor.u32 %v6743_v56, %v6105_v53  ;;  %v5518_v8 = vor.u32 %v6577_v58, %v5515_v21 }
 0x119   : > { %v8827_v35 = vsub.f32 1.0, %v8779_v40  ;;  %v4036_v60 = vperm.slane %v8779_v40, 0  ;;  %v4619_v53 = vld [vmem:[%s10015_s1 + $0xec] sm:$0xf0] }
 0x11a   : > { %3474 = vmatpush.bf16.msra.mxu0 %v5798_v39  ;;  %v5069_v39 = vld [vmem:[%s10015_s1 + $0x3d8] sm:$0xf]  ;;  %v6255_v58 = vld [vmem:[%s10015_s1 + $0xdac] sm:$0xf0] }
 0x11b   : > { %3483 = vmatpush.bf16.msrb.mxu1 %v5210_v28  ;;  %3461 = vmatpush.bf16.msra.mxu2 %v4614_v44  ;;  %v4411_v28 = vpack.c.bf16 %v4378_v16, %v8661_v5  ;;  %v6780_v5 = vld [vmem:[%s10015_s1 + $0xda8] sm:$0xf0]  ;;  %v3165_v44 = vadd.f32 %v3164_v22, %v3151_v37  ;;  %v5070_v55 = vor.u32 %v6484_v41, %v5069_v39  ;;  %v4153_v42 = vperm.slane %v8827_v35, 1  ;;  %v3177_v11 = vpop.f32.mrf.mxu1  ;;  %v3153_v22 = vpop.f32.mrf.mxu2  ;;  %v6503_v37 = vld [vmem:[%s10015_s1 + $0x504] sm:$0xf] }
 0x11c   : > { %3500 = vmatpush.bf16.msrb.mxu3 %v5802_v32  ;;  %v5218_v32 = vor.u32 %v6521_v19, %v5217_v6  ;;  %v6254_v51 = vor.u32 %v6780_v5, %v6253_v31  ;;  %v4918_v6 = vor.u32 %v6428_v2, %v4915_v3  ;;  %v4773_v19 = vld [vmem:[%s10015_s1 + $0x188] sm:$0xf]  ;;  %v6373_v31 = vld [vmem:[%s10015_s1 + $0xf0] sm:$0xf0]  ;;  %v4038_v22 = vperm.slane %v8779_v40, 2 }
 0x11d   : > { %6324 = vmatmul.msk.bf16.vlgmr.msra.gmra.mxu0 %vm2904_vm0, %v7096_v24  ;;  %4433 = vst [vmem:[%s8290_s30 + $0x18] sm:$0xff] %v4411_v28  ;;  %v3958_v54 = vadd.f32 %v3884_v15, %v3165_v44  ;;  %v4110_v15 = vmul.f32 %v6813_v62, %v4036_v60  ;;  %v5958_v28 = vor.u32 %v6706_v12, %v5957_v9 }
 0x11e   : > { %3506 = vmatpush.bf16.msrb.mxu0 %v5658_v45  ;;  %3462 = vmatmul.bf16.vlgmr.msra.gmra.mxu2 %v7162_v57  ;;  %v4618_v45 = vor.u32 %v6372_v43, %v4617_v20  ;;  %v6410_v20 = vld [vmem:[%s10015_s1 + $0x218] sm:$0xf0]  ;;  %v4767_v43 = vld [vmem:[%s10015_s1 + $0x214] sm:$0xf0]  ;;  %v4626_v21 = vor.u32 %v6373_v31, %v4625_v29  ;;  %v5959_v29 = vld [vmem:[%s10015_s1 + $0xb5c] sm:$0xf0] }
 0x11f   : > { %3484 = vmatpush.bf16.msrb.mxu1 %v5062_v47  ;;  %3523 = vmatpush.bf16.msrb.mxu2 %v6250_v48  ;;  %v5063_v47 = vld [vmem:[%s10015_s1 + $0x464] sm:$0xf0]  ;;  %v8841_v48 = vpop.f32.mrf.mxu3  ;;  %6814 = vtanh.f32 %v3958_v54  ;;  %v4774_v33 = vor.u32 %v6410_v20, %v4773_v19  ;;  %v5373_v19 = vld [vmem:[%s10015_s1 + $0x630] sm:$0xf]  ;;  %v6559_v20 = vld [vmem:[%s10015_s1 + $0x6c0] sm:$0xf0] }
 0x120   : > { %3532 = vmatpush.bf16.msra.mxu3 %v5662_v38  ;;  %v5214_v38 = vor.u32 %v6502_v26, %v5211_v27  ;;  %v5066_v63 = vor.u32 %v6465_v17, %v5063_v47  ;;  %v4227_v27 = vmul.f32 %v4153_v42, %v3165_v44  ;;  %v6261_v17 = vld [vmem:[%s10015_s1 + $0xd20] sm:$0xf]  ;;  %v8935_v47 = vadd.f32 %v8841_v48, %v3177_v11  ;;  %v6762_v48 = vld [vmem:[%s10015_s1 + $0xd1c] sm:$0xf]  ;;  %v5521_v42 = vld [vmem:[%s10015_s1 + $0x758] sm:$0xf] }
 0x121   : > { %6325 = vmatmul.msk.bf16.vlgmr.msrb.gmra.mxu3 %vm2904_vm0, %v7096_v24  ;;  %v6258_v9 = vor.u32 %v6762_v48, %v6255_v58  ;;  %v6651_v48 = vld [vmem:[%s10015_s1 + $0x9a4] sm:$0xf]  ;;  %v5811_v58 = vld [vmem:[%s10015_s1 + $0xa34] sm:$0xf0] }
 0x122   : > { %3507 = vmatpush.bf16.msrb.mxu0 %v5510_v1  ;;  %v6447_v1 = vld [vmem:[%s10015_s1 + $0x340] sm:$0xf0] }
 0x123   : > { %3485 = vmatpush.bf16.msrb.mxu1 %v4914_v50  ;;  %3524 = vmatpush.bf16.msrb.mxu2 %v6102_v4  ;;  %v3166_v50 = vpop.f32.mrf.mxu0  ;;  %v4305_v4 = vperm.slane %v8846_v49, 0  ;;  %v4922_v10 = vor.u32 %v6447_v1, %v4921_v0  ;;  %v5071_v0 = vld [vmem:[%s10015_s1 + $0x46c] sm:$0xf0] }
 0x124   : > { %3533 = vmatpush.bf16.msra.mxu3 %v5514_v61  ;;  %v4152_v61 = vperm.slane %v8827_v35, 0  ;;  %v3216_v50 = vpop.f32.mrf.mxu2 }
 0x125   : > { %v6815_v5 = vpop.eup %6814 }
 0x126   : > { %3508 = vmatpush.bf16.msrb.mxu0 %v5362_v18  ;;  %v4226_v16 = vmul.f32 %v4152_v61, %v8748_v59  ;;  %v4037_v18 = vperm.slane %v8779_v40, 1  ;;  %v6391_v59 = vld [vmem:[%s10015_s1 + $0x184] sm:$0xf]  ;;  %v3179_v61 = vpop.f32.mrf.mxu1 }
 0x127   : > { %3486 = vmatpush.bf16.msrb.mxu1 %v4766_v23  ;;  %3525 = vmatpush.bf16.msrb.mxu2 %v5954_v25  ;;  %v4306_v23 = vperm.slane %v8846_v49, 1  ;;  %v3885_v25 = vperm.slane %v8722_v36, 2  ;;  %v3192_v26 = vpop.f32.mrf.mxu3  ;;  %v4770_v44 = vor.u32 %v6391_v59, %v4767_v43  ;;  %v5965_v59 = vld [vmem:[%s10015_s1 + $0xad0] sm:$0xf]  ;;  %v6707_v43 = vld [vmem:[%s10015_s1 + $0xb60] sm:$0xf0] }
 0x128   : > { %3534 = vmatpush.bf16.msra.mxu3 %v5366_v14  ;;  %v5367_v14 = vld [vmem:[%s10015_s1 + $0x6bc] sm:$0xf0]  ;;  %v4263_v39 = vadd.f32 %v4226_v16, %v4110_v15  ;;  %v4111_v41 = vmul.f32 %v6815_v5, %v4037_v18  ;;  %v6429_v16 = vld [vmem:[%s10015_s1 + $0x2b4] sm:$0xf]  ;;  %v4923_v18 = vld [vmem:[%s10015_s1 + $0x344] sm:$0xf0] }
 0x129   : > { %v5370_v30 = vor.u32 %v6540_v13, %v5367_v14  ;;  %v6725_v13 = vld [vmem:[%s10015_s1 + $0xbf4] sm:$0xf]  ;;  %v6107_v14 = vld [vmem:[%s10015_s1 + $0xc84] sm:$0xf0] }
 0x12a   : > { %3509 = vmatpush.bf16.msrb.mxu0 %v5214_v38  ;;  %v5219_v38 = vld [vmem:[%s10015_s1 + $0x594] sm:$0xf0]  ;;  %v4264_v54 = vadd.f32 %v4227_v27, %v4111_v41  ;;  %v4379_v1 = vadd.f32 %v4305_v4, %v4263_v39  ;;  %v4926_v27 = vor.u32 %v6429_v16, %v4923_v18  ;;  %v5817_v39 = vld [vmem:[%s10015_s1 + $0x9a8] sm:$0xf]  ;;  %v6670_v41 = vld [vmem:[%s10015_s1 + $0xa38] sm:$0xf0] }
 0x12b   : > { %3487 = vmatpush.bf16.msrb.mxu1 %v4618_v45  ;;  %3526 = vmatpush.bf16.msrb.mxu2 %v5806_v46  ;;  %v5669_v45 = vld [vmem:[%s10015_s1 + $0x880] sm:$0xf]  ;;  %v6633_v46 = vld [vmem:[%s10015_s1 + $0x910] sm:$0xf0]  ;;  %v5222_v56 = vor.u32 %v6503_v37, %v5219_v38  ;;  %v6113_v4 = vld [vmem:[%s10015_s1 + $0xbf8] sm:$0xf]  ;;  %v3203_v26 = vpop.f32.mrf.mxu0  ;;  %v5966_v38 = vor.u32 %v6707_v43, %v5965_v59 }
 0x12c   : > { %3535 = vmatpush.bf16.msra.mxu3 %v5218_v32  ;;  %v5809_v32 = vld [vmem:[%s10015_s1 + $0x9a0] sm:$0xf]  ;;  %v5670_v60 = vor.u32 %v6633_v46, %v5669_v45  ;;  %v4380_v62 = vadd.f32 %v4306_v23, %v4264_v54  ;;  %v3886_v23 = vperm.slane %v8722_v36, 3  ;;  %v3217_v31 = vadd.f32 %v3216_v50, %v3203_v26  ;;  %v6522_v37 = vld [vmem:[%s10015_s1 + $0x598] sm:$0xf0]  ;;  %v3218_v45 = vpop.f32.mrf.mxu2 }
 0x12d   : > { %v4154_v46 = vperm.slane %v8827_v35, 2  ;;  %v6355_v54 = vld [vmem:[%s10015_s1 + $0x64] sm:$0xf]  ;;  %v6263_v50 = vld [vmem:[%s10015_s1 + $0xdb4] sm:$0xf0]  ;;  %v4307_v43 = vperm.slane %v8846_v49, 2 }
 0x12e   : > { %3510 = vmatpush.bf16.msrb.mxu0 %v5066_v63  ;;  %3488 = vmatmul.bf16.vlgmr.msrb.gmra.mxu1 %v7162_v57  ;;  %v6466_v63 = vld [vmem:[%s10015_s1 + $0x3dc] sm:$0xf]  ;;  %v4412_v11 = vpack.c.bf16 %v4380_v62, %v4379_v1  ;;  %v3242_v5 = vpop.f32.mrf.mxu1  ;;  %v5671_v1 = vld [vmem:[%s10015_s1 + $0x914] sm:$0xf0]  ;;  %v5818_v62 = vor.u32 %v6670_v41, %v5817_v39  ;;  %v4781_v39 = vld [vmem:[%s10015_s1 + $0x190] sm:$0xf] }
 0x12f   : > { %3549 = vmatpush.bf16.msra.mxu1 %v6254_v51  ;;  %3558 = vmatpush.bf16.msra.mxu2 %v5666_v52  ;;  %v6781_v51 = vld [vmem:[%s10015_s1 + $0xdb0] sm:$0xf0]  ;;  %v6354_v52 = vld [vmem:[%s10015_s1 + $0x5c] sm:$0xf]  ;;  %v5074_v12 = vor.u32 %v6466_v63, %v5071_v0  ;;  %v5077_v63 = vld [vmem:[%s10015_s1 + $0x3e0] sm:$0xf] }
 0x130   : > { %3536 = vmatpush.bf16.msra.mxu3 %v5070_v55  ;;  %6326 = vmatmul.msk.bf16.vlgmr.msrb.gmra.mxu2 %vm2904_vm0, %v7096_v24  ;;  %v5810_v55 = vor.u32 %v6669_v34, %v5809_v32  ;;  %v6262_v2 = vor.u32 %v6781_v51, %v6261_v17  ;;  %v4622_v3 = vor.u32 %v6354_v52, %v4619_v53  ;;  %v5225_v34 = vld [vmem:[%s10015_s1 + $0x508] sm:$0xf]  ;;  %v4155_v51 = vperm.slane %v8827_v35, 3  ;;  %v6634_v53 = vld [vmem:[%s10015_s1 + $0x918] sm:$0xf0] }
 0x131   : > { %4434 = vst [vmem:[%s8290_s30 + $0x20] sm:$0xff] %v4412_v11  ;;  %v5374_v32 = vor.u32 %v6559_v20, %v5373_v19  ;;  %v3960_v17 = vadd.f32 %v3886_v23, %v3217_v31  ;;  %v5226_v61 = vor.u32 %v6522_v37, %v5225_v34  ;;  %v6615_v0 = vld [vmem:[%s10015_s1 + $0x884] sm:$0xf]  ;;  %v4929_v18 = vld [vmem:[%s10015_s1 + $0x2b8] sm:$0xf] }
 0x132   : > { %3511 = vmatpush.bf16.msrb.mxu0 %v4918_v6  ;;  %v4229_v20 = vmul.f32 %v4155_v51, %v3217_v31  ;;  %v6726_v23 = vld [vmem:[%s10015_s1 + $0xbfc] sm:$0xf]  ;;  %v4308_v31 = vperm.slane %v8846_v49, 3  ;;  %v6541_v41 = vld [vmem:[%s10015_s1 + $0x634] sm:$0xf] }
 0x133   : > { %3550 = vmatpush.bf16.msra.mxu1 %v6106_v7  ;;  %3559 = vmatpush.bf16.msra.mxu2 %v5518_v8  ;;  %v6596_v7 = vld [vmem:[%s10015_s1 + $0x7e8] sm:$0xf0]  ;;  %v3959_v8 = vadd.f32 %v3885_v25, %v8935_v47  ;;  %v6110_v25 = vor.u32 %v6725_v13, %v6107_v14  ;;  %v5529_v13 = vld [vmem:[%s10015_s1 + $0x760] sm:$0xf]  ;;  %v6597_v14 = vld [vmem:[%s10015_s1 + $0x7f0] sm:$0xf0] }
 0x134   : > { %3537 = vmatpush.bf16.msra.mxu3 %v4922_v10  ;;  %v6744_v10 = vld [vmem:[%s10015_s1 + $0xc88] sm:$0xf0]  ;;  %v5522_v15 = vor.u32 %v6596_v7, %v5521_v42  ;;  %v4039_v42 = vperm.slane %v8779_v40, 3  ;;  %v5967_v51 = vld [vmem:[%s10015_s1 + $0xb64] sm:$0xf0] }
 0x135   : > { %v6114_v6 = vor.u32 %v6744_v10, %v6113_v4  ;;  %6816 = vtanh.f32 %v3959_v8  ;;  %v5814_v8 = vor.u32 %v6651_v48, %v5811_v58  ;;  %v4228_v4 = vmul.f32 %v4154_v46, %v8935_v47  ;;  %v3205_v10 = vpop.f32.mrf.mxu0  ;;  %v6578_v47 = vld [vmem:[%s10015_s1 + $0x75c] sm:$0xf]  ;;  %v6411_v46 = vld [vmem:[%s10015_s1 + $0x220] sm:$0xf0]  ;;  %v5233_v58 = vld [vmem:[%s10015_s1 + $0x510] sm:$0xf] }
 0x136   : > { %3512 = vmatpush.bf16.msrb.mxu0 %v4770_v44  ;;  %v5677_v44 = vld [vmem:[%s10015_s1 + $0x888] sm:$0xf]  ;;  %6818 = vtanh.f32 %v3960_v17  ;;  %v3244_v19 = vpop.f32.mrf.mxu1  ;;  %v6689_v17 = vld [vmem:[%s10015_s1 + $0xad4] sm:$0xf]  ;;  %v5679_v10 = vld [vmem:[%s10015_s1 + $0x91c] sm:$0xf0] }
 0x137   : > { %3551 = vmatpush.bf16.msra.mxu1 %v5958_v28  ;;  %3560 = vmatpush.bf16.msra.mxu2 %v5370_v30  ;;  %v6392_v28 = vld [vmem:[%s10015_s1 + $0x18c] sm:$0xf]  ;;  %v5678_v7 = vor.u32 %v6634_v53, %v5677_v44  ;;  %v5375_v44 = vld [vmem:[%s10015_s1 + $0x6c4] sm:$0xf0] }
 0x138   : > { %3538 = vmatpush.bf16.msra.mxu3 %v4774_v33  ;;  %v6688_v30 = vld [vmem:[%s10015_s1 + $0xacc] sm:$0xf]  ;;  %v4775_v33 = vld [vmem:[%s10015_s1 + $0x21c] sm:$0xf0]  ;;  %v5378_v48 = vor.u32 %v6541_v41, %v5375_v44 }
 0x139   : > { %v5962_v52 = vor.u32 %v6688_v30, %v5959_v29 }
 0x13a   : > { %3513 = vmatpush.bf16.msrb.mxu0 %v4622_v3  ;;  %v6763_v3 = vld [vmem:[%s10015_s1 + $0xd24] sm:$0xf] }
 0x13b   : > { %3552 = vmatpush.bf16.msra.mxu1 %v5810_v55  ;;  %3561 = vmatpush.bf16.msra.mxu2 %v5222_v56  ;;  %v4778_v55 = vor.u32 %v6392_v28, %v4775_v33  ;;  %v4627_v56 = vld [vmem:[%s10015_s1 + $0xf4] sm:$0xf0]  ;;  %v6266_v16 = vor.u32 %v6763_v3, %v6263_v50  ;;  %v5530_v28 = vor.u32 %v6597_v14, %v5529_v13  ;;  %v6652_v50 = vld [vmem:[%s10015_s1 + $0x9ac] sm:$0xf]  ;;  %v5085_v13 = vld [vmem:[%s10015_s1 + $0x3e8] sm:$0xf] }
 0x13c   : > { %3539 = vmatpush.bf16.msra.mxu3 %v4626_v21  ;;  %v6817_v21 = vpop.eup %6816  ;;  %v4630_v11 = vor.u32 %v6355_v54, %v4627_v56  ;;  %v5381_v33 = vld [vmem:[%s10015_s1 + $0x638] sm:$0xf]  ;;  %v3888_v54 = vperm.slane %v8722_v36, 5  ;;  %v6486_v14 = vld [vmem:[%s10015_s1 + $0x478] sm:$0xf0] }
 0x13d   : > { %3514 = vmatmul.bf16.vlgmr.msrb.gmra.mxu0 %v7162_v57  ;;  %v6819_v59 = vpop.eup %6818 }
 0x13e   : > { %3575 = vmatpush.bf16.msra.mxu0 %v6258_v9  ;;  %6327 = vmatmul.msk.bf16.vlgmr.msra.gmra.mxu1 %vm2904_vm0, %v7096_v24  ;;  %v4112_v9 = vmul.f32 %v6817_v21, %v4038_v22  ;;  %v6448_v22 = vld [vmem:[%s10015_s1 + $0x348] sm:$0xf0]  ;;  %v4113_v29 = vmul.f32 %v6819_v59, %v4039_v42  ;;  %v6523_v21 = vld [vmem:[%s10015_s1 + $0x5a0] sm:$0xf0]  ;;  %v5819_v42 = vld [vmem:[%s10015_s1 + $0xa3c] sm:$0xf0] }
 0x13f   : > { %3584 = vmatpush.bf16.msrb.mxu1 %v5670_v60  ;;  %3562 = vmatpush.bf16.msra.mxu2 %v5074_v12  ;;  %v3229_v60 = vpop.f32.mrf.mxu3  ;;  %v5674_v12 = vor.u32 %v6615_v0, %v5671_v1  ;;  %v4930_v37 = vor.u32 %v6448_v22, %v4929_v18  ;;  %v5970_v0 = vor.u32 %v6689_v17, %v5967_v51  ;;  %v6374_v1 = vld [vmem:[%s10015_s1 + $0xf8] sm:$0xf0]  ;;  %v4156_v22 = vperm.slane %v8827_v35, 4  ;;  %v4937_v59 = vld [vmem:[%s10015_s1 + $0x2c0] sm:$0xf] }
 0x140   : > { %3601 = vmatpush.bf16.msrb.mxu3 %v6262_v2  ;;  %v6485_v2 = vld [vmem:[%s10015_s1 + $0x470] sm:$0xf0]  ;;  %v9093_v26 = vadd.f32 %v3242_v5, %v3229_v60  ;;  %v4265_v30 = vadd.f32 %v4228_v4, %v4112_v9  ;;  %v6560_v5 = vld [vmem:[%s10015_s1 + $0x6c8] sm:$0xf0]  ;;  %v4266_v45 = vadd.f32 %v4229_v20, %v4113_v29  ;;  %v4633_v60 = vld [vmem:[%s10015_s1 + $0x68] sm:$0xf]  ;;  %v5822_v18 = vor.u32 %v6652_v50, %v5819_v42 }
 0x141   : > { %3540 = vmatmul.bf16.vlgmr.msra.gmra.mxu3 %v7162_v57  ;;  %v5382_v53 = vor.u32 %v6560_v5, %v5381_v33  ;;  %v6782_v9 = vld [vmem:[%s10015_s1 + $0xdb8] sm:$0xf0]  ;;  %v6616_v4 = vld [vmem:[%s10015_s1 + $0x88c] sm:$0xf]  ;;  %v4040_v20 = vperm.slane %v8779_v40, 4 }
 0x142   : > { %3576 = vmatpush.bf16.msra.mxu0 %v6110_v25  ;;  %v6115_v25 = vld [vmem:[%s10015_s1 + $0xc8c] sm:$0xf0]  ;;  %v4382_v56 = vadd.f32 %v4308_v31, %v4266_v45  ;;  %v6579_v29 = vld [vmem:[%s10015_s1 + $0x764] sm:$0xf]  ;;  %v5531_v31 = vld [vmem:[%s10015_s1 + $0x7f4] sm:$0xf0] }
 0x143   : > { %3585 = vmatpush.bf16.msrb.mxu1 %v5522_v15  ;;  %3563 = vmatpush.bf16.msra.mxu2 %v4926_v27  ;;  %v5078_v15 = vor.u32 %v6485_v2, %v5077_v63  ;;  %v3887_v27 = vperm.slane %v8722_v36, 4  ;;  %v4782_v63 = vor.u32 %v6411_v46, %v4781_v39  ;;  %v5227_v2 = vld [vmem:[%s10015_s1 + $0x59c] sm:$0xf0]  ;;  %v6449_v33 = vld [vmem:[%s10015_s1 + $0x350] sm:$0xf0]  ;;  %v4157_v39 = vperm.slane %v8827_v35, 5 }
 0x144   : > { %3602 = vmatpush.bf16.msrb.mxu3 %v6114_v6  ;;  %v5523_v6 = vld [vmem:[%s10015_s1 + $0x7ec] sm:$0xf0]  ;;  %v6430_v5 = vld [vmem:[%s10015_s1 + $0x2bc] sm:$0xf]  ;;  %v5534_v44 = vor.u32 %v6579_v29, %v5531_v31  ;;  %v3889_v45 = vperm.slane %v8722_v36, 6  ;;  %v4938_v51 = vor.u32 %v6449_v33, %v4937_v59  ;;  %v4042_v29 = vperm.slane %v8779_v40, 6 }
 0x145   : > { %v5973_v46 = vld [vmem:[%s10015_s1 + $0xad8] sm:$0xf]  ;;  %v6708_v17 = vld [vmem:[%s10015_s1 + $0xb68] sm:$0xf0] }
 0x146   : > { %3577 = vmatpush.bf16.msra.mxu0 %v5962_v52  ;;  %v3961_v52 = vadd.f32 %v3887_v27, %v9093_v26 }
 0x147   : > { %3586 = vmatpush.bf16.msrb.mxu1 %v5374_v32  ;;  %3564 = vmatpush.bf16.msra.mxu2 %v4778_v55  ;;  %v5526_v32 = vor.u32 %v6578_v47, %v5523_v6  ;;  %v3231_v34 = vpop.f32.mrf.mxu3  ;;  %v4381_v55 = vadd.f32 %v4307_v43, %v4265_v30  ;;  %v6467_v47 = vld [vmem:[%s10015_s1 + $0x3e4] sm:$0xf]  ;;  %v5079_v6 = vld [vmem:[%s10015_s1 + $0x474] sm:$0xf0]  ;;  %v6121_v43 = vld [vmem:[%s10015_s1 + $0xc00] sm:$0xf] }
 0x148   : > { %3603 = vmatpush.bf16.msrb.mxu3 %v5966_v38  ;;  %v6118_v38 = vor.u32 %v6726_v23, %v6115_v25  ;;  %6820 = vtanh.f32 %v3961_v52  ;;  %v5682_v25 = vor.u32 %v6616_v4, %v5679_v10  ;;  %v6745_v30 = vld [vmem:[%s10015_s1 + $0xc90] sm:$0xf0]  ;;  %v4931_v34 = vld [vmem:[%s10015_s1 + $0x34c] sm:$0xf0]  ;;  %v6671_v4 = vld [vmem:[%s10015_s1 + $0xa40] sm:$0xf0] }
 0x149   : > { %v4413_v3 = vpack.c.bf16 %v4382_v56, %v4381_v55  ;;  %v6122_v41 = vor.u32 %v6745_v30, %v6121_v43  ;;  %v5383_v55 = vld [vmem:[%s10015_s1 + $0x6cc] sm:$0xf0]  ;;  %v6271_v30 = vld [vmem:[%s10015_s1 + $0xdbc] sm:$0xf0] }
 0x14a   : > { %3578 = vmatpush.bf16.msra.mxu0 %v5814_v8  ;;  %v5234_v8 = vor.u32 %v6523_v21, %v5233_v58  ;;  %v4041_v58 = vperm.slane %v8779_v40, 5 }
 0x14b   : > { %3587 = vmatpush.bf16.msrb.mxu1 %v5226_v61  ;;  %3565 = vmatpush.bf16.msra.mxu2 %v4630_v11  ;;  %v3268_v61 = vpop.f32.mrf.mxu0  ;;  %4435 = vst [vmem:[%s8290_s30 + $0x28] sm:$0xff] %v4413_v3  ;;  %v3255_v11 = vpop.f32.mrf.mxu2 }
 0x14c   : > { %3604 = vmatpush.bf16.msrb.mxu3 %v5818_v62  ;;  %v6504_v62 = vld [vmem:[%s10015_s1 + $0x50c] sm:$0xf]  ;;  %v3281_v52 = vpop.f32.mrf.mxu1 }
 0x14d   : > { %6328 = vmatmul.msk.bf16.vlgmr.msra.gmra.mxu0 %vm2904_vm0, %v7096_v24 }
 0x14e   : > { %3610 = vmatpush.bf16.msrb.mxu0 %v5674_v12  ;;  %3566 = vmatmul.bf16.vlgmr.msra.gmra.mxu2 %v7162_v57  ;;  %v5230_v12 = vor.u32 %v6504_v62, %v5227_v2  ;;  %v4783_v62 = vld [vmem:[%s10015_s1 + $0x224] sm:$0xf0] }
 0x14f   : > { %3588 = vmatpush.bf16.msrb.mxu1 %v5078_v15  ;;  %3627 = vmatpush.bf16.msrb.mxu2 %v6266_v16  ;;  %v3269_v15 = vadd.f32 %v3268_v61, %v3255_v11  ;;  %v4634_v16 = vor.u32 %v6374_v1, %v4633_v60  ;;  %v3294_v19 = vpop.f32.mrf.mxu3  ;;  %v4789_v60 = vld [vmem:[%s10015_s1 + $0x198] sm:$0xf]  ;;  %v6412_v61 = vld [vmem:[%s10015_s1 + $0x228] sm:$0xf0]  ;;  %v5974_v1 = vor.u32 %v6708_v17, %v5973_v46  ;;  %v4310_v11 = vperm.slane %v8846_v49, 5 }
 0x150   : > { %3636 = vmatpush.bf16.msra.mxu3 %v5678_v7  ;;  %v6269_v7 = vld [vmem:[%s10015_s1 + $0xd28] sm:$0xf]  ;;  %v3295_v21 = vadd.f32 %v3294_v19, %v3281_v52  ;;  %v6635_v19 = vld [vmem:[%s10015_s1 + $0x920] sm:$0xf0]  ;;  %v6598_v46 = vld [vmem:[%s10015_s1 + $0x7f8] sm:$0xf0] }
 0x151   : > { %6329 = vmatmul.msk.bf16.vlgmr.msrb.gmra.mxu3 %vm2904_vm0, %v7096_v24  ;;  %v6270_v23 = vor.u32 %v6782_v9, %v6269_v7  ;;  %v3962_v27 = vadd.f32 %v3888_v54, %v3269_v15  ;;  %v6542_v54 = vld [vmem:[%s10015_s1 + $0x63c] sm:$0xf]  ;;  %v4231_v3 = vmul.f32 %v4157_v39, %v3269_v15  ;;  %v4641_v7 = vld [vmem:[%s10015_s1 + $0x70] sm:$0xf]  ;;  %v5235_v15 = vld [vmem:[%s10015_s1 + $0x5a4] sm:$0xf0] }
 0x152   : > { %3611 = vmatpush.bf16.msrb.mxu0 %v5526_v32  ;;  %v5082_v32 = vor.u32 %v6467_v47, %v5079_v6  ;;  %v3963_v50 = vadd.f32 %v3889_v45, %v3295_v21  ;;  %v5386_v42 = vor.u32 %v6542_v54, %v5383_v55  ;;  %v5825_v9 = vld [vmem:[%s10015_s1 + $0x9b0] sm:$0xf]  ;;  %v5537_v45 = vld [vmem:[%s10015_s1 + $0x768] sm:$0xf] }
 0x153   : > { %3589 = vmatpush.bf16.msrb.mxu1 %v4930_v37  ;;  %3628 = vmatpush.bf16.msrb.mxu2 %v6118_v38  ;;  %v6821_v37 = vpop.eup %6820  ;;  %6822 = vtanh.f32 %v3962_v27  ;;  %v3270_v38 = vpop.f32.mrf.mxu0  ;;  %v5685_v6 = vld [vmem:[%s10015_s1 + $0x890] sm:$0xf]  ;;  %v5826_v43 = vor.u32 %v6671_v4, %v5825_v9  ;;  %v6129_v52 = vld [vmem:[%s10015_s1 + $0xc08] sm:$0xf]  ;;  %v6394_v4 = vld [vmem:[%s10015_s1 + $0x19c] sm:$0xf] }
 0x154   : > { %3637 = vmatpush.bf16.msra.mxu3 %v5530_v28  ;;  %v5086_v28 = vor.u32 %v6486_v14, %v5085_v13  ;;  %v4114_v56 = vmul.f32 %v6821_v37, %v4040_v20  ;;  %v4790_v13 = vor.u32 %v6412_v61, %v4789_v60  ;;  %v6505_v14 = vld [vmem:[%s10015_s1 + $0x514] sm:$0xf]  ;;  %6824 = vtanh.f32 %v3963_v50  ;;  %v6277_v20 = vld [vmem:[%s10015_s1 + $0xd30] sm:$0xf]  ;;  %v3283_v33 = vpop.f32.mrf.mxu1 }
 0x155   : > { %v5238_v27 = vor.u32 %v6505_v14, %v5235_v15  ;;  %v4311_v60 = vperm.slane %v8846_v49, 6  ;;  %v5538_v61 = vor.u32 %v6598_v46, %v5537_v45  ;;  %v4791_v15 = vld [vmem:[%s10015_s1 + $0x22c] sm:$0xf0] }
 0x156   : > { %3612 = vmatpush.bf16.msrb.mxu0 %v5378_v48  ;;  %v4230_v48 = vmul.f32 %v4156_v22, %v9093_v26  ;;  %v6393_v26 = vld [vmem:[%s10015_s1 + $0x194] sm:$0xf]  ;;  %v6783_v22 = vld [vmem:[%s10015_s1 + $0xdc0] sm:$0xf0]  ;;  %v5093_v33 = vld [vmem:[%s10015_s1 + $0x3f0] sm:$0xf] }
 0x157   : > { %3590 = vmatpush.bf16.msrb.mxu1 %v4782_v63  ;;  %3629 = vmatpush.bf16.msrb.mxu2 %v5970_v0  ;;  %v3257_v63 = vpop.f32.mrf.mxu2  ;;  %v4309_v0 = vperm.slane %v8846_v49, 4  ;;  %v3296_v2 = vpop.f32.mrf.mxu3  ;;  %v4786_v47 = vor.u32 %v6393_v26, %v4783_v62  ;;  %v6278_v39 = vor.u32 %v6783_v22, %v6277_v20  ;;  %v5389_v26 = vld [vmem:[%s10015_s1 + $0x640] sm:$0xf]  ;;  %v6561_v62 = vld [vmem:[%s10015_s1 + $0x6d0] sm:$0xf0] }
 0x158   : > { %3638 = vmatpush.bf16.msra.mxu3 %v5382_v53  ;;  %v4934_v53 = vor.u32 %v6430_v5, %v4931_v34  ;;  %v6468_v5 = vld [vmem:[%s10015_s1 + $0x3ec] sm:$0xf]  ;;  %v5087_v34 = vld [vmem:[%s10015_s1 + $0x47c] sm:$0xf0]  ;;  %v6431_v63 = vld [vmem:[%s10015_s1 + $0x2c4] sm:$0xf] }
 0x159   : > { %v6823_v10 = vpop.eup %6822  ;;  %v5693_v20 = vld [vmem:[%s10015_s1 + $0x898] sm:$0xf] }
 0x15a   : > { %3613 = vmatpush.bf16.msrb.mxu0 %v5230_v12  ;;  %v4158_v12 = vperm.slane %v8827_v35, 6  ;;  %v6825_v54 = vpop.eup %6824 }
 0x15b   : > { %3591 = vmatpush.bf16.msrb.mxu1 %v4634_v16  ;;  %3630 = vmatpush.bf16.msrb.mxu2 %v5822_v18  ;;  %v4267_v16 = vadd.f32 %v4230_v48, %v4114_v56  ;;  %v4115_v18 = vmul.f32 %v6823_v10, %v4041_v58  ;;  %v5090_v56 = vor.u32 %v6468_v5, %v5087_v34  ;;  %v6727_v48 = vld [vmem:[%s10015_s1 + $0xc04] sm:$0xf]  ;;  %v6123_v58 = vld [vmem:[%s10015_s1 + $0xc94] sm:$0xf0]  ;;  %v5975_v10 = vld [vmem:[%s10015_s1 + $0xb6c] sm:$0xf0] }
 0x15c   : > { %3639 = vmatpush.bf16.msra.mxu3 %v5234_v8  ;;  %v6375_v8 = vld [vmem:[%s10015_s1 + $0x100] sm:$0xf0]  ;;  %v4232_v17 = vmul.f32 %v4158_v12, %v3295_v21  ;;  %v4116_v21 = vmul.f32 %v6825_v54, %v4042_v29  ;;  %v6126_v50 = vor.u32 %v6727_v48, %v6123_v58  ;;  %v3346_v14 = vpop.f32.mrf.mxu1  ;;  %v5827_v29 = vld [vmem:[%s10015_s1 + $0xa44] sm:$0xf0]  ;;  %v6617_v5 = vld [vmem:[%s10015_s1 + $0x894] sm:$0xf] }
 0x15d   : > { %v4268_v59 = vadd.f32 %v4231_v3, %v4115_v18  ;;  %v4642_v31 = vor.u32 %v6375_v8, %v4641_v7  ;;  %v4383_v37 = vadd.f32 %v4309_v0, %v4267_v16  ;;  %v4939_v0 = vld [vmem:[%s10015_s1 + $0x354] sm:$0xf0]  ;;  %v3890_v3 = vperm.slane %v8722_v36, 7  ;;  %v6709_v7 = vld [vmem:[%s10015_s1 + $0xb70] sm:$0xf0]  ;;  %v3307_v8 = vpop.f32.mrf.mxu0 }
 0x15e   : > { %3614 = vmatpush.bf16.msrb.mxu0 %v5082_v32  ;;  %3592 = vmatmul.bf16.vlgmr.msrb.gmra.mxu1 %v7162_v57  ;;  %v5686_v32 = vor.u32 %v6635_v19, %v5685_v6  ;;  %v4269_v2 = vadd.f32 %v4232_v17, %v4116_v21  ;;  %v4942_v9 = vor.u32 %v6431_v63, %v4939_v0  ;;  %v6690_v36 = vld [vmem:[%s10015_s1 + $0xadc] sm:$0xf]  ;;  %v5241_v16 = vld [vmem:[%s10015_s1 + $0x518] sm:$0xf]  ;;  %v6524_v18 = vld [vmem:[%s10015_s1 + $0x5a8] sm:$0xf0] }
 0x15f   : > { %3653 = vmatpush.bf16.msra.mxu1 %v6270_v23  ;;  %3662 = vmatpush.bf16.msra.mxu2 %v5682_v25  ;;  %v6356_v23 = vld [vmem:[%s10015_s1 + $0x6c] sm:$0xf]  ;;  %v4635_v25 = vld [vmem:[%s10015_s1 + $0xfc] sm:$0xf0]  ;;  %v4384_v38 = vadd.f32 %v4310_v11, %v4268_v59  ;;  %v5833_v6 = vld [vmem:[%s10015_s1 + $0x9b8] sm:$0xf]  ;;  %v5978_v59 = vor.u32 %v6690_v36, %v5975_v10 }
 0x160   : > { %3640 = vmatpush.bf16.msra.mxu3 %v5086_v28  ;;  %6330 = vmatmul.msk.bf16.vlgmr.msrb.gmra.mxu2 %vm2904_vm0, %v7096_v24  ;;  %v6764_v28 = vld [vmem:[%s10015_s1 + $0xd2c] sm:$0xf]  ;;  %v9335_v11 = vadd.f32 %v4311_v60, %v4269_v2  ;;  %v5687_v34 = vld [vmem:[%s10015_s1 + $0x924] sm:$0xf0]  ;;  %v5545_v54 = vld [vmem:[%s10015_s1 + $0x770] sm:$0xf] }
 0x161   : > { %v4414_v55 = vpack.c.bf16 %v4384_v38, %v4383_v37  ;;  %v6672_v19 = vld [vmem:[%s10015_s1 + $0xa48] sm:$0xf0]  ;;  %v6487_v38 = vld [vmem:[%s10015_s1 + $0x480] sm:$0xf0]  ;;  %v4945_v48 = vld [vmem:[%s10015_s1 + $0x2c8] sm:$0xf] }
 0x162   : > { %3615 = vmatpush.bf16.msrb.mxu0 %v4934_v53  ;;  %v6746_v53 = vld [vmem:[%s10015_s1 + $0xc98] sm:$0xf0]  ;;  %v5834_v37 = vor.u32 %v6672_v19, %v5833_v6  ;;  %v6580_v58 = vld [vmem:[%s10015_s1 + $0x76c] sm:$0xf]  ;;  %v5539_v21 = vld [vmem:[%s10015_s1 + $0x7fc] sm:$0xf0] }
 0x163   : > { %3654 = vmatpush.bf16.msra.mxu1 %v6122_v41  ;;  %3663 = vmatpush.bf16.msra.mxu2 %v5534_v44  ;;  %v4638_v41 = vor.u32 %v6356_v23, %v4635_v25  ;;  %v3320_v44 = vpop.f32.mrf.mxu2  ;;  %4436 = vst [vmem:[%s8290_s30 + $0x30] sm:$0xff] %v4414_v55  ;;  %v4159_v25 = vperm.slane %v8827_v35, 7  ;;  %v6653_v35 = vld [vmem:[%s10015_s1 + $0x9b4] sm:$0xf]  ;;  %v5094_v55 = vor.u32 %v6487_v38, %v5093_v33  ;;  %v6450_v63 = vld [vmem:[%s10015_s1 + $0x358] sm:$0xf0] }
 0x164   : > { %3641 = vmatpush.bf16.msra.mxu3 %v4938_v51  ;;  %v6274_v51 = vor.u32 %v6764_v28, %v6271_v30  ;;  %v3321_v12 = vadd.f32 %v3320_v44, %v3307_v8  ;;  %v4794_v28 = vor.u32 %v6394_v4, %v4791_v15  ;;  %v4643_v30 = vld [vmem:[%s10015_s1 + $0x104] sm:$0xf0]  ;;  %v4043_v44 = vperm.slane %v8779_v40, 7  ;;  %v6599_v40 = vld [vmem:[%s10015_s1 + $0x800] sm:$0xf0]  ;;  %v3348_v60 = vpop.f32.mrf.mxu1 }
 0x165   : > { %v5830_v46 = vor.u32 %v6653_v35, %v5827_v29  ;;  %v9396_v17 = vld [vmem:[%s10016_s2 + $0x40] ss:$4 sm:$0xff]  ;;  %v4946_v36 = vor.u32 %v6450_v63, %v4945_v48  ;;  %v9520_v48 = vld [vmem:[%s10016_s2 + $0x41] ss:$4 sm:$0xff] }
 0x166   : > { %3616 = vmatpush.bf16.msrb.mxu0 %v4786_v47  ;;  %v3964_v23 = vadd.f32 %v3890_v3, %v3321_v12  ;;  %v6728_v0 = vld [vmem:[%s10015_s1 + $0xc0c] sm:$0xf]  ;;  %v3891_v2 = vperm.slane %v9396_v17, 0  ;;  %v5546_v3 = vor.u32 %v6599_v40, %v5545_v54  ;;  %v5397_v8 = vld [vmem:[%s10015_s1 + $0x648] sm:$0xf] }
 0x167   : > { %3655 = vmatpush.bf16.msra.mxu1 %v5974_v1  ;;  %3664 = vmatpush.bf16.msra.mxu2 %v5386_v42  ;;  %v6130_v1 = vor.u32 %v6746_v53, %v6129_v52  ;;  %v5981_v42 = vld [vmem:[%s10015_s1 + $0xae0] sm:$0xf]  ;;  %v5690_v53 = vor.u32 %v6617_v5, %v5687_v34  ;;  %v6413_v15 = vld [vmem:[%s10015_s1 + $0x230] sm:$0xf0]  ;;  %v6376_v35 = vld [vmem:[%s10015_s1 + $0x108] sm:$0xf0] }
 0x168   : > { %3642 = vmatpush.bf16.msra.mxu3 %v4790_v13  ;;  %v5390_v13 = vor.u32 %v6561_v62, %v5389_v26  ;;  %v5982_v47 = vor.u32 %v6709_v7, %v5981_v42  ;;  %6826 = vtanh.f32 %v3964_v23  ;;  %v4312_v42 = vperm.slane %v8846_v49, 7  ;;  %v4797_v49 = vld [vmem:[%s10015_s1 + $0x1a0] sm:$0xf]  ;;  %v6506_v29 = vld [vmem:[%s10015_s1 + $0x51c] sm:$0xf] }
 0x169   : > { %v5542_v7 = vor.u32 %v6580_v58, %v5539_v21  ;;  %v6654_v33 = vld [vmem:[%s10015_s1 + $0x9bc] sm:$0xf]  ;;  %v5835_v5 = vld [vmem:[%s10015_s1 + $0xa4c] sm:$0xf0]  ;;  %v6285_v34 = vld [vmem:[%s10015_s1 + $0xd38] sm:$0xf] }
 0x16a   : > { %3617 = vmatpush.bf16.msrb.mxu0 %v4638_v41  ;;  %v6279_v41 = vld [vmem:[%s10015_s1 + $0xdc4] sm:$0xf0]  ;;  %v6618_v38 = vld [vmem:[%s10015_s1 + $0x89c] sm:$0xf]  ;;  %v5838_v54 = vor.u32 %v6654_v33, %v5835_v5  ;;  %v6469_v40 = vld [vmem:[%s10015_s1 + $0x3f4] sm:$0xf] }
 0x16b   : > { %3656 = vmatpush.bf16.msra.mxu1 %v5826_v43  ;;  %3665 = vmatpush.bf16.msra.mxu2 %v5238_v27  ;;  %v3322_v22 = vpop.f32.mrf.mxu2  ;;  %v6636_v43 = vld [vmem:[%s10015_s1 + $0x928] sm:$0xf0]  ;;  %v6357_v27 = vld [vmem:[%s10015_s1 + $0x74] sm:$0xf]  ;;  %v6137_v60 = vld [vmem:[%s10015_s1 + $0xc10] sm:$0xf] }
 0x16c   : > { %3643 = vmatpush.bf16.msra.mxu3 %v4642_v31  ;;  %v3333_v31 = vpop.f32.mrf.mxu3  ;;  %v5694_v45 = vor.u32 %v6636_v43, %v5693_v20  ;;  %v4646_v52 = vor.u32 %v6357_v27, %v4643_v30  ;;  %v3892_v20 = vperm.slane %v9396_v17, 1  ;;  %v4649_v43 = vld [vmem:[%s10015_s1 + $0x78] sm:$0xf]  ;;  %v4657_v5 = vld [vmem:[%s10015_s1 + $0x80] sm:$0xf] }
 0x16d   : > { %3618 = vmatmul.bf16.vlgmr.msrb.gmra.mxu0 %v7162_v57  ;;  %v9422_v62 = vadd.f32 %v3346_v14, %v3333_v31  ;;  %v5243_v31 = vld [vmem:[%s10015_s1 + $0x5ac] sm:$0xf0] }
 0x16e   : > { %3679 = vmatpush.bf16.msra.mxu0 %v6274_v51  ;;  %6331 = vmatmul.msk.bf16.vlgmr.msra.gmra.mxu1 %vm2904_vm0, %v7096_v24  ;;  %v3309_v51 = vpop.f32.mrf.mxu0  ;;  %v6827_v26 = vpop.eup %6826 }
 0x16f   : > { %3688 = vmatpush.bf16.msrb.mxu1 %v5686_v32  ;;  %3666 = vmatpush.bf16.msra.mxu2 %v5090_v56  ;;  %v5242_v32 = vor.u32 %v6524_v18, %v5241_v16  ;;  %v6691_v16 = vld [vmem:[%s10015_s1 + $0xae4] sm:$0xf]  ;;  %v5983_v18 = vld [vmem:[%s10015_s1 + $0xb74] sm:$0xf0]  ;;  %v3965_v6 = vadd.f32 %v3891_v2, %v9422_v62  ;;  %v6488_v51 = vld [vmem:[%s10015_s1 + $0x488] sm:$0xf0] }
 0x170   : > { %3705 = vmatpush.bf16.msrb.mxu3 %v6278_v39  ;;  %v6765_v39 = vld [vmem:[%s10015_s1 + $0xd34] sm:$0xf]  ;;  %v5986_v30 = vor.u32 %v6691_v16, %v5983_v18  ;;  %v6710_v18 = vld [vmem:[%s10015_s1 + $0xb78] sm:$0xf0] }
 0x171   : > { %3644 = vmatmul.bf16.vlgmr.msra.gmra.mxu3 %v7162_v57  ;;  %v6282_v56 = vor.u32 %v6765_v39, %v6279_v41  ;;  %6828 = vtanh.f32 %v3965_v6  ;;  %v5695_v39 = vld [vmem:[%s10015_s1 + $0x92c] sm:$0xf0]  ;;  %v6544_v6 = vld [vmem:[%s10015_s1 + $0x64c] sm:$0xf] }
 0x172   : > { %3680 = vmatpush.bf16.msra.mxu0 %v6126_v50  ;;  %v4117_v50 = vmul.f32 %v6827_v26, %v4043_v44  ;;  %v5698_v21 = vor.u32 %v6618_v38, %v5695_v39  ;;  %v5547_v26 = vld [vmem:[%s10015_s1 + $0x804] sm:$0xf0]  ;;  %v6673_v39 = vld [vmem:[%s10015_s1 + $0xa50] sm:$0xf0] }
 0x173   : > { %3689 = vmatpush.bf16.msrb.mxu1 %v5538_v61  ;;  %3667 = vmatpush.bf16.msra.mxu2 %v4942_v9  ;;  %v4233_v61 = vmul.f32 %v4159_v25, %v3321_v12  ;;  %v6562_v9 = vld [vmem:[%s10015_s1 + $0x6d8] sm:$0xf0]  ;;  %v6543_v12 = vld [vmem:[%s10015_s1 + $0x644] sm:$0xf]  ;;  %v5249_v25 = vld [vmem:[%s10015_s1 + $0x520] sm:$0xf]  ;;  %v3359_v44 = vpop.f32.mrf.mxu2 }
 0x174   : > { %3706 = vmatpush.bf16.msrb.mxu3 %v6130_v1  ;;  %v6131_v1 = vld [vmem:[%s10015_s1 + $0xc9c] sm:$0xf0]  ;;  %v3335_v4 = vpop.f32.mrf.mxu3  ;;  %v5398_v19 = vor.u32 %v6562_v9, %v5397_v8  ;;  %v6432_v9 = vld [vmem:[%s10015_s1 + $0x2cc] sm:$0xf] }
 0x175   : > { %v6134_v10 = vor.u32 %v6728_v0, %v6131_v1  ;;  %v4270_v14 = vadd.f32 %v4233_v61, %v4117_v50  ;;  %v6747_v0 = vld [vmem:[%s10015_s1 + $0xca0] sm:$0xf0]  ;;  %v6581_v1 = vld [vmem:[%s10015_s1 + $0x774] sm:$0xf]  ;;  %v4947_v4 = vld [vmem:[%s10015_s1 + $0x35c] sm:$0xf0] }
 0x176   : > { %3681 = vmatpush.bf16.msra.mxu0 %v5978_v59  ;;  %v6525_v59 = vld [vmem:[%s10015_s1 + $0x5b0] sm:$0xf0]  ;;  %v3372_v27 = vpop.f32.mrf.mxu0 }
 0x177   : > { %3690 = vmatpush.bf16.msrb.mxu1 %v5390_v13  ;;  %3668 = vmatpush.bf16.msra.mxu2 %v4794_v28  ;;  %v5391_v13 = vld [vmem:[%s10015_s1 + $0x6d4] sm:$0xf0]  ;;  %v4386_v22 = vadd.f32 %v4312_v42, %v4270_v14  ;;  %v4798_v28 = vor.u32 %v6413_v15, %v4797_v49  ;;  %v4953_v42 = vld [vmem:[%s10015_s1 + $0x2d0] sm:$0xf]  ;;  %v6829_v8 = vpop.eup %6828  ;;  %v5989_v14 = vld [vmem:[%s10015_s1 + $0xae8] sm:$0xf] }
 0x178   : > { %3707 = vmatpush.bf16.msrb.mxu3 %v5982_v47  ;;  %v9453_v47 = vld [vmem:[%s10016_s2 + $0x42] ss:$4 sm:$0xff]  ;;  %v5394_v23 = vor.u32 %v6543_v12, %v5391_v13  ;;  %v6138_v12 = vor.u32 %v6747_v0, %v6137_v60  ;;  %v5550_v13 = vor.u32 %v6581_v1, %v5547_v26 }
 0x179   : > { %v9501_v41 = vsub.f32 1.0, %v9453_v47  ;;  %v4044_v2 = vperm.slane %v9453_v47, 0  ;;  %v4651_v60 = vld [vmem:[%s10015_s1 + $0x10c] sm:$0xf0] }
 0x17a   : > { %3682 = vmatpush.bf16.msra.mxu0 %v5830_v46  ;;  %v5101_v46 = vld [vmem:[%s10015_s1 + $0x3f8] sm:$0xf]  ;;  %v6287_v1 = vld [vmem:[%s10015_s1 + $0xdcc] sm:$0xf0] }
 0x17b   : > { %3691 = vmatpush.bf16.msrb.mxu1 %v5242_v32  ;;  %3669 = vmatpush.bf16.msra.mxu2 %v4646_v52  ;;  %v4415_v32 = vpack.c.bf16 %v4386_v22, %v9335_v11  ;;  %v6784_v11 = vld [vmem:[%s10015_s1 + $0xdc8] sm:$0xf0]  ;;  %v3373_v52 = vadd.f32 %v3372_v27, %v3359_v44  ;;  %v5102_v63 = vor.u32 %v6488_v51, %v5101_v46  ;;  %v4161_v49 = vperm.slane %v9501_v41, 1  ;;  %v3385_v16 = vpop.f32.mrf.mxu1  ;;  %v3361_v27 = vpop.f32.mrf.mxu2  ;;  %v6507_v44 = vld [vmem:[%s10015_s1 + $0x524] sm:$0xf] }
 0x17c   : > { %3708 = vmatpush.bf16.msrb.mxu3 %v5834_v37  ;;  %v5250_v37 = vor.u32 %v6525_v59, %v5249_v25  ;;  %v6286_v58 = vor.u32 %v6784_v11, %v6285_v34  ;;  %v4950_v25 = vor.u32 %v6432_v9, %v4947_v4  ;;  %v4805_v59 = vld [vmem:[%s10015_s1 + $0x1a8] sm:$0xf]  ;;  %v6377_v34 = vld [vmem:[%s10015_s1 + $0x110] sm:$0xf0]  ;;  %v4046_v27 = vperm.slane %v9453_v47, 2 }
 0x17d   : > { %6332 = vmatmul.msk.bf16.vlgmr.msra.gmra.mxu0 %vm2904_vm0, %v7096_v24  ;;  %4437 = vst [vmem:[%s8290_s30 + $0x38] sm:$0xff] %v4415_v32  ;;  %v3966_v61 = vadd.f32 %v3892_v20, %v3373_v52  ;;  %v4118_v20 = vmul.f32 %v6829_v8, %v4044_v2  ;;  %v5990_v32 = vor.u32 %v6710_v18, %v5989_v14 }
 0x17e   : > { %3714 = vmatpush.bf16.msrb.mxu0 %v5690_v53  ;;  %3670 = vmatmul.bf16.vlgmr.msra.gmra.mxu2 %v7162_v57  ;;  %v4650_v53 = vor.u32 %v6376_v35, %v4649_v43  ;;  %v6414_v43 = vld [vmem:[%s10015_s1 + $0x238] sm:$0xf0]  ;;  %v4799_v35 = vld [vmem:[%s10015_s1 + $0x234] sm:$0xf0]  ;;  %v4658_v26 = vor.u32 %v6377_v34, %v4657_v5  ;;  %v5991_v5 = vld [vmem:[%s10015_s1 + $0xb7c] sm:$0xf0] }
 0x17f   : > { %3692 = vmatpush.bf16.msrb.mxu1 %v5094_v55  ;;  %3731 = vmatpush.bf16.msrb.mxu2 %v6282_v56  ;;  %v5095_v55 = vld [vmem:[%s10015_s1 + $0x484] sm:$0xf0]  ;;  %v9515_v56 = vpop.f32.mrf.mxu3  ;;  %6830 = vtanh.f32 %v3966_v61  ;;  %v4806_v38 = vor.u32 %v6414_v43, %v4805_v59  ;;  %v5405_v59 = vld [vmem:[%s10015_s1 + $0x650] sm:$0xf]  ;;  %v6563_v43 = vld [vmem:[%s10015_s1 + $0x6e0] sm:$0xf0] }
 0x180   : > { %3740 = vmatpush.bf16.msra.mxu3 %v5694_v45  ;;  %v5246_v45 = vor.u32 %v6506_v29, %v5243_v31  ;;  %v5098_v50 = vor.u32 %v6469_v40, %v5095_v55  ;;  %v4235_v31 = vmul.f32 %v4161_v49, %v3373_v52  ;;  %v6293_v40 = vld [vmem:[%s10015_s1 + $0xd40] sm:$0xf]  ;;  %v9609_v55 = vadd.f32 %v9515_v56, %v3385_v16  ;;  %v6766_v56 = vld [vmem:[%s10015_s1 + $0xd3c] sm:$0xf]  ;;  %v5553_v49 = vld [vmem:[%s10015_s1 + $0x778] sm:$0xf] }
 0x181   : > { %6333 = vmatmul.msk.bf16.vlgmr.msrb.gmra.mxu3 %vm2904_vm0, %v7096_v24  ;;  %v6290_v14 = vor.u32 %v6766_v56, %v6287_v1  ;;  %v6655_v56 = vld [vmem:[%s10015_s1 + $0x9c4] sm:$0xf]  ;;  %v5843_v1 = vld [vmem:[%s10015_s1 + $0xa54] sm:$0xf0] }
 0x182   : > { %3715 = vmatpush.bf16.msrb.mxu0 %v5542_v7  ;;  %v6451_v7 = vld [vmem:[%s10015_s1 + $0x360] sm:$0xf0] }
 0x183   : > { %3693 = vmatpush.bf16.msrb.mxu1 %v4946_v36  ;;  %3732 = vmatpush.bf16.msrb.mxu2 %v6134_v10  ;;  %v3374_v36 = vpop.f32.mrf.mxu0  ;;  %v4313_v10 = vperm.slane %v9520_v48, 0  ;;  %v4954_v15 = vor.u32 %v6451_v7, %v4953_v42  ;;  %v5103_v42 = vld [vmem:[%s10015_s1 + $0x48c] sm:$0xf0] }
 0x184   : > { %3741 = vmatpush.bf16.msra.mxu3 %v5546_v3  ;;  %v4160_v3 = vperm.slane %v9501_v41, 0  ;;  %v3424_v36 = vpop.f32.mrf.mxu2 }
 0x185   : > { %v6831_v11 = vpop.eup %6830 }
 0x186   : > { %3716 = vmatpush.bf16.msrb.mxu0 %v5394_v23  ;;  %v4234_v22 = vmul.f32 %v4160_v3, %v9422_v62  ;;  %v4045_v23 = vperm.slane %v9453_v47, 1  ;;  %v6395_v62 = vld [vmem:[%s10015_s1 + $0x1a4] sm:$0xf]  ;;  %v3387_v3 = vpop.f32.mrf.mxu1 }
 0x187   : > { %3694 = vmatpush.bf16.msrb.mxu1 %v4798_v28  ;;  %3733 = vmatpush.bf16.msrb.mxu2 %v5986_v30  ;;  %v4314_v28 = vperm.slane %v9520_v48, 1  ;;  %v3893_v30 = vperm.slane %v9396_v17, 2  ;;  %v3400_v29 = vpop.f32.mrf.mxu3  ;;  %v4802_v52 = vor.u32 %v6395_v62, %v4799_v35  ;;  %v5997_v62 = vld [vmem:[%s10015_s1 + $0xaf0] sm:$0xf]  ;;  %v6711_v35 = vld [vmem:[%s10015_s1 + $0xb80] sm:$0xf0] }
 0x188   : > { %3742 = vmatpush.bf16.msra.mxu3 %v5398_v19  ;;  %v5399_v19 = vld [vmem:[%s10015_s1 + $0x6dc] sm:$0xf0]  ;;  %v4271_v46 = vadd.f32 %v4234_v22, %v4118_v20  ;;  %v4119_v51 = vmul.f32 %v6831_v11, %v4045_v23  ;;  %v6433_v22 = vld [vmem:[%s10015_s1 + $0x2d4] sm:$0xf]  ;;  %v4955_v23 = vld [vmem:[%s10015_s1 + $0x364] sm:$0xf0] }
 0x189   : > { %v5402_v33 = vor.u32 %v6544_v6, %v5399_v19  ;;  %v6729_v6 = vld [vmem:[%s10015_s1 + $0xc14] sm:$0xf]  ;;  %v6139_v19 = vld [vmem:[%s10015_s1 + $0xca4] sm:$0xf0] }
 0x18a   : > { %3717 = vmatpush.bf16.msrb.mxu0 %v5246_v45  ;;  %v5251_v45 = vld [vmem:[%s10015_s1 + $0x5b4] sm:$0xf0]  ;;  %v4272_v61 = vadd.f32 %v4235_v31, %v4119_v51  ;;  %v4387_v7 = vadd.f32 %v4313_v10, %v4271_v46  ;;  %v4958_v31 = vor.u32 %v6433_v22, %v4955_v23  ;;  %v5849_v46 = vld [vmem:[%s10015_s1 + $0x9c8] sm:$0xf]  ;;  %v6674_v51 = vld [vmem:[%s10015_s1 + $0xa58] sm:$0xf0] }
 0x18b   : > { %3695 = vmatpush.bf16.msrb.mxu1 %v4650_v53  ;;  %3734 = vmatpush.bf16.msrb.mxu2 %v5838_v54  ;;  %v5701_v53 = vld [vmem:[%s10015_s1 + $0x8a0] sm:$0xf]  ;;  %v6637_v54 = vld [vmem:[%s10015_s1 + $0x930] sm:$0xf0]  ;;  %v5254_v0 = vor.u32 %v6507_v44, %v5251_v45  ;;  %v6145_v10 = vld [vmem:[%s10015_s1 + $0xc18] sm:$0xf]  ;;  %v3411_v29 = vpop.f32.mrf.mxu0  ;;  %v5998_v45 = vor.u32 %v6711_v35, %v5997_v62 }
 0x18c   : > { %3743 = vmatpush.bf16.msra.mxu3 %v5250_v37  ;;  %v5841_v37 = vld [vmem:[%s10015_s1 + $0x9c0] sm:$0xf]  ;;  %v5702_v2 = vor.u32 %v6637_v54, %v5701_v53  ;;  %v4388_v8 = vadd.f32 %v4314_v28, %v4272_v61  ;;  %v3894_v28 = vperm.slane %v9396_v17, 3  ;;  %v3425_v34 = vadd.f32 %v3424_v36, %v3411_v29  ;;  %v6526_v44 = vld [vmem:[%s10015_s1 + $0x5b8] sm:$0xf0]  ;;  %v3426_v53 = vpop.f32.mrf.mxu2 }
 0x18d   : > { %v4162_v54 = vperm.slane %v9501_v41, 2  ;;  %v6359_v61 = vld [vmem:[%s10015_s1 + $0x84] sm:$0xf]  ;;  %v6295_v36 = vld [vmem:[%s10015_s1 + $0xdd4] sm:$0xf0]  ;;  %v3895_v35 = vperm.slane %v9396_v17, 4 }
 0x18e   : > { %3718 = vmatpush.bf16.msrb.mxu0 %v5098_v50  ;;  %3696 = vmatmul.bf16.vlgmr.msrb.gmra.mxu1 %v7162_v57  ;;  %v6470_v50 = vld [vmem:[%s10015_s1 + $0x3fc] sm:$0xf]  ;;  %v4416_v16 = vpack.c.bf16 %v4388_v8, %v4387_v7  ;;  %v3450_v11 = vpop.f32.mrf.mxu1  ;;  %v5703_v7 = vld [vmem:[%s10015_s1 + $0x934] sm:$0xf0]  ;;  %v5850_v8 = vor.u32 %v6674_v51, %v5849_v46  ;;  %v5407_v46 = vld [vmem:[%s10015_s1 + $0x6e4] sm:$0xf0] }
 0x18f   : > { %3757 = vmatpush.bf16.msra.mxu1 %v6286_v58  ;;  %3766 = vmatpush.bf16.msra.mxu2 %v5698_v21  ;;  %v6785_v58 = vld [vmem:[%s10015_s1 + $0xdd0] sm:$0xf0]  ;;  %v6358_v21 = vld [vmem:[%s10015_s1 + $0x7c] sm:$0xf]  ;;  %v5106_v18 = vor.u32 %v6470_v50, %v5103_v42  ;;  %v5109_v50 = vld [vmem:[%s10015_s1 + $0x400] sm:$0xf] }
 0x190   : > { %3744 = vmatpush.bf16.msra.mxu3 %v5102_v63  ;;  %6334 = vmatmul.msk.bf16.vlgmr.msrb.gmra.mxu2 %vm2904_vm0, %v7096_v24  ;;  %v5842_v63 = vor.u32 %v6673_v39, %v5841_v37  ;;  %v6294_v9 = vor.u32 %v6785_v58, %v6293_v40  ;;  %v4654_v4 = vor.u32 %v6358_v21, %v4651_v60  ;;  %v5257_v39 = vld [vmem:[%s10015_s1 + $0x528] sm:$0xf]  ;;  %v4163_v58 = vperm.slane %v9501_v41, 3  ;;  %v6638_v60 = vld [vmem:[%s10015_s1 + $0x938] sm:$0xf0] }
 0x191   : > { %4438 = vst [vmem:[%s8290_s30 + $0x40] sm:$0xff] %v4416_v16  ;;  %v5406_v37 = vor.u32 %v6563_v43, %v5405_v59  ;;  %v3968_v40 = vadd.f32 %v3894_v28, %v3425_v34  ;;  %v5258_v3 = vor.u32 %v6526_v44, %v5257_v39  ;;  %v6619_v42 = vld [vmem:[%s10015_s1 + $0x8a4] sm:$0xf]  ;;  %v6582_v22 = vld [vmem:[%s10015_s1 + $0x77c] sm:$0xf] }
 0x192   : > { %3719 = vmatpush.bf16.msrb.mxu0 %v4950_v25  ;;  %v4237_v59 = vmul.f32 %v4163_v58, %v3425_v34  ;;  %v4961_v43 = vld [vmem:[%s10015_s1 + $0x2d8] sm:$0xf]  ;;  %v4316_v34 = vperm.slane %v9520_v48, 3  ;;  %v6415_v53 = vld [vmem:[%s10015_s1 + $0x240] sm:$0xf0] }
 0x193   : > { %3758 = vmatpush.bf16.msra.mxu1 %v6138_v12  ;;  %3767 = vmatpush.bf16.msra.mxu2 %v5550_v13  ;;  %v6600_v12 = vld [vmem:[%s10015_s1 + $0x808] sm:$0xf0]  ;;  %v3967_v13 = vadd.f32 %v3893_v30, %v9609_v55  ;;  %v6142_v30 = vor.u32 %v6729_v6, %v6139_v19  ;;  %v5561_v6 = vld [vmem:[%s10015_s1 + $0x780] sm:$0xf]  ;;  %v6601_v19 = vld [vmem:[%s10015_s1 + $0x810] sm:$0xf0] }
 0x194   : > { %3745 = vmatpush.bf16.msra.mxu3 %v4954_v15  ;;  %v6748_v15 = vld [vmem:[%s10015_s1 + $0xca8] sm:$0xf0]  ;;  %v5554_v20 = vor.u32 %v6600_v12, %v5553_v49  ;;  %v4047_v49 = vperm.slane %v9453_v47, 3  ;;  %v5562_v29 = vor.u32 %v6601_v19, %v5561_v6 }
 0x195   : > { %v6146_v25 = vor.u32 %v6748_v15, %v6145_v10  ;;  %6832 = vtanh.f32 %v3967_v13  ;;  %v5846_v13 = vor.u32 %v6655_v56, %v5843_v1  ;;  %v4236_v10 = vmul.f32 %v4162_v54, %v9609_v55  ;;  %v3413_v15 = vpop.f32.mrf.mxu0  ;;  %v5555_v55 = vld [vmem:[%s10015_s1 + $0x80c] sm:$0xf0]  ;;  %v6527_v1 = vld [vmem:[%s10015_s1 + $0x5c0] sm:$0xf0] }
 0x196   : > { %3720 = vmatpush.bf16.msrb.mxu0 %v4802_v52  ;;  %v5709_v52 = vld [vmem:[%s10015_s1 + $0x8a8] sm:$0xf]  ;;  %6834 = vtanh.f32 %v3968_v40  ;;  %v5265_v56 = vld [vmem:[%s10015_s1 + $0x530] sm:$0xf] }
 0x197   : > { %3759 = vmatpush.bf16.msra.mxu1 %v5990_v32  ;;  %3768 = vmatpush.bf16.msra.mxu2 %v5402_v33  ;;  %v6396_v32 = vld [vmem:[%s10015_s1 + $0x1ac] sm:$0xf]  ;;  %v5710_v12 = vor.u32 %v6638_v60, %v5709_v52  ;;  %v4813_v52 = vld [vmem:[%s10015_s1 + $0x1b0] sm:$0xf]  ;;  %v5999_v60 = vld [vmem:[%s10015_s1 + $0xb84] sm:$0xf0] }
 0x198   : > { %3746 = vmatpush.bf16.msra.mxu3 %v4806_v38  ;;  %v6692_v33 = vld [vmem:[%s10015_s1 + $0xaec] sm:$0xf]  ;;  %v4807_v38 = vld [vmem:[%s10015_s1 + $0x23c] sm:$0xf0] }
 0x199   : > { %v5994_v21 = vor.u32 %v6692_v33, %v5991_v5 }
 0x19a   : > { %3721 = vmatpush.bf16.msrb.mxu0 %v4654_v4  ;;  %v6767_v4 = vld [vmem:[%s10015_s1 + $0xd44] sm:$0xf] }
 0x19b   : > { %3760 = vmatpush.bf16.msra.mxu1 %v5842_v63  ;;  %3769 = vmatpush.bf16.msra.mxu2 %v5254_v0  ;;  %v4810_v63 = vor.u32 %v6396_v32, %v4807_v38  ;;  %v4659_v0 = vld [vmem:[%s10015_s1 + $0x114] sm:$0xf0]  ;;  %v6298_v23 = vor.u32 %v6767_v4, %v6295_v36  ;;  %v6147_v32 = vld [vmem:[%s10015_s1 + $0xcac] sm:$0xf0]  ;;  %v6564_v38 = vld [vmem:[%s10015_s1 + $0x6e8] sm:$0xf0] }
 0x19c   : > { %3747 = vmatpush.bf16.msra.mxu3 %v4658_v26  ;;  %v6833_v26 = vpop.eup %6832  ;;  %v4662_v16 = vor.u32 %v6359_v61, %v4659_v0  ;;  %v6301_v36 = vld [vmem:[%s10015_s1 + $0xd48] sm:$0xf] }
 0x19d   : > { %3722 = vmatmul.bf16.vlgmr.msrb.gmra.mxu0 %v7162_v57  ;;  %v6835_v28 = vpop.eup %6834 }
 0x19e   : > { %3783 = vmatpush.bf16.msra.mxu0 %v6290_v14  ;;  %6335 = vmatmul.msk.bf16.vlgmr.msra.gmra.mxu1 %vm2904_vm0, %v7096_v24  ;;  %v4120_v14 = vmul.f32 %v6833_v26, %v4046_v27  ;;  %v6452_v27 = vld [vmem:[%s10015_s1 + $0x368] sm:$0xf0]  ;;  %v4121_v5 = vmul.f32 %v6835_v28, %v4047_v49  ;;  %v3476_v26 = vpop.f32.mrf.mxu0  ;;  %v5266_v49 = vor.u32 %v6527_v1, %v5265_v56 }
 0x19f   : > { %3792 = vmatpush.bf16.msrb.mxu1 %v5702_v2  ;;  %3748 = vmatmul.bf16.vlgmr.msra.gmra.mxu3 %v7162_v57  ;;  %v3437_v2 = vpop.f32.mrf.mxu3  ;;  %v4962_v44 = vor.u32 %v6452_v27, %v4961_v43 }
 0x1a0   : > { %3809 = vmatpush.bf16.msrb.mxu3 %v6294_v9  ;;  %3770 = vmatpush.bf16.msra.mxu2 %v5106_v18  ;;  %v6489_v9 = vld [vmem:[%s10015_s1 + $0x490] sm:$0xf0]  ;;  %v5706_v18 = vor.u32 %v6619_v42, %v5703_v7  ;;  %v9761_v62 = vadd.f32 %v3450_v11, %v3437_v2  ;;  %v4273_v33 = vadd.f32 %v4236_v10, %v4120_v14  ;;  %v5413_v11 = vld [vmem:[%s10015_s1 + $0x658] sm:$0xf]  ;;  %v3896_v2 = vperm.slane %v9396_v17, 5 }
 0x1a1   : > { %v4274_v51 = vadd.f32 %v4237_v59, %v4121_v5  ;;  %v5414_v58 = vor.u32 %v6564_v38, %v5413_v11  ;;  %v5259_v42 = vld [vmem:[%s10015_s1 + $0x5bc] sm:$0xf0]  ;;  %v3463_v10 = vpop.f32.mrf.mxu2  ;;  %v4963_v5 = vld [vmem:[%s10015_s1 + $0x36c] sm:$0xf0]  ;;  %v4165_v11 = vperm.slane %v9501_v41, 5  ;;  %v3897_v38 = vperm.slane %v9396_v17, 6 }
 0x1a2   : > { %3784 = vmatpush.bf16.msra.mxu0 %v6142_v30  ;;  %v4315_v30 = vperm.slane %v9520_v48, 2  ;;  %v3969_v40 = vadd.f32 %v3895_v35, %v9761_v62  ;;  %v5851_v14 = vld [vmem:[%s10015_s1 + $0xa5c] sm:$0xf0]  ;;  %v3477_v6 = vadd.f32 %v3476_v26, %v3463_v10 }
 0x1a3   : > { %3793 = vmatpush.bf16.msrb.mxu1 %v5554_v20  ;;  %v5110_v20 = vor.u32 %v6489_v9, %v5109_v50  ;;  %v6508_v50 = vld [vmem:[%s10015_s1 + $0x52c] sm:$0xf]  ;;  %v6378_v9 = vld [vmem:[%s10015_s1 + $0x118] sm:$0xf0]  ;;  %v6153_v35 = vld [vmem:[%s10015_s1 + $0xc20] sm:$0xf] }
 0x1a4   : > { %3810 = vmatpush.bf16.msrb.mxu3 %v6146_v25  ;;  %3771 = vmatpush.bf16.msra.mxu2 %v4958_v31  ;;  %v3452_v25 = vpop.f32.mrf.mxu1  ;;  %v6730_v31 = vld [vmem:[%s10015_s1 + $0xc1c] sm:$0xf]  ;;  %v4389_v61 = vadd.f32 %v4315_v30, %v4273_v33  ;;  %6836 = vtanh.f32 %v3969_v40  ;;  %v5262_v15 = vor.u32 %v6508_v50, %v5259_v42  ;;  %v3970_v27 = vadd.f32 %v3896_v2, %v3477_v6  ;;  %v4969_v30 = vld [vmem:[%s10015_s1 + $0x2e0] sm:$0xf] }
 0x1a5   : > { %v6150_v54 = vor.u32 %v6730_v31, %v6147_v32  ;;  %v4164_v25 = vperm.slane %v9501_v41, 4  ;;  %v6453_v32 = vld [vmem:[%s10015_s1 + $0x370] sm:$0xf0]  ;;  %v6434_v33 = vld [vmem:[%s10015_s1 + $0x2dc] sm:$0xf]  ;;  %v4049_v40 = vperm.slane %v9453_v47, 5  ;;  %v4239_v56 = vmul.f32 %v4165_v11, %v3477_v6 }
 0x1a6   : > { %3785 = vmatpush.bf16.msra.mxu0 %v5994_v21  ;;  %v6693_v21 = vld [vmem:[%s10015_s1 + $0xaf4] sm:$0xf]  ;;  %6838 = vtanh.f32 %v3970_v27  ;;  %v4318_v50 = vperm.slane %v9520_v48, 5  ;;  %v4667_v10 = vld [vmem:[%s10015_s1 + $0x11c] sm:$0xf0]  ;;  %v4167_v11 = vperm.slane %v9501_v41, 7 }
 0x1a7   : > { %3794 = vmatpush.bf16.msrb.mxu1 %v5406_v37  ;;  %v5558_v37 = vor.u32 %v6582_v22, %v5555_v55  ;;  %v3439_v39 = vpop.f32.mrf.mxu3  ;;  %v6002_v4 = vor.u32 %v6693_v21, %v5999_v60  ;;  %v5111_v22 = vld [vmem:[%s10015_s1 + $0x494] sm:$0xf0]  ;;  %v6416_v60 = vld [vmem:[%s10015_s1 + $0x248] sm:$0xf0] }
 0x1a8   : > { %3811 = vmatpush.bf16.msrb.mxu3 %v5998_v45  ;;  %3772 = vmatpush.bf16.msra.mxu2 %v4810_v63  ;;  %v6545_v45 = vld [vmem:[%s10015_s1 + $0x654] sm:$0xf]  ;;  %v4390_v63 = vadd.f32 %v4316_v34, %v4274_v51  ;;  %v6005_v51 = vld [vmem:[%s10015_s1 + $0xaf8] sm:$0xf] }
 0x1a9   : > { %v5410_v0 = vor.u32 %v6545_v45, %v5407_v46  ;;  %v4966_v46 = vor.u32 %v6434_v33, %v4963_v5  ;;  %v4821_v21 = vld [vmem:[%s10015_s1 + $0x1b8] sm:$0xf] }
 0x1aa   : > { %3786 = vmatpush.bf16.msra.mxu0 %v5846_v13  ;;  %v4417_v7 = vpack.c.bf16 %v4390_v63, %v4389_v61  ;;  %v6656_v13 = vld [vmem:[%s10015_s1 + $0x9cc] sm:$0xf]  ;;  %v6837_v34 = vpop.eup %6836  ;;  %v3465_v61 = vpop.f32.mrf.mxu2  ;;  %v6397_v63 = vld [vmem:[%s10015_s1 + $0x1b4] sm:$0xf]  ;;  %v4822_v42 = vor.u32 %v6416_v60, %v4821_v21 }
 0x1ab   : > { %3795 = vmatpush.bf16.msrb.mxu1 %v5258_v3  ;;  %v4814_v3 = vor.u32 %v6415_v53, %v4813_v52  ;;  %v5854_v43 = vor.u32 %v6656_v13, %v5851_v14  ;;  %v6712_v52 = vld [vmem:[%s10015_s1 + $0xb88] sm:$0xf0]  ;;  %v4166_v13 = vperm.slane %v9501_v41, 6 }
 0x1ac   : > { %3812 = vmatpush.bf16.msrb.mxu3 %v5850_v8  ;;  %3773 = vmatpush.bf16.msra.mxu2 %v4662_v16  ;;  %v4665_v8 = vld [vmem:[%s10015_s1 + $0x88] sm:$0xf]  ;;  %4439 = vst [vmem:[%s8290_s30 + $0x48] sm:$0xff] %v4417_v7  ;;  %v3489_v45 = vpop.f32.mrf.mxu1  ;;  %v6006_v26 = vor.u32 %v6712_v52, %v6005_v51  ;;  %v6839_v2 = vpop.eup %6838  ;;  %v5857_v7 = vld [vmem:[%s10015_s1 + $0x9d0] sm:$0xf]  ;;  %v4320_v52 = vperm.slane %v9520_v48, 7 }
 0x1ad   : > { %6336 = vmatmul.msk.bf16.vlgmr.msra.gmra.mxu0 %vm2904_vm0, %v7096_v24  ;;  %v5117_v16 = vld [vmem:[%s10015_s1 + $0x408] sm:$0xf]  ;;  %v4666_v19 = vor.u32 %v6378_v9, %v4665_v8  ;;  %v6675_v8 = vld [vmem:[%s10015_s1 + $0xa60] sm:$0xf0]  ;;  %v6360_v14 = vld [vmem:[%s10015_s1 + $0x8c] sm:$0xf] }
 0x1ae   : > { %3818 = vmatpush.bf16.msrb.mxu0 %v5706_v18  ;;  %v6490_v18 = vld [vmem:[%s10015_s1 + $0x498] sm:$0xf0] }
 0x1af   : > { %3796 = vmatpush.bf16.msrb.mxu1 %v5110_v20  ;;  %3774 = vmatmul.bf16.vlgmr.msra.gmra.mxu2 %v7162_v57  ;;  %v6471_v20 = vld [vmem:[%s10015_s1 + $0x404] sm:$0xf]  ;;  %v3502_v55 = vpop.f32.mrf.mxu3  ;;  %v5118_v28 = vor.u32 %v6490_v18, %v5117_v16  ;;  %v5858_v16 = vor.u32 %v6675_v8, %v5857_v7  ;;  %v4050_v18 = vperm.slane %v9453_v47, 6 }
 0x1b0   : > { %3844 = vmatpush.bf16.msra.mxu3 %v5710_v12  ;;  %3835 = vmatpush.bf16.msrb.mxu2 %v6298_v23  ;;  %v6786_v12 = vld [vmem:[%s10015_s1 + $0xdd8] sm:$0xf0]  ;;  %v4048_v23 = vperm.slane %v9453_v47, 4  ;;  %v5114_v31 = vor.u32 %v6471_v20, %v5111_v22 }
 0x1b1   : > { %6337 = vmatmul.msk.bf16.vlgmr.msrb.gmra.mxu3 %vm2904_vm0, %v7096_v24  ;;  %v6302_v59 = vor.u32 %v6786_v12, %v6301_v36  ;;  %v6379_v12 = vld [vmem:[%s10015_s1 + $0x120] sm:$0xf0] }
 0x1b2   : > { %3819 = vmatpush.bf16.msrb.mxu0 %v5558_v37  ;;  %v3478_v37 = vpop.f32.mrf.mxu0  ;;  %v4122_v53 = vmul.f32 %v6837_v34, %v4048_v23 }
 0x1b3   : > { %3797 = vmatpush.bf16.msrb.mxu1 %v4962_v44  ;;  %v4970_v44 = vor.u32 %v6453_v32, %v4969_v30  ;;  %v3528_v23 = vpop.f32.mrf.mxu2 }
 0x1b4   : > { %3845 = vmatpush.bf16.msra.mxu3 %v5562_v29  ;;  %3836 = vmatpush.bf16.msrb.mxu2 %v6150_v54  ;;  %v6749_v29 = vld [vmem:[%s10015_s1 + $0xcb0] sm:$0xf0]  ;;  %v4238_v54 = vmul.f32 %v4164_v25, %v9761_v62  ;;  %v4815_v62 = vld [vmem:[%s10015_s1 + $0x244] sm:$0xf0] }
 0x1b5   : > { %v6154_v39 = vor.u32 %v6749_v29, %v6153_v35  ;;  %v4818_v36 = vor.u32 %v6397_v63, %v4815_v62  ;;  %v3898_v35 = vperm.slane %v9396_v17, 7  ;;  %v9924_v17 = vld [vmem:[%s10016_s2 + $0x60] ss:$4 sm:$0xff] }
 0x1b6   : > { %3820 = vmatpush.bf16.msrb.mxu0 %v5410_v0  ;;  %v4275_v9 = vadd.f32 %v4238_v54, %v4122_v53  ;;  %v3900_v60 = vperm.slane %v9924_v17, 1 }
 0x1b7   : > { %3798 = vmatpush.bf16.msrb.mxu1 %v4814_v3  ;;  %v3504_v0 = vpop.f32.mrf.mxu3  ;;  %v4317_v3 = vperm.slane %v9520_v48, 4 }
 0x1b8   : > { %3846 = vmatpush.bf16.msra.mxu3 %v5414_v58  ;;  %3837 = vmatpush.bf16.msrb.mxu2 %v6002_v4  ;;  %v3503_v58 = vadd.f32 %v3502_v55, %v3489_v45  ;;  %v4123_v4 = vmul.f32 %v6839_v2, %v4049_v40  ;;  %v4670_v55 = vor.u32 %v6360_v14, %v4667_v10  ;;  %v9931_v40 = vld [vmem:[%s10016_s2 + $0x62] ss:$4 sm:$0xff] }
 0x1b9   : > { %v4391_v20 = vadd.f32 %v4317_v3, %v4275_v9  ;;  %v9936_v61 = vsub.f32 1.0, %v9931_v40  ;;  %v4053_v8 = vperm.slane %v9931_v40, 1 }
 0x1ba   : > { %3821 = vmatpush.bf16.msrb.mxu0 %v5262_v15  ;;  %v3971_v1 = vadd.f32 %v3897_v38, %v3503_v58  ;;  %v4276_v15 = vadd.f32 %v4239_v56, %v4123_v4  ;;  %v4240_v25 = vmul.f32 %v4166_v13, %v3503_v58  ;;  %v3515_v29 = vpop.f32.mrf.mxu0  ;;  %v4051_v38 = vperm.slane %v9453_v47, 7  ;;  %v9945_v4 = vld [vmem:[%s10016_s2 + $0x61] ss:$4 sm:$0xff] }
 0x1bb   : > { %3799 = vmatpush.bf16.msrb.mxu1 %v4666_v19  ;;  %v3491_v19 = vpop.f32.mrf.mxu1  ;;  %v3529_v32 = vadd.f32 %v3528_v23, %v3515_v29  ;;  %v3530_v5 = vpop.f32.mrf.mxu2  ;;  %v4052_v56 = vperm.slane %v9931_v40, 0  ;;  %v4169_v3 = vperm.slane %v9936_v61, 1  ;;  %v4321_v14 = vperm.slane %v9945_v4, 0 }
 0x1bc   : > { %3847 = vmatpush.bf16.msra.mxu3 %v5266_v49  ;;  %3838 = vmatpush.bf16.msrb.mxu2 %v5854_v43  ;;  %6840 = vtanh.f32 %v3971_v1  ;;  %v4673_v49 = vld [vmem:[%s10015_s1 + $0x90] sm:$0xf]  ;;  %v4392_v22 = vadd.f32 %v4318_v50, %v4276_v15  ;;  %v4168_v1 = vperm.slane %v9936_v61, 0  ;;  %v4322_v15 = vperm.slane %v9945_v4, 1 }
 0x1bd   : > { %v4674_v6 = vor.u32 %v6379_v12, %v4673_v49  ;;  %v3972_v34 = vadd.f32 %v3898_v35, %v3529_v32  ;;  %v4054_v29 = vperm.slane %v9931_v40, 2  ;;  %v4171_v5 = vperm.slane %v9936_v61, 3 }
 0x1be   : > { %3800 = vmatmul.bf16.vlgmr.msrb.gmra.mxu1 %v7162_v57  ;;  %3822 = vmatpush.bf16.msrb.mxu0 %v5114_v31  ;;  %v4418_v43 = vpack.c.bf16 %v4392_v22, %v4391_v20 }
 0x1bf   : > { %3861 = vmatpush.bf16.msra.mxu1 %v6302_v59  ;;  %6338 = vmatmul.msk.bf16.vlgmr.msrb.gmra.mxu2 %vm2904_vm0, %v7096_v24  ;;  %6842 = vtanh.f32 %v3972_v34 }
 0x1c0   : > { %3848 = vmatpush.bf16.msra.mxu3 %v5118_v28  ;;  %v4319_v28 = vperm.slane %v9520_v48, 6  ;;  %4440 = vst [vmem:[%s8290_s30 + $0x50] sm:$0xff] %v4418_v43 }
 0x1c2   : > { %3823 = vmatpush.bf16.msrb.mxu0 %v4966_v46  ;;  %v6841_v59 = vpop.eup %6840 }
 0x1c3   : > { %3862 = vmatpush.bf16.msra.mxu1 %v6154_v39  ;;  %v4124_v27 = vmul.f32 %v6841_v59, %v4050_v18  ;;  %v3554_v33 = vpop.f32.mrf.mxu1  ;;  %v3517_v39 = vpop.f32.mrf.mxu0  ;;  %v3901_v18 = vperm.slane %v9924_v17, 2  ;;  %v3902_v59 = vperm.slane %v9924_v17, 3 }
 0x1c4   : > { %3849 = vmatpush.bf16.msra.mxu3 %v4970_v44  ;;  %v3541_v37 = vpop.f32.mrf.mxu3 }
 0x1c5   : > { %v4277_v30 = vadd.f32 %v4240_v25, %v4124_v27  ;;  %v6843_v45 = vpop.eup %6842  ;;  %v3555_v46 = vadd.f32 %v3554_v33, %v3541_v37 }
 0x1c6   : > { %3824 = vmatpush.bf16.msrb.mxu0 %v4818_v36  ;;  %v4125_v51 = vmul.f32 %v6843_v45, %v4051_v38 }
 0x1c7   : > { %3863 = vmatpush.bf16.msra.mxu1 %v6006_v26  ;;  %v4393_v31 = vadd.f32 %v4319_v28, %v4277_v30  ;;  %v4242_v7 = vmul.f32 %v4168_v1, %v3555_v46 }
 0x1c8   : > { %3850 = vmatpush.bf16.msra.mxu3 %v4822_v42 }
 0x1ca   : > { %3825 = vmatpush.bf16.msrb.mxu0 %v4670_v55 }
 0x1cb   : > { %3864 = vmatpush.bf16.msra.mxu1 %v5858_v16  ;;  %v3556_v44 = vpop.f32.mrf.mxu1  ;;  %v3580_v58 = vpop.f32.mrf.mxu0 }
 0x1cc   : > { %3851 = vmatpush.bf16.msra.mxu3 %v4674_v6  ;;  %v3543_v53 = vpop.f32.mrf.mxu3 }
 0x1cd   : > { %3826 = vmatmul.bf16.vlgmr.msrb.gmra.mxu0 %v7162_v57  ;;  %v4324_v53 = vperm.slane %v9945_v4, 3 }
 0x1ce   : > { %6339 = vmatmul.msk.bf16.vlgmr.msra.gmra.mxu1 %vm2904_vm0, %v7096_v24  ;;  %v3899_v24 = vperm.slane %v9924_v17, 0 }
 0x1cf   : > { %3852 = vmatmul.bf16.vlgmr.msra.gmra.mxu3 %v7162_v57  ;;  %v4241_v57 = vmul.f32 %v4167_v11, %v3529_v32  ;;  %v4055_v11 = vperm.slane %v9931_v40, 3 }
 0x1d0   : > { %v3973_v54 = vadd.f32 %v3899_v24, %v3555_v46  ;;  %v3903_v46 = vperm.slane %v9924_v17, 4 }
 0x1d1   : > { %v4278_v41 = vadd.f32 %v4241_v57, %v4125_v51  ;;  %v3567_v63 = vpop.f32.mrf.mxu2  ;;  %v4323_v51 = vperm.slane %v9945_v4, 2 }
 0x1d2   : > { %6844 = vtanh.f32 %v3973_v54  ;;  %v3581_v48 = vadd.f32 %v3580_v58, %v3567_v63 }
 0x1d3   : > { %v4394_v47 = vadd.f32 %v4320_v52, %v4278_v41  ;;  %v3582_v2 = vpop.f32.mrf.mxu0 }
 0x1d4   : > { %v3606_v62 = vpop.f32.mrf.mxu3  ;;  %v3974_v0 = vadd.f32 %v3900_v60, %v3581_v48  ;;  %v4243_v49 = vmul.f32 %v4169_v3, %v3581_v48  ;;  %v3904_v48 = vperm.slane %v9924_v17, 5  ;;  %v4172_v2 = vperm.slane %v9936_v61, 4 }
 0x1d5   : > { %v4419_v21 = vpack.c.bf16 %v4394_v47, %v4393_v31  ;;  %v4170_v31 = vperm.slane %v9936_v61, 2 }
 0x1d6   : > { %6846 = vtanh.f32 %v3974_v0 }
 0x1d7   : > { %4441 = vst [vmem:[%s8290_s30 + $0x58] sm:$0xff] %v4419_v21 }
 0x1d8   : > { %v6845_v26 = vpop.eup %6844 }
 0x1d9   : > { %v4126_v42 = vmul.f32 %v6845_v26, %v4052_v56  ;;  %v3569_v9 = vpop.f32.mrf.mxu2  ;;  %v4056_v26 = vperm.slane %v9931_v40, 4 }
 0x1db   : > { %v3593_v50 = vpop.f32.mrf.mxu1  ;;  %v4279_v13 = vadd.f32 %v4242_v7, %v4126_v42  ;;  %v4173_v42 = vperm.slane %v9936_v61, 5  ;;  %v3905_v7 = vperm.slane %v9924_v17, 6 }
 0x1dc   : > { %v3608_v36 = vpop.f32.mrf.mxu3  ;;  %v6847_v12 = vpop.eup %6846  ;;  %v3607_v16 = vadd.f32 %v3606_v62, %v3593_v50 }
 0x1dd   : > { %v4127_v10 = vmul.f32 %v6847_v12, %v4053_v8  ;;  %v4395_v20 = vadd.f32 %v4321_v14, %v4279_v13 }
 0x1de   : > { %v3975_v23 = vadd.f32 %v3901_v18, %v3607_v16  ;;  %v4244_v37 = vmul.f32 %v4170_v31, %v3607_v16  ;;  %v4325_v18 = vperm.slane %v9945_v4, 4  ;;  %v4327_v31 = vperm.slane %v9945_v4, 6 }
 0x1df   : > { %v4280_v6 = vadd.f32 %v4243_v49, %v4127_v10  ;;  %v4057_v49 = vperm.slane %v9931_v40, 5 }
 0x1e0   : > { %6848 = vtanh.f32 %v3975_v23  ;;  %v4058_v23 = vperm.slane %v9931_v40, 6 }
 0x1e1   : > { %v4396_v22 = vadd.f32 %v4322_v15, %v4280_v6 }
 0x1e3   : > { %v3595_v19 = vpop.f32.mrf.mxu1  ;;  %v3632_v55 = vpop.f32.mrf.mxu2  ;;  %v4420_v25 = vpack.c.bf16 %v4396_v22, %v4395_v20  ;;  %v4326_v20 = vperm.slane %v9945_v4, 5  ;;  %v4174_v22 = vperm.slane %v9936_v61, 6 }
 0x1e5   : > { %4442 = vst [vmem:[%s8290_s30 + $0x60] sm:$0xff] %v4420_v25 }
 0x1e6   : > { %v6849_v32 = vpop.eup %6848 }
 0x1e7   : > { %v4128_v34 = vmul.f32 %v6849_v32, %v4054_v29 }
 0x1e9   : > { %v4281_v24 = vadd.f32 %v4244_v37, %v4128_v34 }
 0x1ea   : > { %v3619_v43 = vpop.f32.mrf.mxu0 }
 0x1eb   : > { %v3633_v27 = vadd.f32 %v3632_v55, %v3619_v43  ;;  %v3658_v28 = vpop.f32.mrf.mxu1  ;;  %v3634_v30 = vpop.f32.mrf.mxu2  ;;  %v4397_v58 = vadd.f32 %v4323_v51, %v4281_v24 }
 0x1ed   : > { %v3976_v35 = vadd.f32 %v3902_v59, %v3633_v27  ;;  %v4245_v44 = vmul.f32 %v4171_v5, %v3633_v27 }
 0x1ef   : > { %6850 = vtanh.f32 %v3976_v35 }
 0x1f2   : > { %v3621_v38 = vpop.f32.mrf.mxu0 }
 0x1f3   : > { %v3660_v39 = vpop.f32.mrf.mxu1 }
 0x1f4   : > { %v3645_v33 = vpop.f32.mrf.mxu3 }
 0x1f5   : > { %v6851_v57 = vpop.eup %6850  ;;  %v3659_v45 = vadd.f32 %v3658_v28, %v3645_v33  ;;  %v3906_v33 = vperm.slane %v9924_v17, 7 }
 0x1f6   : > { %v4129_v52 = vmul.f32 %v6851_v57, %v4055_v11  ;;  %v4175_v57 = vperm.slane %v9936_v61, 7 }
 0x1f7   : > { %v3977_v47 = vadd.f32 %v3903_v46, %v3659_v45  ;;  %v4246_v36 = vmul.f32 %v4172_v2, %v3659_v45  ;;  %v4059_v45 = vperm.slane %v9931_v40, 7  ;;  %v9978_v46 = vld [vmem:[%s10016_s2 + $0x80] ss:$4 sm:$0x1f] }
 0x1f8   : > { %v4282_v54 = vadd.f32 %v4245_v44, %v4129_v52 }
 0x1f9   : > { %6852 = vtanh.f32 %v3977_v47  ;;  %v4328_v47 = vperm.slane %v9945_v4, 7 }
 0x1fa   : > { %v4398_v21 = vadd.f32 %v4324_v53, %v4282_v54  ;;  %v3684_v60 = vpop.f32.mrf.mxu0 }
 0x1fc   : > { %v3647_v41 = vpop.f32.mrf.mxu3  ;;  %v4421_v63 = vpack.c.bf16 %v4398_v21, %v4397_v58 }
 0x1fd   : > { %v3907_v41 = vperm.slane %v9978_v46, 0 }
 0x1fe   : > { %4443 = vst [vmem:[%s8290_s30 + $0x68] sm:$0xff] %v4421_v63  ;;  %v9985_v63 = vld [vmem:[%s10016_s2 + $0x82] ss:$4 sm:$0x1f] }
 0x1ff   : > { %v6853_v3 = vpop.eup %6852  ;;  %v4060_v2 = vperm.slane %v9985_v63, 0 }
 0x200   : > { %v4130_v9 = vmul.f32 %v6853_v3, %v4056_v26 }
 0x201   : > { %v3671_v62 = vpop.f32.mrf.mxu2 }
 0x202   : > { %v3685_v0 = vadd.f32 %v3684_v60, %v3671_v62  ;;  %v3686_v50 = vpop.f32.mrf.mxu0  ;;  %v4283_v6 = vadd.f32 %v4246_v36, %v4130_v9  ;;  %v3908_v62 = vperm.slane %v9978_v46, 1 }
 0x204   : > { %v3710_v56 = vpop.f32.mrf.mxu3  ;;  %v3978_v1 = vadd.f32 %v3904_v48, %v3685_v0  ;;  %v4247_v10 = vmul.f32 %v4173_v42, %v3685_v0  ;;  %v4399_v59 = vadd.f32 %v4325_v18, %v4283_v6  ;;  %v9990_v0 = vsub.f32 1.0, %v9985_v63 }
 0x206   : > { %6854 = vtanh.f32 %v3978_v1  ;;  %v4176_v3 = vperm.slane %v9990_v0, 0 }
 0x209   : > { %v3673_v13 = vpop.f32.mrf.mxu2 }
 0x20a   : > { %v4521_v13 = vld [vmem:[%s10016_s2 + $0x81] ss:$4 sm:$0x1f] }
 0x20b   : > { %v3697_v8 = vpop.f32.mrf.mxu1  ;;  %v4329_v18 = vperm.slane %v4521_v13, 0 }
 0x20c   : > { %v3711_v12 = vadd.f32 %v3710_v56, %v3697_v8  ;;  %v3712_v14 = vpop.f32.mrf.mxu3  ;;  %v6855_v16 = vpop.eup %6854 }
 0x20d   : > { %v4131_v19 = vmul.f32 %v6855_v16, %v4057_v49  ;;  %v4061_v49 = vperm.slane %v9985_v63, 1 }
 0x20e   : > { %v3979_v15 = vadd.f32 %v3905_v7, %v3711_v12  ;;  %v4248_v28 = vmul.f32 %v4174_v22, %v3711_v12  ;;  %v4177_v7 = vperm.slane %v9990_v0, 1  ;;  %v3909_v22 = vperm.slane %v9978_v46, 2 }
 0x20f   : > { %v4284_v55 = vadd.f32 %v4247_v10, %v4131_v19  ;;  %v4330_v19 = vperm.slane %v4521_v13, 1 }
 0x210   : > { %6856 = vtanh.f32 %v3979_v15 }
 0x211   : > { %v4400_v43 = vadd.f32 %v4326_v20, %v4284_v55 }
 0x213   : > { %v3699_v25 = vpop.f32.mrf.mxu1  ;;  %v3736_v27 = vpop.f32.mrf.mxu2  ;;  %v4422_v35 = vpack.c.bf16 %v4400_v43, %v4399_v59 }
 0x215   : > { %4444 = vst [vmem:[%s8290_s30 + $0x70] sm:$0xff] %v4422_v35 }
 0x216   : > { %v6857_v30 = vpop.eup %6856 }
 0x217   : > { %v4132_v29 = vmul.f32 %v6857_v30, %v4058_v23  ;;  %v3910_v30 = vperm.slane %v9978_v46, 3 }
 0x219   : > { %v4285_v32 = vadd.f32 %v4248_v28, %v4132_v29 }
 0x21a   : > { %v3723_v5 = vpop.f32.mrf.mxu0 }
 0x21b   : > { %v4401_v34 = vadd.f32 %v4327_v31, %v4285_v32  ;;  %v3737_v37 = vadd.f32 %v3736_v27, %v3723_v5  ;;  %v3762_v11 = vpop.f32.mrf.mxu1  ;;  %v3738_v38 = vpop.f32.mrf.mxu2  ;;  %v4062_v5 = vperm.slane %v9985_v63, 2 }
 0x21c   : > { %v4178_v38 = vperm.slane %v9990_v0, 2 }
 0x21d   : > { %v3980_v39 = vadd.f32 %v3906_v33, %v3737_v37  ;;  %v4249_v17 = vmul.f32 %v4175_v57, %v3737_v37  ;;  %v4063_v57 = vperm.slane %v9985_v63, 3 }
 0x21f   : > { %6858 = vtanh.f32 %v3980_v39 }
 0x222   : > { %v3749_v44 = vpop.f32.mrf.mxu3  ;;  %v3725_v24 = vpop.f32.mrf.mxu0 }
 0x223   : > { %v3764_v51 = vpop.f32.mrf.mxu1  ;;  %v3763_v53 = vadd.f32 %v3762_v11, %v3749_v44 }
 0x225   : > { %v6859_v52 = vpop.eup %6858  ;;  %v3981_v21 = vadd.f32 %v3907_v41, %v3763_v53  ;;  %v4250_v36 = vmul.f32 %v4176_v3, %v3763_v53  ;;  %v4331_v41 = vperm.slane %v4521_v13, 2 }
 0x226   : > { %v4133_v54 = vmul.f32 %v6859_v52, %v4059_v45  ;;  %v4179_v45 = vperm.slane %v9990_v0, 3 }
 0x227   : > { %6860 = vtanh.f32 %v3981_v21  ;;  %v4180_v21 = vperm.slane %v9990_v0, 4 }
 0x228   : > { %v4286_v61 = vadd.f32 %v4249_v17, %v4133_v54 }
 0x22a   : > { %v3751_v58 = vpop.f32.mrf.mxu3  ;;  %v4402_v40 = vadd.f32 %v4328_v47, %v4286_v61  ;;  %v3788_v60 = vpop.f32.mrf.mxu0  ;;  %v4064_v61 = vperm.slane %v9985_v63, 4 }
 0x22b   : > { %v4332_v58 = vperm.slane %v4521_v13, 3 }
 0x22c   : > { %v4423_v48 = vpack.c.bf16 %v4402_v40, %v4401_v34  ;;  %v3911_v34 = vperm.slane %v9978_v46, 4 }
 0x22d   : > { %v6861_v42 = vpop.eup %6860 }
 0x22e   : > { %4445 = vst [vmem:[%s8290_s30 + $0x78] sm:$0xff] %v4423_v48  ;;  %v4134_v9 = vmul.f32 %v6861_v42, %v4060_v2 }
 0x230   : > { %v4287_v16 = vadd.f32 %v4250_v36, %v4134_v9 }
 0x232   : > { %v3775_v56 = vpop.f32.mrf.mxu2  ;;  %v3790_v50 = vpop.f32.mrf.mxu0  ;;  %v4403_v25 = vadd.f32 %v4329_v18, %v4287_v16 }
 0x233   : > { %v3789_v4 = vadd.f32 %v3788_v60, %v3775_v56 }
 0x234   : > { %v3814_v1 = vpop.f32.mrf.mxu3 }
 0x235   : > { %v3982_v26 = vadd.f32 %v3908_v62, %v3789_v4  ;;  %v4251_v10 = vmul.f32 %v4177_v7, %v3789_v4 }
 0x237   : > { %6862 = vtanh.f32 %v3982_v26  ;;  %v4333_v26 = vperm.slane %v4521_v13, 4 }
 0x23a   : > { %v3777_v12 = vpop.f32.mrf.mxu2 }
 0x23b   : > { %v3801_v8 = vpop.f32.mrf.mxu1 }
 0x23c   : > { %v3816_v14 = vpop.f32.mrf.mxu3  ;;  %v3815_v20 = vadd.f32 %v3814_v1, %v3801_v8 }
 0x23d   : > { %v6863_v15 = vpop.eup %6862 }
 0x23e   : > { %v4135_v6 = vmul.f32 %v6863_v15, %v4061_v49  ;;  %v3983_v27 = vadd.f32 %v3909_v22, %v3815_v20  ;;  %v4252_v52 = vmul.f32 %v4178_v38, %v3815_v20 }
 0x240   : > { %v4288_v55 = vadd.f32 %v4251_v10, %v4135_v6  ;;  %6864 = vtanh.f32 %v3983_v27 }
 0x242   : > { %v4404_v59 = vadd.f32 %v4330_v19, %v4288_v55  ;;  %v3840_v43 = vpop.f32.mrf.mxu2 }
 0x243   : > { %v3803_v23 = vpop.f32.mrf.mxu1 }
 0x244   : > { %v4424_v28 = vpack.c.bf16 %v4404_v59, %v4403_v25 }
 0x246   : > { %4446 = vst [vmem:[%s8290_s30 + $0x80] sm:$0xff] %v4424_v28  ;;  %v6865_v37 = vpop.eup %6864 }
 0x247   : > { %v4136_v44 = vmul.f32 %v6865_v37, %v4062_v5 }
 0x249   : > { %v4289_v54 = vadd.f32 %v4252_v52, %v4136_v44 }
 0x24a   : > { %v3827_v35 = vpop.f32.mrf.mxu0  ;;  %v3842_v32 = vpop.f32.mrf.mxu2 }
 0x24b   : > { %v3841_v29 = vadd.f32 %v3840_v43, %v3827_v35  ;;  %v3866_v31 = vpop.f32.mrf.mxu1  ;;  %v4405_v62 = vadd.f32 %v4331_v41, %v4289_v54 }
 0x24d   : > { %v3984_v33 = vadd.f32 %v3910_v30, %v3841_v29  ;;  %v4253_v47 = vmul.f32 %v4179_v45, %v3841_v29 }
 0x24f   : > { %6866 = vtanh.f32 %v3984_v33 }
 0x252   : > { %v3853_v11 = vpop.f32.mrf.mxu3  ;;  %v3829_v51 = vpop.f32.mrf.mxu0 }
 0x253   : > { %v3867_v39 = vadd.f32 %v3866_v31, %v3853_v11  ;;  %v3868_v17 = vpop.f32.mrf.mxu1 }
 0x255   : > { %v3985_v24 = vadd.f32 %v3911_v34, %v3867_v39  ;;  %v6867_v53 = vpop.eup %6866  ;;  %v4254_v1 = vmul.f32 %v4180_v21, %v3867_v39 }
 0x256   : > { %v4137_v46 = vmul.f32 %v6867_v53, %v4063_v57 }
 0x257   : > { %6868 = vtanh.f32 %v3985_v24 }
 0x258   : > { %v4290_v60 = vadd.f32 %v4253_v47, %v4137_v46 }
 0x25a   : > { %v3855_v40 = vpop.f32.mrf.mxu3  ;;  %v4406_v56 = vadd.f32 %v4332_v58, %v4290_v60 }
 0x25c   : > { %v4425_v2 = vpack.c.bf16 %v4406_v56, %v4405_v62 }
 0x25d   : > { %v6869_v48 = vpop.eup %6868 }
 0x25e   : > { %v4138_v4 = vmul.f32 %v6869_v48, %v4064_v61  ;;  %4447 = vst [vmem:[%s8290_s30 + $0x88] sm:$0xff] %v4425_v2 }
 0x260   : > { %v4291_v3 = vadd.f32 %v4254_v1, %v4138_v4 }
 0x262   : > { %v4407_v50 = vadd.f32 %v4333_v26, %v4291_v3 }
 0x264   : > { %v4426_v42 = vpack.c.bf16 %v4407_v50, %v4407_v50 }
 0x266   : > { %4449 = vst.msk [vmem:[%s8290_s30 + $0x90] sm:$0xf] %vm4448_vm1, %v4426_v42 }
 0x267 PF: > { %s13_s12 = sadd.s32 1, %s6876_s12  }
 0x268   : > { %p10_p4 = scmp.ge.s32.totalorder %s13_s12, 4  }
 0x26a   :  { %12 = sbr.rel (!%p10_p4) target bundleno = 1 (0x1), region = 78 }

</bundles_post_ra>
